<compile_context>
chip_gen: v7x
topology: tpu7x:2x2x1
jax: 0.10.0
libtpu: 0.0.40
codegen_flags: <defaults>
</compile_context>

<pallas_src>
import functools
import numpy as np

import jax
import jax.numpy as jnp
from jax.experimental import pallas as pl
from jax.experimental.pallas import tpu as pltpu

EPS = 1e-6
PAD_IDX = 0
MXU_DTYPE = jnp.bfloat16   # feed the MXU bf16; accumulate in f32


# ----------------------------- kernel helpers -----------------------------

def _layernorm(x, g, b):
    # PyTorch LayerNorm(eps=1e-6), biased variance, f32 statistics.
    mu = jnp.mean(x, axis=-1, keepdims=True)
    var = jnp.mean((x - mu) ** 2, axis=-1, keepdims=True)
    return (x - mu) * jax.lax.rsqrt(var + EPS) * g + b


# ------------------------------- kernels ----------------------------------

def layernorm_kernel(x_ref, g_ref, b_ref, o_ref):
    o_ref[...] = _layernorm(x_ref[...], g_ref[...], b_ref[...])


def encoder_layer_kernel(x_ref, mask_ref,
                         g0_ref, b0_ref,
                         wq_ref, wk_ref, wv_ref, wo_ref,
                         g1_ref, b1_ref,
                         w1_ref, bf1_ref, w2_ref, bf2_ref,
                         g2_ref, b2_ref,
                         o_ref, *, n_head, apply_input_ln):
    x = x_ref[0].astype(jnp.float32)          # (S, D)
    if apply_input_ln:                        # fused pre-stack LayerNorm
        x = _layernorm(x, g0_ref[...], b0_ref[...])

    S, D = x.shape
    dk = D // n_head
    scale = 1.0 / float(np.sqrt(dk))

    xb = x.astype(MXU_DTYPE)
    # QKV projections (bias-free, as in the reference MultiHeadAttention).
    q = jnp.dot(xb, wq_ref[...], preferred_element_type=jnp.float32)
    k = jnp.dot(xb, wk_ref[...], preferred_element_type=jnp.float32)
    v = jnp.dot(xb, wv_ref[...], preferred_element_type=jnp.float32)

    # (S, D) -> (H, S, dk): heads batched into single einsums.
    qh = jnp.transpose((q * scale).reshape(S, n_head, dk), (1, 0, 2))
    kh = jnp.transpose(k.reshape(S, n_head, dk), (1, 0, 2))
    vh = jnp.transpose(v.reshape(S, n_head, dk), (1, 0, 2))

    att = jnp.einsum('hqd,hkd->hqk',
                     qh.astype(MXU_DTYPE), kh.astype(MXU_DTYPE),
                     preferred_element_type=jnp.float32)        # (H, S, S)

    mask = mask_ref[0]                         # (1, S); 1.0 = valid, 0.0 = pad
    att = jnp.where(mask[None, :, :] > 0.0, att, -1e9)          # masked_fill

    # softmax (f32 statistics, EUP reciprocal).
    m = jnp.max(att, axis=-1, keepdims=True)
    e = jnp.exp(att - m)
    l = jnp.sum(e, axis=-1, keepdims=True)
    p = e * pl.reciprocal(l, approx=True)

    ctx = jnp.einsum('hqk,hkd->hqd',
                     p.astype(MXU_DTYPE), vh.astype(MXU_DTYPE),
                     preferred_element_type=jnp.float32)        # (H, S, dk)
    ctx = jnp.transpose(ctx, (1, 0, 2)).reshape(S, D)

    attn_out = jnp.dot(ctx.astype(MXU_DTYPE), wo_ref[...],
                       preferred_element_type=jnp.float32)
    attn_out = attn_out + x                                      # residual
    y = _layernorm(attn_out, g1_ref[...], b1_ref[...])           # post-LN

    # Position-wise FFN: w2(relu(w1(y))) + residual, post-LN.
    h1 = jnp.maximum(
        jnp.dot(y.astype(MXU_DTYPE), w1_ref[...],
                preferred_element_type=jnp.float32) + bf1_ref[...], 0.0)
    f = jnp.dot(h1.astype(MXU_DTYPE), w2_ref[...],
                preferred_element_type=jnp.float32) + bf2_ref[...]
    f = f + y
    o_ref[0] = _layernorm(f, g2_ref[...], b2_ref[...]).astype(o_ref.dtype)


def linear_kernel(x_ref, w_ref, b_ref, o_ref):
    o_ref[...] = (jnp.dot(x_ref[...].astype(MXU_DTYPE), w_ref[...],
                          preferred_element_type=jnp.float32)
                  + b_ref[...]).astype(o_ref.dtype)


# ------------------------------ wrappers -----------------------------------

def _rep2d_1ax(shape):
    # Replicated (non-tiled) 2D operand over a 1-D grid.
    return pl.BlockSpec(shape, lambda i: (0, 0))


def _row_tile(n_rows, cap=256):
    return cap if n_rows >= cap else n_rows


def layernorm_call(x, g, b):
    # Only used when there are zero encoder layers (pre-LN is otherwise fused).
    B, S, D = x.shape
    R = B * S
    TM = _row_tile(R)
    out = pl.pallas_call(
        layernorm_kernel,
        out_shape=jax.ShapeDtypeStruct((R, D), jnp.float32),
        grid=(pl.cdiv(R, TM),),
        in_specs=[pl.BlockSpec((TM, D), lambda i: (i, 0)),
                  _rep2d_1ax(g.shape), _rep2d_1ax(b.shape)],
        out_specs=pl.BlockSpec((TM, D), lambda i: (i, 0)),
        compiler_params=pltpu.CompilerParams(dimension_semantics=("parallel",)),
    )(x.reshape(R, D), g, b)
    return out.reshape(B, S, D)


def encoder_layer_call(x, mask_f, lp, n_head, pre_ln=None):
    B, S, D = x.shape
    d_inner = lp["w1"].shape[1]
    apply_input_ln = pre_ln is not None
    g0, b0 = pre_ln if apply_input_ln else (lp["ln1_g"], lp["ln1_b"])

    # Matmul weights fed to the MXU in bf16; biases / LN params stay f32.
    weights = (g0, b0,
               lp["wq"].astype(MXU_DTYPE), lp["wk"].astype(MXU_DTYPE),
               lp["wv"].astype(MXU_DTYPE), lp["wo"].astype(MXU_DTYPE),
               lp["ln1_g"], lp["ln1_b"],
               lp["w1"].astype(MXU_DTYPE), lp["b1"],
               lp["w2"].astype(MXU_DTYPE), lp["b2"],
               lp["ln2_g"], lp["ln2_b"])

    in_specs = ([pl.BlockSpec((1, S, D), lambda i: (i, 0, 0)),
                 pl.BlockSpec((1, 1, S), lambda i: (i, 0, 0))]
                + [_rep2d_1ax(w.shape) for w in weights])

    flops = int(B * (8 * S * D * D + 4 * S * S * D + 4 * S * D * d_inner))
    transcendentals = int(B * (n_head * S * S + n_head * S + 3 * S))
    bytes_accessed = int(8 * B * S * D + 4 * B * S
                         + 2 * (4 * D * D + 2 * D * d_inner)
                         + 4 * (6 * D + D + d_inner))

    return pl.pallas_call(
        functools.partial(encoder_layer_kernel, n_head=n_head,
                          apply_input_ln=apply_input_ln),
        out_shape=jax.ShapeDtypeStruct((B, S, D), jnp.float32),
        grid=(B,),
        in_specs=in_specs,
        out_specs=pl.BlockSpec((1, S, D), lambda i: (i, 0, 0)),
        compiler_params=pltpu.CompilerParams(
            dimension_semantics=("parallel",),
            vmem_limit_bytes=64 * 1024 * 1024),
        cost_estimate=pl.CostEstimate(flops=flops,
                                      transcendentals=transcendentals,
                                      bytes_accessed=bytes_accessed),
    )(x, mask_f, *weights)


def linear_call(x, w, b):
    # Vocab projection: flatten tokens to lane-dense row tiles and tile V.
    B, S, D = x.shape
    V = w.shape[1]
    R = B * S
    TM = _row_tile(R)
    TN = V if V <= 1024 else 1024

    flops = int(2 * R * D * V)
    bytes_accessed = int(4 * R * D + 2 * D * V + 4 * V + 4 * R * V)

    out = pl.pallas_call(
        linear_kernel,
        out_shape=jax.ShapeDtypeStruct((R, V), jnp.float32),
        grid=(pl.cdiv(R, TM), pl.cdiv(V, TN)),
        in_specs=[pl.BlockSpec((TM, D), lambda i, j: (i, 0)),
                  pl.BlockSpec((D, TN), lambda i, j: (0, j)),
                  pl.BlockSpec((1, TN), lambda i, j: (0, j))],
        out_specs=pl.BlockSpec((TM, TN), lambda i, j: (i, j)),
        compiler_params=pltpu.CompilerParams(
            dimension_semantics=("parallel", "parallel")),
        cost_estimate=pl.CostEstimate(flops=flops, transcendentals=0,
                                      bytes_accessed=bytes_accessed),
    )(x.reshape(R, D), w.astype(MXU_DTYPE), b)
    return out.reshape(B, S, V)


# -------------------------- model setup & forward ---------------------------

def sinusoid_table(n_position, d_hid):
    pos = np.arange(n_position)[:, None].astype(np.float64)
    i = np.arange(d_hid)[None, :]
    angle = pos / np.power(10000.0, 2.0 * (i // 2) / d_hid)
    table = np.zeros((n_position, d_hid), dtype=np.float64)
    table[:, 0::2] = np.sin(angle[:, 0::2])
    table[:, 1::2] = np.cos(angle[:, 1::2])
    return jnp.asarray(table, jnp.float32)


def init_params(key, vocab_size, hidden, n_head, n_layers, max_length):
    d_inner = hidden          # __init__ sets d_inner = hidden_size
    keys = jax.random.split(key, 4 + 8 * n_layers)

    def nrm(k, shape):
        return 0.02 * jax.random.normal(k, shape, jnp.float32)

    params = {
        "emb": nrm(keys[0], (vocab_size, hidden)).at[PAD_IDX].set(0.0),
        "pos_table": sinusoid_table(max_length, hidden),
        "enc_ln_g": jnp.ones((1, hidden), jnp.float32),
        "enc_ln_b": jnp.zeros((1, hidden), jnp.float32),
        "proj_w": nrm(keys[1], (hidden, vocab_size)),
        "proj_b": jnp.zeros((1, vocab_size), jnp.float32),
        "layers": [],
    }
    kidx = 4
    for _ in range(n_layers):
        lp = {
            "wq": nrm(keys[kidx + 0], (hidden, hidden)),
            "wk": nrm(keys[kidx + 1], (hidden, hidden)),
            "wv": nrm(keys[kidx + 2], (hidden, hidden)),
            "wo": nrm(keys[kidx + 3], (hidden, hidden)),
            "ln1_g": jnp.ones((1, hidden), jnp.float32),
            "ln1_b": jnp.zeros((1, hidden), jnp.float32),
            "w1": nrm(keys[kidx + 4], (hidden, d_inner)),
            "b1": jnp.zeros((1, d_inner), jnp.float32),
            "w2": nrm(keys[kidx + 5], (d_inner, hidden)),
            "b2": jnp.zeros((1, hidden), jnp.float32),
            "ln2_g": jnp.ones((1, hidden), jnp.float32),
            "ln2_b": jnp.zeros((1, hidden), jnp.float32),
        }
        kidx += 8
        params["layers"].append(lp)
    return params


def masked_language_model_forward(params, n_head,
                                  inp_seq, inp_seq_len, inp_mask,
                                  target_seq, target_len, target_mask,
                                  masked_positions):
    """model_type='only_encoder' forward. Returns [logits]."""
    B, S = inp_seq.shape
    # get_pad_mask: (B, 1, S), 1.0 = valid token, 0.0 = pad.
    src_mask = (inp_seq != PAD_IDX).astype(jnp.float32)[:, None, :]
    # Embedding gather + positional encoding (glue, plain JAX).
    x = params["emb"][inp_seq] + params["pos_table"][None, :S, :]
    # dropout -> identity (eval). Pre-stack LayerNorm is fused into layer 0.
    layers = params["layers"]
    if not layers:
        x = layernorm_call(x, params["enc_ln_g"], params["enc_ln_b"])
    for li, lp in enumerate(layers):
        pre_ln = (params["enc_ln_g"], params["enc_ln_b"]) if li == 0 else None
        x = encoder_layer_call(x, src_mask, lp, n_head, pre_ln=pre_ln)
    # Final vocab projection (row/vocab tiled Pallas kernel).
    logits = linear_call(x, params["proj_w"], params["proj_b"])
    return [logits]


# ---------------------------------- main ------------------------------------

if __name__ == "__main__":
    B, S = 2, 8
    hidden_size = 32
    vocab_size = 2048          # > 1024 so the vocab-tiled projection grid is exercised
    n_head = 2
    n_layers = 2               # exercises both fused-pre-LN and plain layer paths
    max_length = 500

    key = jax.random.PRNGKey(0)
    k_param, k_seq = jax.random.split(key)

    params = init_params(k_param, vocab_size, hidden_size, n_head,
                         n_layers, max_length)

    inp_seq = jax.random.randint(k_seq, (B, S), 1, vocab_size, jnp.int32)
    inp_seq = inp_seq.at[1, -2:].set(PAD_IDX)        # padding to exercise mask
    inp_seq_len = jnp.array([S, S - 2], jnp.int32)
    inp_mask = (inp_seq != PAD_IDX).astype(jnp.int32)
    target_seq = inp_seq
    target_len = inp_seq_len
    target_mask = inp_mask
    masked_positions = jnp.zeros((B, S), jnp.int32)

    fwd = jax.jit(masked_language_model_forward, static_argnums=(1,))
    out = fwd(params, n_head,
              inp_seq, inp_seq_len, inp_mask,
              target_seq, target_len, target_mask, masked_positions)

    logits = jax.block_until_ready(out[0])
    assert logits.shape == (B, S, vocab_size)
    assert jnp.all(jnp.isfinite(logits))
    print("KERNEL_OK")
</pallas_src>

<mosaic_0001>
module attributes {stable_mosaic.version = 11 : i64} {
  func.func @encoder_layer_kernel(%arg0: i32, %arg1: memref<1x8x32xf32, #tpu.memory_space<vmem>>, %arg2: memref<1x1x8xf32, #tpu.memory_space<vmem>>, %arg3: memref<1x32xf32, #tpu.memory_space<vmem>>, %arg4: memref<1x32xf32, #tpu.memory_space<vmem>>, %arg5: memref<32x32xbf16, #tpu.memory_space<vmem>>, %arg6: memref<32x32xbf16, #tpu.memory_space<vmem>>, %arg7: memref<32x32xbf16, #tpu.memory_space<vmem>>, %arg8: memref<32x32xbf16, #tpu.memory_space<vmem>>, %arg9: memref<1x32xf32, #tpu.memory_space<vmem>>, %arg10: memref<1x32xf32, #tpu.memory_space<vmem>>, %arg11: memref<32x32xbf16, #tpu.memory_space<vmem>>, %arg12: memref<1x32xf32, #tpu.memory_space<vmem>>, %arg13: memref<32x32xbf16, #tpu.memory_space<vmem>>, %arg14: memref<1x32xf32, #tpu.memory_space<vmem>>, %arg15: memref<1x32xf32, #tpu.memory_space<vmem>>, %arg16: memref<1x32xf32, #tpu.memory_space<vmem>>, %arg17: memref<1x8x32xf32, #tpu.memory_space<vmem>>) attributes {dimension_semantics = [#tpu.dimension_semantics<parallel>], iteration_bounds = array<i64: 2>, scalar_prefetch = 0 : i64, scratch_operands = 0 : i64, tpu.core_type = #tpu.core_type<tc>, window_params = [{transform_indices = @transform_0, window_bounds = array<i64: 1, 8, 32>}, {transform_indices = @transform_1, window_bounds = array<i64: 1, 1, 8>}, {pipeline_mode = #tpu.pipeline_mode<synchronous>, transform_indices = @transform_2, window_bounds = array<i64: 1, 32>}, {pipeline_mode = #tpu.pipeline_mode<synchronous>, transform_indices = @transform_3, window_bounds = array<i64: 1, 32>}, {pipeline_mode = #tpu.pipeline_mode<synchronous>, transform_indices = @transform_4, window_bounds = array<i64: 32, 32>}, {pipeline_mode = #tpu.pipeline_mode<synchronous>, transform_indices = @transform_5, window_bounds = array<i64: 32, 32>}, {pipeline_mode = #tpu.pipeline_mode<synchronous>, transform_indices = @transform_6, window_bounds = array<i64: 32, 32>}, {pipeline_mode = #tpu.pipeline_mode<synchronous>, transform_indices = @transform_7, window_bounds = array<i64: 32, 32>}, {pipeline_mode = #tpu.pipeline_mode<synchronous>, transform_indices = @transform_8, window_bounds = array<i64: 1, 32>}, {pipeline_mode = #tpu.pipeline_mode<synchronous>, transform_indices = @transform_9, window_bounds = array<i64: 1, 32>}, {pipeline_mode = #tpu.pipeline_mode<synchronous>, transform_indices = @transform_10, window_bounds = array<i64: 32, 32>}, {pipeline_mode = #tpu.pipeline_mode<synchronous>, transform_indices = @transform_11, window_bounds = array<i64: 1, 32>}, {pipeline_mode = #tpu.pipeline_mode<synchronous>, transform_indices = @transform_12, window_bounds = array<i64: 32, 32>}, {pipeline_mode = #tpu.pipeline_mode<synchronous>, transform_indices = @transform_13, window_bounds = array<i64: 1, 32>}, {pipeline_mode = #tpu.pipeline_mode<synchronous>, transform_indices = @transform_14, window_bounds = array<i64: 1, 32>}, {pipeline_mode = #tpu.pipeline_mode<synchronous>, transform_indices = @transform_15, window_bounds = array<i64: 1, 32>}, {transform_indices = @transform_16, window_bounds = array<i64: 1, 8, 32>}]} {
    %c0 = arith.constant 0 : index
    %c0_0 = arith.constant 0 : index
    %c0_1 = arith.constant 0 : index
    %0 = vector.load %arg1[%c0, %c0_0, %c0_1] : memref<1x8x32xf32, #tpu.memory_space<vmem>>, vector<1x8x32xf32>
    %1 = vector.shape_cast %0 : vector<1x8x32xf32> to vector<8x32xf32>
    %c0_2 = arith.constant 0 : index
    %c0_3 = arith.constant 0 : index
    %2 = vector.load %arg3[%c0_2, %c0_3] : memref<1x32xf32, #tpu.memory_space<vmem>>, vector<1x32xf32>
    %c0_4 = arith.constant 0 : index
    %c0_5 = arith.constant 0 : index
    %3 = vector.load %arg4[%c0_4, %c0_5] : memref<1x32xf32, #tpu.memory_space<vmem>>, vector<1x32xf32>
    %cst = arith.constant dense<0.000000e+00> : vector<8xf32>
    %4 = vector.multi_reduction <add>, %1, %cst [1] : vector<8x32xf32> to vector<8xf32>
    %5 = vector.shape_cast %4 : vector<8xf32> to vector<8x1xf32>
    %cst_6 = arith.constant 3.200000e+01 : f32
    %6 = vector.broadcast %cst_6 : f32 to vector<8x1xf32>
    %7 = arith.divf %5, %6 : vector<8x1xf32>
    %8 = vector.broadcast %7 : vector<8x1xf32> to vector<8x32xf32>
    %9 = arith.subf %1, %8 : vector<8x32xf32>
    %10 = arith.mulf %9, %9 : vector<8x32xf32>
    %cst_7 = arith.constant dense<0.000000e+00> : vector<8xf32>
    %11 = vector.multi_reduction <add>, %10, %cst_7 [1] : vector<8x32xf32> to vector<8xf32>
    %12 = vector.shape_cast %11 : vector<8xf32> to vector<8x1xf32>
    %cst_8 = arith.constant 3.200000e+01 : f32
    %13 = vector.broadcast %cst_8 : f32 to vector<8x1xf32>
    %14 = arith.divf %12, %13 : vector<8x1xf32>
    %15 = vector.broadcast %7 : vector<8x1xf32> to vector<8x32xf32>
    %16 = arith.subf %1, %15 : vector<8x32xf32>
    %cst_9 = arith.constant 9.99999997E-7 : f32
    %17 = vector.broadcast %cst_9 : f32 to vector<8x1xf32>
    %18 = arith.addf %14, %17 : vector<8x1xf32>
    %19 = math.rsqrt %18 : vector<8x1xf32>
    %20 = vector.broadcast %19 : vector<8x1xf32> to vector<8x32xf32>
    %21 = arith.mulf %16, %20 : vector<8x32xf32>
    %22 = vector.broadcast %2 : vector<1x32xf32> to vector<8x32xf32>
    %23 = arith.mulf %21, %22 : vector<8x32xf32>
    %24 = vector.broadcast %3 : vector<1x32xf32> to vector<8x32xf32>
    %25 = arith.addf %23, %24 : vector<8x32xf32>
    %26 = arith.truncf %25 : vector<8x32xf32> to vector<8x32xbf16>
    %c0_10 = arith.constant 0 : index
    %c0_11 = arith.constant 0 : index
    %27 = vector.load %arg5[%c0_10, %c0_11] : memref<32x32xbf16, #tpu.memory_space<vmem>>, vector<32x32xbf16>
    %cst_12 = arith.constant dense<0.000000e+00> : vector<8x32xf32>
    %28 = tpu.matmul %26, %27, %cst_12 {dimension_numbers = #tpu.dot_dimension_numbers<[1], [0], [0], [1], [0, 0, 1, 1], [], []>} : vector<8x32xbf16>, vector<32x32xbf16>, vector<8x32xf32> -> vector<8x32xf32>
    %c0_13 = arith.constant 0 : index
    %c0_14 = arith.constant 0 : index
    %29 = vector.load %arg6[%c0_13, %c0_14] : memref<32x32xbf16, #tpu.memory_space<vmem>>, vector<32x32xbf16>
    %cst_15 = arith.constant dense<0.000000e+00> : vector<8x32xf32>
    %30 = tpu.matmul %26, %29, %cst_15 {dimension_numbers = #tpu.dot_dimension_numbers<[1], [0], [0], [1], [0, 0, 1, 1], [], []>} : vector<8x32xbf16>, vector<32x32xbf16>, vector<8x32xf32> -> vector<8x32xf32>
    %c0_16 = arith.constant 0 : index
    %c0_17 = arith.constant 0 : index
    %31 = vector.load %arg7[%c0_16, %c0_17] : memref<32x32xbf16, #tpu.memory_space<vmem>>, vector<32x32xbf16>
    %cst_18 = arith.constant dense<0.000000e+00> : vector<8x32xf32>
    %32 = tpu.matmul %26, %31, %cst_18 {dimension_numbers = #tpu.dot_dimension_numbers<[1], [0], [0], [1], [0, 0, 1, 1], [], []>} : vector<8x32xbf16>, vector<32x32xbf16>, vector<8x32xf32> -> vector<8x32xf32>
    %cst_19 = arith.constant 2.500000e-01 : f32
    %33 = vector.broadcast %cst_19 : f32 to vector<8x32xf32>
    %34 = arith.mulf %28, %33 : vector<8x32xf32>
    %35 = vector.shape_cast %34 : vector<8x32xf32> to vector<8x2x16xf32>
    %36 = tpu.transpose %35, [1, 0, 2] : vector<8x2x16xf32> -> vector<2x8x16xf32>
    %37 = vector.shape_cast %30 : vector<8x32xf32> to vector<8x2x16xf32>
    %38 = tpu.transpose %37, [1, 0, 2] : vector<8x2x16xf32> -> vector<2x8x16xf32>
    %39 = vector.shape_cast %32 : vector<8x32xf32> to vector<8x2x16xf32>
    %40 = tpu.transpose %39, [1, 0, 2] : vector<8x2x16xf32> -> vector<2x8x16xf32>
    %41 = arith.truncf %36 : vector<2x8x16xf32> to vector<2x8x16xbf16>
    %42 = arith.truncf %38 : vector<2x8x16xf32> to vector<2x8x16xbf16>
    "tpu.trace_start"() <{level = 10 : i32, message = "hqd,hkd->hqk"}> : () -> ()
    %cst_20 = arith.constant dense<0.000000e+00> : vector<2x8x8xf32>
    %43 = tpu.matmul %41, %42, %cst_20 {dimension_numbers = #tpu.dot_dimension_numbers<[2], [2], [1], [1], [0, 0, 0, 1, 1, 1], [0], [0]>} : vector<2x8x16xbf16>, vector<2x8x16xbf16>, vector<2x8x8xf32> -> vector<2x8x8xf32>
    "tpu.trace_stop"() : () -> ()
    %c0_21 = arith.constant 0 : index
    %c0_22 = arith.constant 0 : index
    %c0_23 = arith.constant 0 : index
    %44 = vector.load %arg2[%c0_21, %c0_22, %c0_23] : memref<1x1x8xf32, #tpu.memory_space<vmem>>, vector<1x1x8xf32>
    %45 = vector.shape_cast %44 : vector<1x1x8xf32> to vector<1x8xf32>
    %46 = vector.shape_cast %45 : vector<1x8xf32> to vector<1x1x8xf32>
    %cst_24 = arith.constant 0.000000e+00 : f32
    %47 = vector.broadcast %cst_24 : f32 to vector<1x1x8xf32>
    %48 = arith.cmpf ogt, %46, %47 : vector<1x1x8xf32>
    %cst_25 = arith.constant -1.000000e+09 : f32
    %49 = vector.shape_cast %48 : vector<1x1x8xi1> to vector<1x1x8xi1>
    %50 = vector.broadcast %49 : vector<1x1x8xi1> to vector<2x8x8xi1>
    %51 = vector.broadcast %cst_25 : f32 to vector<2x8x8xf32>
    %52 = arith.select %50, %43, %51 : vector<2x8x8xi1>, vector<2x8x8xf32>
    %cst_26 = arith.constant dense<0xFF800000> : vector<2x8xf32>
    %53 = vector.multi_reduction <maximumf>, %52, %cst_26 [2] : vector<2x8x8xf32> to vector<2x8xf32>
    %54 = vector.shape_cast %53 : vector<2x8xf32> to vector<2x8x1xf32>
    %55 = vector.broadcast %54 : vector<2x8x1xf32> to vector<2x8x8xf32>
    %56 = arith.subf %52, %55 : vector<2x8x8xf32>
    %57 = math.exp %56 : vector<2x8x8xf32>
    %cst_27 = arith.constant dense<0.000000e+00> : vector<2x8xf32>
    %58 = vector.multi_reduction <add>, %57, %cst_27 [2] : vector<2x8x8xf32> to vector<2x8xf32>
    %59 = vector.shape_cast %58 : vector<2x8xf32> to vector<2x8x1xf32>
    %60 = tpu.reciprocal %59 {approx = true} : vector<2x8x1xf32> -> vector<2x8x1xf32>
    %61 = vector.broadcast %60 : vector<2x8x1xf32> to vector<2x8x8xf32>
    %62 = arith.mulf %57, %61 : vector<2x8x8xf32>
    %63 = arith.truncf %62 : vector<2x8x8xf32> to vector<2x8x8xbf16>
    %64 = arith.truncf %40 : vector<2x8x16xf32> to vector<2x8x16xbf16>
    "tpu.trace_start"() <{level = 10 : i32, message = "hqk,hkd->hqd"}> : () -> ()
    %cst_28 = arith.constant dense<0.000000e+00> : vector<2x8x16xf32>
    %65 = tpu.matmul %63, %64, %cst_28 {dimension_numbers = #tpu.dot_dimension_numbers<[2], [1], [1], [2], [0, 0, 0, 1, 1, 2], [0], [0]>} : vector<2x8x8xbf16>, vector<2x8x16xbf16>, vector<2x8x16xf32> -> vector<2x8x16xf32>
    "tpu.trace_stop"() : () -> ()
    %66 = tpu.transpose %65, [1, 0, 2] : vector<2x8x16xf32> -> vector<8x2x16xf32>
    %67 = vector.shape_cast %66 : vector<8x2x16xf32> to vector<8x32xf32>
    %68 = arith.truncf %67 : vector<8x32xf32> to vector<8x32xbf16>
    %c0_29 = arith.constant 0 : index
    %c0_30 = arith.constant 0 : index
    %69 = vector.load %arg8[%c0_29, %c0_30] : memref<32x32xbf16, #tpu.memory_space<vmem>>, vector<32x32xbf16>
    %cst_31 = arith.constant dense<0.000000e+00> : vector<8x32xf32>
    %70 = tpu.matmul %68, %69, %cst_31 {dimension_numbers = #tpu.dot_dimension_numbers<[1], [0], [0], [1], [0, 0, 1, 1], [], []>} : vector<8x32xbf16>, vector<32x32xbf16>, vector<8x32xf32> -> vector<8x32xf32>
    %71 = arith.addf %70, %25 : vector<8x32xf32>
    %c0_32 = arith.constant 0 : index
    %c0_33 = arith.constant 0 : index
    %72 = vector.load %arg9[%c0_32, %c0_33] : memref<1x32xf32, #tpu.memory_space<vmem>>, vector<1x32xf32>
    %c0_34 = arith.constant 0 : index
    %c0_35 = arith.constant 0 : index
    %73 = vector.load %arg10[%c0_34, %c0_35] : memref<1x32xf32, #tpu.memory_space<vmem>>, vector<1x32xf32>
    %cst_36 = arith.constant dense<0.000000e+00> : vector<8xf32>
    %74 = vector.multi_reduction <add>, %71, %cst_36 [1] : vector<8x32xf32> to vector<8xf32>
    %75 = vector.shape_cast %74 : vector<8xf32> to vector<8x1xf32>
    %cst_37 = arith.constant 3.200000e+01 : f32
    %76 = vector.broadcast %cst_37 : f32 to vector<8x1xf32>
    %77 = arith.divf %75, %76 : vector<8x1xf32>
    %78 = vector.broadcast %77 : vector<8x1xf32> to vector<8x32xf32>
    %79 = arith.subf %71, %78 : vector<8x32xf32>
    %80 = arith.mulf %79, %79 : vector<8x32xf32>
    %cst_38 = arith.constant dense<0.000000e+00> : vector<8xf32>
    %81 = vector.multi_reduction <add>, %80, %cst_38 [1] : vector<8x32xf32> to vector<8xf32>
    %82 = vector.shape_cast %81 : vector<8xf32> to vector<8x1xf32>
    %cst_39 = arith.constant 3.200000e+01 : f32
    %83 = vector.broadcast %cst_39 : f32 to vector<8x1xf32>
    %84 = arith.divf %82, %83 : vector<8x1xf32>
    %85 = vector.broadcast %77 : vector<8x1xf32> to vector<8x32xf32>
    %86 = arith.subf %71, %85 : vector<8x32xf32>
    %cst_40 = arith.constant 9.99999997E-7 : f32
    %87 = vector.broadcast %cst_40 : f32 to vector<8x1xf32>
    %88 = arith.addf %84, %87 : vector<8x1xf32>
    %89 = math.rsqrt %88 : vector<8x1xf32>
    %90 = vector.broadcast %89 : vector<8x1xf32> to vector<8x32xf32>
    %91 = arith.mulf %86, %90 : vector<8x32xf32>
    %92 = vector.broadcast %72 : vector<1x32xf32> to vector<8x32xf32>
    %93 = arith.mulf %91, %92 : vector<8x32xf32>
    %94 = vector.broadcast %73 : vector<1x32xf32> to vector<8x32xf32>
    %95 = arith.addf %93, %94 : vector<8x32xf32>
    %96 = arith.truncf %95 : vector<8x32xf32> to vector<8x32xbf16>
    %c0_41 = arith.constant 0 : index
    %c0_42 = arith.constant 0 : index
    %97 = vector.load %arg11[%c0_41, %c0_42] : memref<32x32xbf16, #tpu.memory_space<vmem>>, vector<32x32xbf16>
    %cst_43 = arith.constant dense<0.000000e+00> : vector<8x32xf32>
    %98 = tpu.matmul %96, %97, %cst_43 {dimension_numbers = #tpu.dot_dimension_numbers<[1], [0], [0], [1], [0, 0, 1, 1], [], []>} : vector<8x32xbf16>, vector<32x32xbf16>, vector<8x32xf32> -> vector<8x32xf32>
    %c0_44 = arith.constant 0 : index
    %c0_45 = arith.constant 0 : index
    %99 = vector.load %arg12[%c0_44, %c0_45] : memref<1x32xf32, #tpu.memory_space<vmem>>, vector<1x32xf32>
    %100 = vector.broadcast %99 : vector<1x32xf32> to vector<8x32xf32>
    %101 = arith.addf %98, %100 : vector<8x32xf32>
    %cst_46 = arith.constant 0.000000e+00 : f32
    %102 = vector.broadcast %cst_46 : f32 to vector<8x32xf32>
    %103 = arith.maximumf %101, %102 : vector<8x32xf32>
    %104 = arith.truncf %103 : vector<8x32xf32> to vector<8x32xbf16>
    %c0_47 = arith.constant 0 : index
    %c0_48 = arith.constant 0 : index
    %105 = vector.load %arg13[%c0_47, %c0_48] : memref<32x32xbf16, #tpu.memory_space<vmem>>, vector<32x32xbf16>
    %cst_49 = arith.constant dense<0.000000e+00> : vector<8x32xf32>
    %106 = tpu.matmul %104, %105, %cst_49 {dimension_numbers = #tpu.dot_dimension_numbers<[1], [0], [0], [1], [0, 0, 1, 1], [], []>} : vector<8x32xbf16>, vector<32x32xbf16>, vector<8x32xf32> -> vector<8x32xf32>
    %c0_50 = arith.constant 0 : index
    %c0_51 = arith.constant 0 : index
    %107 = vector.load %arg14[%c0_50, %c0_51] : memref<1x32xf32, #tpu.memory_space<vmem>>, vector<1x32xf32>
    %108 = vector.broadcast %107 : vector<1x32xf32> to vector<8x32xf32>
    %109 = arith.addf %106, %108 : vector<8x32xf32>
    %110 = arith.addf %109, %95 : vector<8x32xf32>
    %c0_52 = arith.constant 0 : index
    %c0_53 = arith.constant 0 : index
    %111 = vector.load %arg15[%c0_52, %c0_53] : memref<1x32xf32, #tpu.memory_space<vmem>>, vector<1x32xf32>
    %c0_54 = arith.constant 0 : index
    %c0_55 = arith.constant 0 : index
    %112 = vector.load %arg16[%c0_54, %c0_55] : memref<1x32xf32, #tpu.memory_space<vmem>>, vector<1x32xf32>
    %cst_56 = arith.constant dense<0.000000e+00> : vector<8xf32>
    %113 = vector.multi_reduction <add>, %110, %cst_56 [1] : vector<8x32xf32> to vector<8xf32>
    %114 = vector.shape_cast %113 : vector<8xf32> to vector<8x1xf32>
    %cst_57 = arith.constant 3.200000e+01 : f32
    %115 = vector.broadcast %cst_57 : f32 to vector<8x1xf32>
    %116 = arith.divf %114, %115 : vector<8x1xf32>
    %117 = vector.broadcast %116 : vector<8x1xf32> to vector<8x32xf32>
    %118 = arith.subf %110, %117 : vector<8x32xf32>
    %119 = arith.mulf %118, %118 : vector<8x32xf32>
    %cst_58 = arith.constant dense<0.000000e+00> : vector<8xf32>
    %120 = vector.multi_reduction <add>, %119, %cst_58 [1] : vector<8x32xf32> to vector<8xf32>
    %121 = vector.shape_cast %120 : vector<8xf32> to vector<8x1xf32>
    %cst_59 = arith.constant 3.200000e+01 : f32
    %122 = vector.broadcast %cst_59 : f32 to vector<8x1xf32>
    %123 = arith.divf %121, %122 : vector<8x1xf32>
    %124 = vector.broadcast %116 : vector<8x1xf32> to vector<8x32xf32>
    %125 = arith.subf %110, %124 : vector<8x32xf32>
    %cst_60 = arith.constant 9.99999997E-7 : f32
    %126 = vector.broadcast %cst_60 : f32 to vector<8x1xf32>
    %127 = arith.addf %123, %126 : vector<8x1xf32>
    %128 = math.rsqrt %127 : vector<8x1xf32>
    %129 = vector.broadcast %128 : vector<8x1xf32> to vector<8x32xf32>
    %130 = arith.mulf %125, %129 : vector<8x32xf32>
    %131 = vector.broadcast %111 : vector<1x32xf32> to vector<8x32xf32>
    %132 = arith.mulf %130, %131 : vector<8x32xf32>
    %133 = vector.broadcast %112 : vector<1x32xf32> to vector<8x32xf32>
    %134 = arith.addf %132, %133 : vector<8x32xf32>
    %c0_61 = arith.constant 0 : index
    %c0_62 = arith.constant 0 : index
    %c0_63 = arith.constant 0 : index
    %135 = vector.load %arg17[%c0_61, %c0_62, %c0_63] : memref<1x8x32xf32, #tpu.memory_space<vmem>>, vector<1x8x32xf32>
    %136 = vector.shape_cast %135 : vector<1x8x32xf32> to vector<8x32xf32>
    %137 = vector.shape_cast %134 : vector<8x32xf32> to vector<1x8x32xf32>
    tpu.vector_store %arg17[%c0_61, %c0_62, %c0_63], %137 {strides = array<i32>} : memref<1x8x32xf32, #tpu.memory_space<vmem>>, vector<1x8x32xf32>,
    return
  }
  func.func @transform_0(%arg0: i32) -> (i32, i32, i32) {
    %c0_i32 = arith.constant 0 : i32
    %c0_i32_0 = arith.constant 0 : i32
    %c0_i32_1 = arith.constant 0 : i32
    return %arg0, %c0_i32, %c0_i32_0 : i32, i32, i32
  }
  func.func @transform_1(%arg0: i32) -> (i32, i32, i32) {
    %c0_i32 = arith.constant 0 : i32
    %c0_i32_0 = arith.constant 0 : i32
    %c0_i32_1 = arith.constant 0 : i32
    return %arg0, %c0_i32, %c0_i32_0 : i32, i32, i32
  }
  func.func @transform_2(%arg0: i32) -> (i32, i32) {
    %c0_i32 = arith.constant 0 : i32
    %c0_i32_0 = arith.constant 0 : i32
    %c0_i32_1 = arith.constant 0 : i32
    return %c0_i32, %c0_i32_0 : i32, i32
  }
  func.func @transform_3(%arg0: i32) -> (i32, i32) {
    %c0_i32 = arith.constant 0 : i32
    %c0_i32_0 = arith.constant 0 : i32
    %c0_i32_1 = arith.constant 0 : i32
    return %c0_i32, %c0_i32_0 : i32, i32
  }
  func.func @transform_4(%arg0: i32) -> (i32, i32) {
    %c0_i32 = arith.constant 0 : i32
    %c0_i32_0 = arith.constant 0 : i32
    %c0_i32_1 = arith.constant 0 : i32
    return %c0_i32, %c0_i32_0 : i32, i32
  }
  func.func @transform_5(%arg0: i32) -> (i32, i32) {
    %c0_i32 = arith.constant 0 : i32
    %c0_i32_0 = arith.constant 0 : i32
    %c0_i32_1 = arith.constant 0 : i32
    return %c0_i32, %c0_i32_0 : i32, i32
  }
  func.func @transform_6(%arg0: i32) -> (i32, i32) {
    %c0_i32 = arith.constant 0 : i32
    %c0_i32_0 = arith.constant 0 : i32
    %c0_i32_1 = arith.constant 0 : i32
    return %c0_i32, %c0_i32_0 : i32, i32
  }
  func.func @transform_7(%arg0: i32) -> (i32, i32) {
    %c0_i32 = arith.constant 0 : i32
    %c0_i32_0 = arith.constant 0 : i32
    %c0_i32_1 = arith.constant 0 : i32
    return %c0_i32, %c0_i32_0 : i32, i32
  }
  func.func @transform_8(%arg0: i32) -> (i32, i32) {
    %c0_i32 = arith.constant 0 : i32
    %c0_i32_0 = arith.constant 0 : i32
    %c0_i32_1 = arith.constant 0 : i32
    return %c0_i32, %c0_i32_0 : i32, i32
  }
  func.func @transform_9(%arg0: i32) -> (i32, i32) {
    %c0_i32 = arith.constant 0 : i32
    %c0_i32_0 = arith.constant 0 : i32
    %c0_i32_1 = arith.constant 0 : i32
    return %c0_i32, %c0_i32_0 : i32, i32
  }
  func.func @transform_10(%arg0: i32) -> (i32, i32) {
    %c0_i32 = arith.constant 0 : i32
    %c0_i32_0 = arith.constant 0 : i32
    %c0_i32_1 = arith.constant 0 : i32
    return %c0_i32, %c0_i32_0 : i32, i32
  }
  func.func @transform_11(%arg0: i32) -> (i32, i32) {
    %c0_i32 = arith.constant 0 : i32
    %c0_i32_0 = arith.constant 0 : i32
    %c0_i32_1 = arith.constant 0 : i32
    return %c0_i32, %c0_i32_0 : i32, i32
  }
  func.func @transform_12(%arg0: i32) -> (i32, i32) {
    %c0_i32 = arith.constant 0 : i32
    %c0_i32_0 = arith.constant 0 : i32
    %c0_i32_1 = arith.constant 0 : i32
    return %c0_i32, %c0_i32_0 : i32, i32
  }
  func.func @transform_13(%arg0: i32) -> (i32, i32) {
    %c0_i32 = arith.constant 0 : i32
    %c0_i32_0 = arith.constant 0 : i32
    %c0_i32_1 = arith.constant 0 : i32
    return %c0_i32, %c0_i32_0 : i32, i32
  }
  func.func @transform_14(%arg0: i32) -> (i32, i32) {
    %c0_i32 = arith.constant 0 : i32
    %c0_i32_0 = arith.constant 0 : i32
    %c0_i32_1 = arith.constant 0 : i32
    return %c0_i32, %c0_i32_0 : i32, i32
  }
  func.func @transform_15(%arg0: i32) -> (i32, i32) {
    %c0_i32 = arith.constant 0 : i32
    %c0_i32_0 = arith.constant 0 : i32
    %c0_i32_1 = arith.constant 0 : i32
    return %c0_i32, %c0_i32_0 : i32, i32
  }
  func.func @transform_16(%arg0: i32) -> (i32, i32, i32) {
    %c0_i32 = arith.constant 0 : i32
    %c0_i32_0 = arith.constant 0 : i32
    %c0_i32_1 = arith.constant 0 : i32
    return %arg0, %c0_i32, %c0_i32_0 : i32, i32, i32
  }
}

module attributes {stable_mosaic.version = 11 : i64} {
  func.func @encoder_layer_kernel(%arg0: i32, %arg1: memref<1x8x32xf32, #tpu.memory_space<vmem>>, %arg2: memref<1x1x8xf32, #tpu.memory_space<vmem>>, %arg3: memref<1x32xf32, #tpu.memory_space<vmem>>, %arg4: memref<1x32xf32, #tpu.memory_space<vmem>>, %arg5: memref<32x32xbf16, #tpu.memory_space<vmem>>, %arg6: memref<32x32xbf16, #tpu.memory_space<vmem>>, %arg7: memref<32x32xbf16, #tpu.memory_space<vmem>>, %arg8: memref<32x32xbf16, #tpu.memory_space<vmem>>, %arg9: memref<1x32xf32, #tpu.memory_space<vmem>>, %arg10: memref<1x32xf32, #tpu.memory_space<vmem>>, %arg11: memref<32x32xbf16, #tpu.memory_space<vmem>>, %arg12: memref<1x32xf32, #tpu.memory_space<vmem>>, %arg13: memref<32x32xbf16, #tpu.memory_space<vmem>>, %arg14: memref<1x32xf32, #tpu.memory_space<vmem>>, %arg15: memref<1x32xf32, #tpu.memory_space<vmem>>, %arg16: memref<1x32xf32, #tpu.memory_space<vmem>>, %arg17: memref<1x8x32xf32, #tpu.memory_space<vmem>>) attributes {dimension_semantics = [#tpu.dimension_semantics<parallel>], iteration_bounds = array<i64: 2>, scalar_prefetch = 0 : i64, scratch_operands = 0 : i64, tpu.core_type = #tpu.core_type<tc>, window_params = [{transform_indices = @transform_0, window_bounds = array<i64: 1, 8, 32>}, {transform_indices = @transform_1, window_bounds = array<i64: 1, 1, 8>}, {pipeline_mode = #tpu.pipeline_mode<synchronous>, transform_indices = @transform_2, window_bounds = array<i64: 1, 32>}, {pipeline_mode = #tpu.pipeline_mode<synchronous>, transform_indices = @transform_3, window_bounds = array<i64: 1, 32>}, {pipeline_mode = #tpu.pipeline_mode<synchronous>, transform_indices = @transform_4, window_bounds = array<i64: 32, 32>}, {pipeline_mode = #tpu.pipeline_mode<synchronous>, transform_indices = @transform_5, window_bounds = array<i64: 32, 32>}, {pipeline_mode = #tpu.pipeline_mode<synchronous>, transform_indices = @transform_6, window_bounds = array<i64: 32, 32>}, {pipeline_mode = #tpu.pipeline_mode<synchronous>, transform_indices = @transform_7, window_bounds = array<i64: 32, 32>}, {pipeline_mode = #tpu.pipeline_mode<synchronous>, transform_indices = @transform_8, window_bounds = array<i64: 1, 32>}, {pipeline_mode = #tpu.pipeline_mode<synchronous>, transform_indices = @transform_9, window_bounds = array<i64: 1, 32>}, {pipeline_mode = #tpu.pipeline_mode<synchronous>, transform_indices = @transform_10, window_bounds = array<i64: 32, 32>}, {pipeline_mode = #tpu.pipeline_mode<synchronous>, transform_indices = @transform_11, window_bounds = array<i64: 1, 32>}, {pipeline_mode = #tpu.pipeline_mode<synchronous>, transform_indices = @transform_12, window_bounds = array<i64: 32, 32>}, {pipeline_mode = #tpu.pipeline_mode<synchronous>, transform_indices = @transform_13, window_bounds = array<i64: 1, 32>}, {pipeline_mode = #tpu.pipeline_mode<synchronous>, transform_indices = @transform_14, window_bounds = array<i64: 1, 32>}, {pipeline_mode = #tpu.pipeline_mode<synchronous>, transform_indices = @transform_15, window_bounds = array<i64: 1, 32>}, {transform_indices = @transform_16, window_bounds = array<i64: 1, 8, 32>}]} {
    %c0 = arith.constant 0 : index
    %c0_0 = arith.constant 0 : index
    %c0_1 = arith.constant 0 : index
    %0 = vector.load %arg1[%c0, %c0_0, %c0_1] : memref<1x8x32xf32, #tpu.memory_space<vmem>>, vector<1x8x32xf32>
    %1 = vector.shape_cast %0 : vector<1x8x32xf32> to vector<8x32xf32>
    %2 = arith.truncf %1 : vector<8x32xf32> to vector<8x32xbf16>
    %c0_2 = arith.constant 0 : index
    %c0_3 = arith.constant 0 : index
    %3 = vector.load %arg5[%c0_2, %c0_3] : memref<32x32xbf16, #tpu.memory_space<vmem>>, vector<32x32xbf16>
    %cst = arith.constant dense<0.000000e+00> : vector<8x32xf32>
    %4 = tpu.matmul %2, %3, %cst {dimension_numbers = #tpu.dot_dimension_numbers<[1], [0], [0], [1], [0, 0, 1, 1], [], []>} : vector<8x32xbf16>, vector<32x32xbf16>, vector<8x32xf32> -> vector<8x32xf32>
    %c0_4 = arith.constant 0 : index
    %c0_5 = arith.constant 0 : index
    %5 = vector.load %arg6[%c0_4, %c0_5] : memref<32x32xbf16, #tpu.memory_space<vmem>>, vector<32x32xbf16>
    %cst_6 = arith.constant dense<0.000000e+00> : vector<8x32xf32>
    %6 = tpu.matmul %2, %5, %cst_6 {dimension_numbers = #tpu.dot_dimension_numbers<[1], [0], [0], [1], [0, 0, 1, 1], [], []>} : vector<8x32xbf16>, vector<32x32xbf16>, vector<8x32xf32> -> vector<8x32xf32>
    %c0_7 = arith.constant 0 : index
    %c0_8 = arith.constant 0 : index
    %7 = vector.load %arg7[%c0_7, %c0_8] : memref<32x32xbf16, #tpu.memory_space<vmem>>, vector<32x32xbf16>
    %cst_9 = arith.constant dense<0.000000e+00> : vector<8x32xf32>
    %8 = tpu.matmul %2, %7, %cst_9 {dimension_numbers = #tpu.dot_dimension_numbers<[1], [0], [0], [1], [0, 0, 1, 1], [], []>} : vector<8x32xbf16>, vector<32x32xbf16>, vector<8x32xf32> -> vector<8x32xf32>
    %cst_10 = arith.constant 2.500000e-01 : f32
    %9 = vector.broadcast %cst_10 : f32 to vector<8x32xf32>
    %10 = arith.mulf %4, %9 : vector<8x32xf32>
    %11 = vector.shape_cast %10 : vector<8x32xf32> to vector<8x2x16xf32>
    %12 = tpu.transpose %11, [1, 0, 2] : vector<8x2x16xf32> -> vector<2x8x16xf32>
    %13 = vector.shape_cast %6 : vector<8x32xf32> to vector<8x2x16xf32>
    %14 = tpu.transpose %13, [1, 0, 2] : vector<8x2x16xf32> -> vector<2x8x16xf32>
    %15 = vector.shape_cast %8 : vector<8x32xf32> to vector<8x2x16xf32>
    %16 = tpu.transpose %15, [1, 0, 2] : vector<8x2x16xf32> -> vector<2x8x16xf32>
    %17 = arith.truncf %12 : vector<2x8x16xf32> to vector<2x8x16xbf16>
    %18 = arith.truncf %14 : vector<2x8x16xf32> to vector<2x8x16xbf16>
    "tpu.trace_start"() <{level = 10 : i32, message = "hqd,hkd->hqk"}> : () -> ()
    %cst_11 = arith.constant dense<0.000000e+00> : vector<2x8x8xf32>
    %19 = tpu.matmul %17, %18, %cst_11 {dimension_numbers = #tpu.dot_dimension_numbers<[2], [2], [1], [1], [0, 0, 0, 1, 1, 1], [0], [0]>} : vector<2x8x16xbf16>, vector<2x8x16xbf16>, vector<2x8x8xf32> -> vector<2x8x8xf32>
    "tpu.trace_stop"() : () -> ()
    %c0_12 = arith.constant 0 : index
    %c0_13 = arith.constant 0 : index
    %c0_14 = arith.constant 0 : index
    %20 = vector.load %arg2[%c0_12, %c0_13, %c0_14] : memref<1x1x8xf32, #tpu.memory_space<vmem>>, vector<1x1x8xf32>
    %21 = vector.shape_cast %20 : vector<1x1x8xf32> to vector<1x8xf32>
    %22 = vector.shape_cast %21 : vector<1x8xf32> to vector<1x1x8xf32>
    %cst_15 = arith.constant 0.000000e+00 : f32
    %23 = vector.broadcast %cst_15 : f32 to vector<1x1x8xf32>
    %24 = arith.cmpf ogt, %22, %23 : vector<1x1x8xf32>
    %cst_16 = arith.constant -1.000000e+09 : f32
    %25 = vector.shape_cast %24 : vector<1x1x8xi1> to vector<1x1x8xi1>
    %26 = vector.broadcast %25 : vector<1x1x8xi1> to vector<2x8x8xi1>
    %27 = vector.broadcast %cst_16 : f32 to vector<2x8x8xf32>
    %28 = arith.select %26, %19, %27 : vector<2x8x8xi1>, vector<2x8x8xf32>
    %cst_17 = arith.constant dense<0xFF800000> : vector<2x8xf32>
    %29 = vector.multi_reduction <maximumf>, %28, %cst_17 [2] : vector<2x8x8xf32> to vector<2x8xf32>
    %30 = vector.shape_cast %29 : vector<2x8xf32> to vector<2x8x1xf32>
    %31 = vector.broadcast %30 : vector<2x8x1xf32> to vector<2x8x8xf32>
    %32 = arith.subf %28, %31 : vector<2x8x8xf32>
    %33 = math.exp %32 : vector<2x8x8xf32>
    %cst_18 = arith.constant dense<0.000000e+00> : vector<2x8xf32>
    %34 = vector.multi_reduction <add>, %33, %cst_18 [2] : vector<2x8x8xf32> to vector<2x8xf32>
    %35 = vector.shape_cast %34 : vector<2x8xf32> to vector<2x8x1xf32>
    %36 = tpu.reciprocal %35 {approx = true} : vector<2x8x1xf32> -> vector<2x8x1xf32>
    %37 = vector.broadcast %36 : vector<2x8x1xf32> to vector<2x8x8xf32>
    %38 = arith.mulf %33, %37 : vector<2x8x8xf32>
    %39 = arith.truncf %38 : vector<2x8x8xf32> to vector<2x8x8xbf16>
    %40 = arith.truncf %16 : vector<2x8x16xf32> to vector<2x8x16xbf16>
    "tpu.trace_start"() <{level = 10 : i32, message = "hqk,hkd->hqd"}> : () -> ()
    %cst_19 = arith.constant dense<0.000000e+00> : vector<2x8x16xf32>
    %41 = tpu.matmul %39, %40, %cst_19 {dimension_numbers = #tpu.dot_dimension_numbers<[2], [1], [1], [2], [0, 0, 0, 1, 1, 2], [0], [0]>} : vector<2x8x8xbf16>, vector<2x8x16xbf16>, vector<2x8x16xf32> -> vector<2x8x16xf32>
    "tpu.trace_stop"() : () -> ()
    %42 = tpu.transpose %41, [1, 0, 2] : vector<2x8x16xf32> -> vector<8x2x16xf32>
    %43 = vector.shape_cast %42 : vector<8x2x16xf32> to vector<8x32xf32>
    %44 = arith.truncf %43 : vector<8x32xf32> to vector<8x32xbf16>
    %c0_20 = arith.constant 0 : index
    %c0_21 = arith.constant 0 : index
    %45 = vector.load %arg8[%c0_20, %c0_21] : memref<32x32xbf16, #tpu.memory_space<vmem>>, vector<32x32xbf16>
    %cst_22 = arith.constant dense<0.000000e+00> : vector<8x32xf32>
    %46 = tpu.matmul %44, %45, %cst_22 {dimension_numbers = #tpu.dot_dimension_numbers<[1], [0], [0], [1], [0, 0, 1, 1], [], []>} : vector<8x32xbf16>, vector<32x32xbf16>, vector<8x32xf32> -> vector<8x32xf32>
    %47 = arith.addf %46, %1 : vector<8x32xf32>
    %c0_23 = arith.constant 0 : index
    %c0_24 = arith.constant 0 : index
    %48 = vector.load %arg9[%c0_23, %c0_24] : memref<1x32xf32, #tpu.memory_space<vmem>>, vector<1x32xf32>
    %c0_25 = arith.constant 0 : index
    %c0_26 = arith.constant 0 : index
    %49 = vector.load %arg10[%c0_25, %c0_26] : memref<1x32xf32, #tpu.memory_space<vmem>>, vector<1x32xf32>
    %cst_27 = arith.constant dense<0.000000e+00> : vector<8xf32>
    %50 = vector.multi_reduction <add>, %47, %cst_27 [1] : vector<8x32xf32> to vector<8xf32>
    %51 = vector.shape_cast %50 : vector<8xf32> to vector<8x1xf32>
    %cst_28 = arith.constant 3.200000e+01 : f32
    %52 = vector.broadcast %cst_28 : f32 to vector<8x1xf32>
    %53 = arith.divf %51, %52 : vector<8x1xf32>
    %54 = vector.broadcast %53 : vector<8x1xf32> to vector<8x32xf32>
    %55 = arith.subf %47, %54 : vector<8x32xf32>
    %56 = arith.mulf %55, %55 : vector<8x32xf32>
    %cst_29 = arith.constant dense<0.000000e+00> : vector<8xf32>
    %57 = vector.multi_reduction <add>, %56, %cst_29 [1] : vector<8x32xf32> to vector<8xf32>
    %58 = vector.shape_cast %57 : vector<8xf32> to vector<8x1xf32>
    %cst_30 = arith.constant 3.200000e+01 : f32
    %59 = vector.broadcast %cst_30 : f32 to vector<8x1xf32>
    %60 = arith.divf %58, %59 : vector<8x1xf32>
    %61 = vector.broadcast %53 : vector<8x1xf32> to vector<8x32xf32>
    %62 = arith.subf %47, %61 : vector<8x32xf32>
    %cst_31 = arith.constant 9.99999997E-7 : f32
    %63 = vector.broadcast %cst_31 : f32 to vector<8x1xf32>
    %64 = arith.addf %60, %63 : vector<8x1xf32>
    %65 = math.rsqrt %64 : vector<8x1xf32>
    %66 = vector.broadcast %65 : vector<8x1xf32> to vector<8x32xf32>
    %67 = arith.mulf %62, %66 : vector<8x32xf32>
    %68 = vector.broadcast %48 : vector<1x32xf32> to vector<8x32xf32>
    %69 = arith.mulf %67, %68 : vector<8x32xf32>
    %70 = vector.broadcast %49 : vector<1x32xf32> to vector<8x32xf32>
    %71 = arith.addf %69, %70 : vector<8x32xf32>
    %72 = arith.truncf %71 : vector<8x32xf32> to vector<8x32xbf16>
    %c0_32 = arith.constant 0 : index
    %c0_33 = arith.constant 0 : index
    %73 = vector.load %arg11[%c0_32, %c0_33] : memref<32x32xbf16, #tpu.memory_space<vmem>>, vector<32x32xbf16>
    %cst_34 = arith.constant dense<0.000000e+00> : vector<8x32xf32>
    %74 = tpu.matmul %72, %73, %cst_34 {dimension_numbers = #tpu.dot_dimension_numbers<[1], [0], [0], [1], [0, 0, 1, 1], [], []>} : vector<8x32xbf16>, vector<32x32xbf16>, vector<8x32xf32> -> vector<8x32xf32>
    %c0_35 = arith.constant 0 : index
    %c0_36 = arith.constant 0 : index
    %75 = vector.load %arg12[%c0_35, %c0_36] : memref<1x32xf32, #tpu.memory_space<vmem>>, vector<1x32xf32>
    %76 = vector.broadcast %75 : vector<1x32xf32> to vector<8x32xf32>
    %77 = arith.addf %74, %76 : vector<8x32xf32>
    %cst_37 = arith.constant 0.000000e+00 : f32
    %78 = vector.broadcast %cst_37 : f32 to vector<8x32xf32>
    %79 = arith.maximumf %77, %78 : vector<8x32xf32>
    %80 = arith.truncf %79 : vector<8x32xf32> to vector<8x32xbf16>
    %c0_38 = arith.constant 0 : index
    %c0_39 = arith.constant 0 : index
    %81 = vector.load %arg13[%c0_38, %c0_39] : memref<32x32xbf16, #tpu.memory_space<vmem>>, vector<32x32xbf16>
    %cst_40 = arith.constant dense<0.000000e+00> : vector<8x32xf32>
    %82 = tpu.matmul %80, %81, %cst_40 {dimension_numbers = #tpu.dot_dimension_numbers<[1], [0], [0], [1], [0, 0, 1, 1], [], []>} : vector<8x32xbf16>, vector<32x32xbf16>, vector<8x32xf32> -> vector<8x32xf32>
    %c0_41 = arith.constant 0 : index
    %c0_42 = arith.constant 0 : index
    %83 = vector.load %arg14[%c0_41, %c0_42] : memref<1x32xf32, #tpu.memory_space<vmem>>, vector<1x32xf32>
    %84 = vector.broadcast %83 : vector<1x32xf32> to vector<8x32xf32>
    %85 = arith.addf %82, %84 : vector<8x32xf32>
    %86 = arith.addf %85, %71 : vector<8x32xf32>
    %c0_43 = arith.constant 0 : index
    %c0_44 = arith.constant 0 : index
    %87 = vector.load %arg15[%c0_43, %c0_44] : memref<1x32xf32, #tpu.memory_space<vmem>>, vector<1x32xf32>
    %c0_45 = arith.constant 0 : index
    %c0_46 = arith.constant 0 : index
    %88 = vector.load %arg16[%c0_45, %c0_46] : memref<1x32xf32, #tpu.memory_space<vmem>>, vector<1x32xf32>
    %cst_47 = arith.constant dense<0.000000e+00> : vector<8xf32>
    %89 = vector.multi_reduction <add>, %86, %cst_47 [1] : vector<8x32xf32> to vector<8xf32>
    %90 = vector.shape_cast %89 : vector<8xf32> to vector<8x1xf32>
    %cst_48 = arith.constant 3.200000e+01 : f32
    %91 = vector.broadcast %cst_48 : f32 to vector<8x1xf32>
    %92 = arith.divf %90, %91 : vector<8x1xf32>
    %93 = vector.broadcast %92 : vector<8x1xf32> to vector<8x32xf32>
    %94 = arith.subf %86, %93 : vector<8x32xf32>
    %95 = arith.mulf %94, %94 : vector<8x32xf32>
    %cst_49 = arith.constant dense<0.000000e+00> : vector<8xf32>
    %96 = vector.multi_reduction <add>, %95, %cst_49 [1] : vector<8x32xf32> to vector<8xf32>
    %97 = vector.shape_cast %96 : vector<8xf32> to vector<8x1xf32>
    %cst_50 = arith.constant 3.200000e+01 : f32
    %98 = vector.broadcast %cst_50 : f32 to vector<8x1xf32>
    %99 = arith.divf %97, %98 : vector<8x1xf32>
    %100 = vector.broadcast %92 : vector<8x1xf32> to vector<8x32xf32>
    %101 = arith.subf %86, %100 : vector<8x32xf32>
    %cst_51 = arith.constant 9.99999997E-7 : f32
    %102 = vector.broadcast %cst_51 : f32 to vector<8x1xf32>
    %103 = arith.addf %99, %102 : vector<8x1xf32>
    %104 = math.rsqrt %103 : vector<8x1xf32>
    %105 = vector.broadcast %104 : vector<8x1xf32> to vector<8x32xf32>
    %106 = arith.mulf %101, %105 : vector<8x32xf32>
    %107 = vector.broadcast %87 : vector<1x32xf32> to vector<8x32xf32>
    %108 = arith.mulf %106, %107 : vector<8x32xf32>
    %109 = vector.broadcast %88 : vector<1x32xf32> to vector<8x32xf32>
    %110 = arith.addf %108, %109 : vector<8x32xf32>
    %c0_52 = arith.constant 0 : index
    %c0_53 = arith.constant 0 : index
    %c0_54 = arith.constant 0 : index
    %111 = vector.load %arg17[%c0_52, %c0_53, %c0_54] : memref<1x8x32xf32, #tpu.memory_space<vmem>>, vector<1x8x32xf32>
    %112 = vector.shape_cast %111 : vector<1x8x32xf32> to vector<8x32xf32>
    %113 = vector.shape_cast %110 : vector<8x32xf32> to vector<1x8x32xf32>
    tpu.vector_store %arg17[%c0_52, %c0_53, %c0_54], %113 {strides = array<i32>} : memref<1x8x32xf32, #tpu.memory_space<vmem>>, vector<1x8x32xf32>,
    return
  }
  func.func @transform_0(%arg0: i32) -> (i32, i32, i32) {
    %c0_i32 = arith.constant 0 : i32
    %c0_i32_0 = arith.constant 0 : i32
    %c0_i32_1 = arith.constant 0 : i32
    return %arg0, %c0_i32, %c0_i32_0 : i32, i32, i32
  }
  func.func @transform_1(%arg0: i32) -> (i32, i32, i32) {
    %c0_i32 = arith.constant 0 : i32
    %c0_i32_0 = arith.constant 0 : i32
    %c0_i32_1 = arith.constant 0 : i32
    return %arg0, %c0_i32, %c0_i32_0 : i32, i32, i32
  }
  func.func @transform_2(%arg0: i32) -> (i32, i32) {
    %c0_i32 = arith.constant 0 : i32
    %c0_i32_0 = arith.constant 0 : i32
    %c0_i32_1 = arith.constant 0 : i32
    return %c0_i32, %c0_i32_0 : i32, i32
  }
  func.func @transform_3(%arg0: i32) -> (i32, i32) {
    %c0_i32 = arith.constant 0 : i32
    %c0_i32_0 = arith.constant 0 : i32
    %c0_i32_1 = arith.constant 0 : i32
    return %c0_i32, %c0_i32_0 : i32, i32
  }
  func.func @transform_4(%arg0: i32) -> (i32, i32) {
    %c0_i32 = arith.constant 0 : i32
    %c0_i32_0 = arith.constant 0 : i32
    %c0_i32_1 = arith.constant 0 : i32
    return %c0_i32, %c0_i32_0 : i32, i32
  }
  func.func @transform_5(%arg0: i32) -> (i32, i32) {
    %c0_i32 = arith.constant 0 : i32
    %c0_i32_0 = arith.constant 0 : i32
    %c0_i32_1 = arith.constant 0 : i32
    return %c0_i32, %c0_i32_0 : i32, i32
  }
  func.func @transform_6(%arg0: i32) -> (i32, i32) {
    %c0_i32 = arith.constant 0 : i32
    %c0_i32_0 = arith.constant 0 : i32
    %c0_i32_1 = arith.constant 0 : i32
    return %c0_i32, %c0_i32_0 : i32, i32
  }
  func.func @transform_7(%arg0: i32) -> (i32, i32) {
    %c0_i32 = arith.constant 0 : i32
    %c0_i32_0 = arith.constant 0 : i32
    %c0_i32_1 = arith.constant 0 : i32
    return %c0_i32, %c0_i32_0 : i32, i32
  }
  func.func @transform_8(%arg0: i32) -> (i32, i32) {
    %c0_i32 = arith.constant 0 : i32
    %c0_i32_0 = arith.constant 0 : i32
    %c0_i32_1 = arith.constant 0 : i32
    return %c0_i32, %c0_i32_0 : i32, i32
  }
  func.func @transform_9(%arg0: i32) -> (i32, i32) {
    %c0_i32 = arith.constant 0 : i32
    %c0_i32_0 = arith.constant 0 : i32
    %c0_i32_1 = arith.constant 0 : i32
    return %c0_i32, %c0_i32_0 : i32, i32
  }
  func.func @transform_10(%arg0: i32) -> (i32, i32) {
    %c0_i32 = arith.constant 0 : i32
    %c0_i32_0 = arith.constant 0 : i32
    %c0_i32_1 = arith.constant 0 : i32
    return %c0_i32, %c0_i32_0 : i32, i32
  }
  func.func @transform_11(%arg0: i32) -> (i32, i32) {
    %c0_i32 = arith.constant 0 : i32
    %c0_i32_0 = arith.constant 0 : i32
    %c0_i32_1 = arith.constant 0 : i32
    return %c0_i32, %c0_i32_0 : i32, i32
  }
  func.func @transform_12(%arg0: i32) -> (i32, i32) {
    %c0_i32 = arith.constant 0 : i32
    %c0_i32_0 = arith.constant 0 : i32
    %c0_i32_1 = arith.constant 0 : i32
    return %c0_i32, %c0_i32_0 : i32, i32
  }
  func.func @transform_13(%arg0: i32) -> (i32, i32) {
    %c0_i32 = arith.constant 0 : i32
    %c0_i32_0 = arith.constant 0 : i32
    %c0_i32_1 = arith.constant 0 : i32
    return %c0_i32, %c0_i32_0 : i32, i32
  }
  func.func @transform_14(%arg0: i32) -> (i32, i32) {
    %c0_i32 = arith.constant 0 : i32
    %c0_i32_0 = arith.constant 0 : i32
    %c0_i32_1 = arith.constant 0 : i32
    return %c0_i32, %c0_i32_0 : i32, i32
  }
  func.func @transform_15(%arg0: i32) -> (i32, i32) {
    %c0_i32 = arith.constant 0 : i32
    %c0_i32_0 = arith.constant 0 : i32
    %c0_i32_1 = arith.constant 0 : i32
    return %c0_i32, %c0_i32_0 : i32, i32
  }
  func.func @transform_16(%arg0: i32) -> (i32, i32, i32) {
    %c0_i32 = arith.constant 0 : i32
    %c0_i32_0 = arith.constant 0 : i32
    %c0_i32_1 = arith.constant 0 : i32
    return %arg0, %c0_i32, %c0_i32_0 : i32, i32, i32
  }
}

module attributes {stable_mosaic.version = 11 : i64} {
  func.func @linear_kernel(%arg0: i32, %arg1: i32, %arg2: memref<16x32xf32, #tpu.memory_space<vmem>>, %arg3: memref<32x1024xbf16, #tpu.memory_space<vmem>>, %arg4: memref<1x1024xf32, #tpu.memory_space<vmem>>, %arg5: memref<16x1024xf32, #tpu.memory_space<vmem>>) attributes {dimension_semantics = [#tpu.dimension_semantics<parallel>, #tpu.dimension_semantics<parallel>], iteration_bounds = array<i64: 1, 2>, scalar_prefetch = 0 : i64, scratch_operands = 0 : i64, tpu.core_type = #tpu.core_type<tc>, window_params = [{transform_indices = @transform_0, window_bounds = array<i64: 16, 32>}, {transform_indices = @transform_1, window_bounds = array<i64: 32, 1024>}, {transform_indices = @transform_2, window_bounds = array<i64: 1, 1024>}, {transform_indices = @transform_3, window_bounds = array<i64: 16, 1024>}]} {
    %c0 = arith.constant 0 : index
    %c0_0 = arith.constant 0 : index
    %0 = vector.load %arg2[%c0, %c0_0] : memref<16x32xf32, #tpu.memory_space<vmem>>, vector<16x32xf32>
    %1 = arith.truncf %0 : vector<16x32xf32> to vector<16x32xbf16>
    %c0_1 = arith.constant 0 : index
    %c0_2 = arith.constant 0 : index
    %2 = vector.load %arg3[%c0_1, %c0_2] : memref<32x1024xbf16, #tpu.memory_space<vmem>>, vector<32x1024xbf16>
    %cst = arith.constant dense<0.000000e+00> : vector<16x1024xf32>
    %3 = tpu.matmul %1, %2, %cst {dimension_numbers = #tpu.dot_dimension_numbers<[1], [0], [0], [1], [0, 0, 1, 1], [], []>} : vector<16x32xbf16>, vector<32x1024xbf16>, vector<16x1024xf32> -> vector<16x1024xf32>
    %c0_3 = arith.constant 0 : index
    %c0_4 = arith.constant 0 : index
    %4 = vector.load %arg4[%c0_3, %c0_4] : memref<1x1024xf32, #tpu.memory_space<vmem>>, vector<1x1024xf32>
    %5 = vector.broadcast %4 : vector<1x1024xf32> to vector<16x1024xf32>
    %6 = arith.addf %3, %5 : vector<16x1024xf32>
    %c0_5 = arith.constant 0 : index
    %c0_6 = arith.constant 0 : index
    %7 = vector.load %arg5[%c0_5, %c0_6] : memref<16x1024xf32, #tpu.memory_space<vmem>>, vector<16x1024xf32>
    tpu.vector_store %arg5[%c0_5, %c0_6], %6 {strides = array<i32>} : memref<16x1024xf32, #tpu.memory_space<vmem>>, vector<16x1024xf32>,
    return
  }
  func.func @transform_0(%arg0: i32, %arg1: i32) -> (i32, i32) {
    %c0_i32 = arith.constant 0 : i32
    %c0_i32_0 = arith.constant 0 : i32
    return %arg0, %c0_i32 : i32, i32
  }
  func.func @transform_1(%arg0: i32, %arg1: i32) -> (i32, i32) {
    %c0_i32 = arith.constant 0 : i32
    %c0_i32_0 = arith.constant 0 : i32
    return %c0_i32, %arg1 : i32, i32
  }
  func.func @transform_2(%arg0: i32, %arg1: i32) -> (i32, i32) {
    %c0_i32 = arith.constant 0 : i32
    %c0_i32_0 = arith.constant 0 : i32
    return %c0_i32, %arg1 : i32, i32
  }
  func.func @transform_3(%arg0: i32, %arg1: i32) -> (i32, i32) {
    %c0_i32 = arith.constant 0 : i32
    return %arg0, %arg1 : i32, i32
  }
}

</mosaic_0001>

<bundles_post_ra>
// kernel: masked_language_model_forward.5
= control target key start
LH: loop header
LB: loop body
LE: loop exit
PB: predicated region body
PF: predicated region fallthrough
CT: control target
= control target key end

     0   :  { %8 = vsyncpa [#allocation4], 0  ;;  %s1131_s0 = inlined_call_operand.vmem [shape: f32[16,32], index: 0, kind: input, shape index: {}]   ;;  %s1132_s1 = inlined_call_operand.vmem [shape: bf16[32,2048], index: 1, kind: input, shape index: {}]   ;;  %s1133_s2 = inlined_call_operand.vmem [shape: f32[1,2048], index: 2, kind: input, shape index: {}]   ;;  %s1134_s3 = inlined_call_operand.hbm [shape: f32[16,2048], index: 3, kind: output, shape index: {}]  }
   0x1   :  { %10 = vsyncpa [#allocation4 + $0x1], 0  ;;  %s934_s12 = smov 0   ;;  %s936_s13 = smov 0  }
   0x2   :  { %s938_s14 = smov 0   ;;  %s940_s15 = smov 0  }
   0x3   :  { %s942_s16 = smov 0   ;;  %s944_s17 = smov 0  }
   0x4 LB: > { %s731_s18 = sadd.s32 4294967295, %s907_s17   ;;  %s732_s19 = sadd.s32 4294967294, %s907_s17   ;;  %s907_s17 = sphi %s944_s17, %s16_s17   ;;  %s903_s16 = sphi %s942_s16, %s1141_s16   ;;  %s899_s15 = sphi %s940_s15, %s1140_s15   ;;  %s895_s14 = sphi %s938_s14, %s1139_s14   ;;  %s891_s13 = sphi %s936_s13, %s1138_s13   ;;  %s887_s12 = sphi %s934_s12, %s1137_s12  }
   0x5   : > { %s25_s20 = sadd.s32 1, %s903_s16  ;;  %s61_s21 = sadd.s32 1, %s895_s14 }
   0x6   : > { %p26_p0 = scmp.ge.s32.totalorder %s25_s20, 2  ;;  %p68_p1 = scmp.ne.s32.totalorder %s895_s14, %s891_s13 }
   0x7   : > { %p69_p2 = scmp.eq.s32.totalorder %s907_s17, 0  ;;  %p126_p3 = scmp.eq.s32.totalorder %s731_s18, 1 }
   0x8   : > { %s1143_s20 = smov (%p26_p0, %s25_s20), 0  ;;  %p131_p6 = scmp.ne.s32.totalorder %s891_s13, %s887_s12 }
   0x9   : > { %p70_p4 = por %p69_p2, %p68_p1  ;;  %p973_p5 = por %p126_p3, %p68_p1 }
   0xa   : > { %s58_s23 = ssub.s32 %s903_s16, %s1143_s20  ;;  %p132_p8 = scmp.eq.s32.totalorder %s732_s19, 1 }
   0xb   : > { %p59_p7 = scmp.eq.s32.totalorder %s58_s23, 0  ;;  %p735_p10 = scmp.ge.s32.totalorder %s907_s17, 2 }
   0xc   : > { %p984_p9 = por %p132_p8, %p131_p6 }
   0xd   : > { %s982_s24 = scalar_select %p59_p7, %s895_s14, %s61_s21  }
   0xe   : > { %157 = sbr.rel (%p735_p10) target bundleno = 33 (0x21), region = 20 }
  0x15   : > { %160 = sbr.rel (!%p70_p4) target bundleno = 33 (0x21), region = 24  ;;  %s162_s26 = sand.u32 (%p70_p4), 1, %s895_s14  }
  0x16   : > { %s768_s27 = sshll.u32 (%p70_p4), %s903_s16, 5  ;;  %s736_s28 = sshll.u32 (%p70_p4), %s162_s26, 7 }
  0x17   : > { %s996_s4 = scalar_lea.vmem (%p70_p4), %s1132_s1, %s768_s27  ;;  %s164_s5 = scalar_lea.vmem (%p70_p4), [#allocation2], %s736_s28 }
  0x18   : > { %v180_v0 = vld [vmem:[%s996_s4] sm:$0xff] (%p70_p4)  ;;  %v182_v1 = vld [vmem:[%s996_s4 + $0x8] sm:$0xff] (%p70_p4)  ;;  %v184_v2 = vld [vmem:[%s996_s4 + $0x10] sm:$0xff] (%p70_p4) }
  0x19   : > { %181 = vst [vmem:[%s164_s5] sm:$0xff] (%p70_p4), %v180_v0  ;;  %183 = vst [vmem:[%s164_s5 + $0x8] sm:$0xff] (%p70_p4), %v182_v1  ;;  %v186_v3 = vld [vmem:[%s996_s4 + $0x18] sm:$0xff] (%p70_p4)  ;;  %v188_v4 = vld [vmem:[%s996_s4 + $0x40] sm:$0xff] (%p70_p4) }
  0x1a   : > { %185 = vst [vmem:[%s164_s5 + $0x10] sm:$0xff] (%p70_p4), %v184_v2  ;;  %v190_v5 = vld [vmem:[%s996_s4 + $0x48] sm:$0xff] (%p70_p4)  ;;  %187 = vst [vmem:[%s164_s5 + $0x18] sm:$0xff] (%p70_p4), %v186_v3  ;;  %v192_v6 = vld [vmem:[%s996_s4 + $0x50] sm:$0xff] (%p70_p4) }
  0x1b   : > { %189 = vst [vmem:[%s164_s5 + $0x20] sm:$0xff] (%p70_p4), %v188_v4  ;;  %191 = vst [vmem:[%s164_s5 + $0x28] sm:$0xff] (%p70_p4), %v190_v5  ;;  %v194_v7 = vld [vmem:[%s996_s4 + $0x58] sm:$0xff] (%p70_p4)  ;;  %v196_v8 = vld [vmem:[%s996_s4 + $0x80] sm:$0xff] (%p70_p4) }
  0x1c   : > { %193 = vst [vmem:[%s164_s5 + $0x30] sm:$0xff] %v192_v6  ;;  %195 = vst [vmem:[%s164_s5 + $0x38] sm:$0xff] %v194_v7  ;;  %v198_v9 = vld [vmem:[%s996_s4 + $0x88] sm:$0xff]  ;;  %v200_v10 = vld [vmem:[%s996_s4 + $0x90] sm:$0xff] }
  0x1d   : > { %197 = vst [vmem:[%s164_s5 + $0x40] sm:$0xff] %v196_v8  ;;  %v202_v11 = vld [vmem:[%s996_s4 + $0x98] sm:$0xff]  ;;  %199 = vst [vmem:[%s164_s5 + $0x48] sm:$0xff] %v198_v9  ;;  %v204_v12 = vld [vmem:[%s996_s4 + $0xc0] sm:$0xff] }
  0x1e   : > { %201 = vst [vmem:[%s164_s5 + $0x50] sm:$0xff] %v200_v10  ;;  %203 = vst [vmem:[%s164_s5 + $0x58] sm:$0xff] %v202_v11  ;;  %v206_v13 = vld [vmem:[%s996_s4 + $0xc8] sm:$0xff]  ;;  %v208_v14 = vld [vmem:[%s996_s4 + $0xd0] sm:$0xff] }
  0x1f   : > { %205 = vst [vmem:[%s164_s5 + $0x60] sm:$0xff] %v204_v12  ;;  %207 = vst [vmem:[%s164_s5 + $0x68] sm:$0xff] %v206_v13  ;;  %v210_v15 = vld [vmem:[%s996_s4 + $0xd8] sm:$0xff] }
  0x20   : > { %209 = vst [vmem:[%s164_s5 + $0x70] sm:$0xff] %v208_v14  ;;  %211 = vst [vmem:[%s164_s5 + $0x78] sm:$0xff] %v210_v15 }
  0x21 PF: > { %p739_p11 = scmp.ge.s32.totalorder %s907_s17, 1  ;;  %p224_p12 = scmp.lt.s32.totalorder %s907_s17, 3 }
  0x23   : > { %p225_p13 = pnand %p739_p11, %p224_p12 }
  0x24   : > { %s231_s6 = sand.u32 (!%p225_p13), 1, %s891_s13   ;;  %v909_v16 = vmov (!%p225_p13), 0   ;;  %v278_v36 = vld [vmem:[%s1131_s0] sm:$0xff] (!%p225_p13)  ;;  %v279_v37 = vld [vmem:[%s1131_s0 + $0x8] sm:$0xff] (!%p225_p13)  ;;  %vm419_vm0 = vcmask (!%p225_p13), 261120   ;;  %s742_s19 = sshll.u32 (!%p225_p13), %s899_s15, 3  ;;  %v299_v52 = vlaneseq (!%p225_p13) }
  0x25   : > { %228 = sbr.rel (%p225_p13) target bundleno = 292 (0x124), region = 51  ;;  %s1019_s7 = sshll.u32 (!%p225_p13), %s231_s6, 7  ;;  %455 = vmatprep.mubr.bf16.mxu0 (!%p225_p13), %v909_v16  ;;  %498 = vmatprep.mubr.bf16.mxu1 (!%p225_p13), %v909_v16  ;;  %v280_v43 = vpack.c.bf16 (!%p225_p13), %v279_v37, %v278_v36 }
  0x26   : > { %s1022_s8 = scalar_lea.vmem (!%p225_p13), [#allocation2], %s1019_s7  ;;  %p271_p0 = scmp.lt.s32.totalorder (!%p225_p13), %s742_s19, 15  ;;  %v300_v53 = vshrl.u32 (!%p225_p13), %v299_v52, 7 }
  0x27   : > { %v281_v17 = vld [vmem:[%s1022_s8] sm:$0xff] (!%p225_p13)  ;;  %v282_v19 = vld [vmem:[%s1022_s8 + $0x8] sm:$0xff] (!%p225_p13)  ;;  %v283_v30 = vld [vmem:[%s1022_s8 + $0x10] sm:$0xff] (!%p225_p13)  ;;  %s1055_s27 = scalar_lea.vmem (!%p225_p13), [#allocation3], %s1019_s7  ;;  %s769_s28 = sshll.u32 (!%p225_p13), %s899_s15, 10 }
  0x28   : > { %v285_v18 = vld [vmem:[%s1022_s8 + $0x20] sm:$0xff] (!%p225_p13)  ;;  %v286_v21 = vld [vmem:[%s1022_s8 + $0x28] sm:$0xff] (!%p225_p13)  ;;  %v287_v32 = vld [vmem:[%s1022_s8 + $0x30] sm:$0xff] (!%p225_p13)  ;;  %v301_v54 = vsub.s32 (!%p225_p13), 0, %v300_v53  ;;  %v309_v56 = vsub.s32 (!%p225_p13), 2, %v300_v53  ;;  %v305_v57 = vsub.s32 (!%p225_p13), 1, %v300_v53  ;;  %s1071_s4 = scalar_lea.hbm (!%p225_p13), %s1134_s3, %s769_s28 }
  0x29   : > { %v744_v20 = vcombine.high (!%p225_p13), %v281_v17, %v285_v18  ;;  %v743_v22 = vcombine.low (!%p225_p13), %v281_v17, %v285_v18  ;;  %v289_v23 = vld [vmem:[%s1022_s8 + $0x40] sm:$0xff] (!%p225_p13)  ;;  %v746_v25 = vcombine.high (!%p225_p13), %v282_v19, %v286_v21  ;;  %v745_v26 = vcombine.low (!%p225_p13), %v282_v19, %v286_v21  ;;  %v290_v28 = vld [vmem:[%s1022_s8 + $0x48] sm:$0xff] (!%p225_p13)  ;;  %v284_v33 = vld [vmem:[%s1022_s8 + $0x18] sm:$0xff] (!%p225_p13)  ;;  %s628_s29 = sshll.u32 (!%p225_p13), %s1055_s27, 4  ;;  %s1084_s5 = scalar_lea.sflag (!%p225_p13), [#allocation4], %s231_s6  ;;  %s1075_s29 = int_to_ptr.vmem [resolvable:$true] %s628_s29 }
  0x2a   : > { %v293_v24 = vld [vmem:[%s1022_s8 + $0x60] sm:$0xff] (!%p225_p13)  ;;  %v294_v29 = vld [vmem:[%s1022_s8 + $0x68] sm:$0xff] (!%p225_p13)  ;;  %v288_v34 = vld [vmem:[%s1022_s8 + $0x38] sm:$0xff] (!%p225_p13)  ;;  %v748_v39 = vcombine.high (!%p225_p13), %v283_v30, %v287_v32  ;;  %v747_v46 = vcombine.low (!%p225_p13), %v283_v30, %v287_v32  ;;  %v313_v58 = vsub.s32 (!%p225_p13), 3, %v300_v53  ;;  %v317_v3 = vsub.s32 (!%p225_p13), 4, %v300_v53  ;;  %s829_s7 = scalar_lea.vmem (!%p225_p13), %s1075_s29, 2048 }
  0x2b   : > { %v752_v27 = vcombine.high (!%p225_p13), %v289_v23, %v293_v24  ;;  %423 = vmatprep.subr.bf16.mxu0 (!%p225_p13), %v744_v20  ;;  %v754_v31 = vcombine.high (!%p225_p13), %v290_v28, %v294_v29  ;;  %466 = vmatprep.subr.bf16.mxu1 (!%p225_p13), %v746_v25  ;;  %v751_v35 = vcombine.low (!%p225_p13), %v289_v23, %v293_v24  ;;  %v291_v41 = vld [vmem:[%s1022_s8 + $0x50] sm:$0xff] (!%p225_p13)  ;;  %v292_v44 = vld [vmem:[%s1022_s8 + $0x58] sm:$0xff] (!%p225_p13)  ;;  %v325_v8 = vsub.s32 (!%p225_p13), 6, %v300_v53  ;;  %p830_p1 = scmp.ne.s32.totalorder (!%p225_p13), %s1075_s29, %s829_s7 }
  0x2c   : > { %424 = vmatpush1.bf16.msra.mxu0 %v743_v22  ;;  %467 = vmatpush1.bf16.msra.mxu1 %v745_v26  ;;  %v753_v38 = vcombine.low %v290_v28, %v294_v29  ;;  %v750_v40 = vcombine.high %v284_v33, %v288_v34  ;;  %v295_v42 = vld [vmem:[%s1022_s8 + $0x70] sm:$0xff]  ;;  %v296_v45 = vld [vmem:[%s1022_s8 + $0x78] sm:$0xff]  ;;  %v749_v47 = vcombine.low %v284_v33, %v288_v34  ;;  %s1145_s19 = smov (!%p271_p0, %s742_s19), 15  ;;  %v321_v9 = vsub.s32 5, %v300_v53  ;;  %s910_s8 = smov [#allocation3]  }
  0x2d   : > { %425 = vmatprep.subr.bf16.mxu0 %v752_v27  ;;  %468 = vmatprep.subr.bf16.mxu1 %v754_v31  ;;  %v756_v48 = vcombine.high %v291_v41, %v295_v42  ;;  %v758_v49 = vcombine.high %v292_v44, %v296_v45  ;;  %v755_v50 = vcombine.low %v291_v41, %v295_v42  ;;  %s273_s26 = scalar_lea.vmem %s1133_s2, %s1145_s19  ;;  %v329_v14 = vsub.s32 7, %v300_v53  ;;  %p831_p2 = pnand %p830_p1, %p973_p5 }
  0x2e   : > { %v757_v51 = vcombine.low %v292_v44, %v296_v45  ;;  %v297_v55 = vld [vmem:[%s273_s26] sm:$0xff]  ;;  %s833_s9 = sshll.u32 %s910_s8, 4  ;;  %s834_s9 = int_to_ptr.vmem [resolvable:$false] %s833_s9 }
  0x2f   : > { %v302_v59 = vrot.slane %v297_v55, %v301_v54  ;;  %v310_v60 = vrot.slane %v297_v55, %v309_v56  ;;  %v306_v61 = vrot.slane %v297_v55, %v305_v57  ;;  %v314_v62 = vrot.slane %v297_v55, %v313_v58  ;;  %p832_p3 = pneg %p831_p2  ;;  %s835_s10 = scalar_lea.vmem %s834_s9, 4096 }
  0x30   : > { %426 = vmatpush1.bf16.msra.mxu0 %v751_v35  ;;  %469 = vmatpush1.bf16.msra.mxu1 %v753_v38  ;;  %v318_v19 = vrot.slane %v297_v55, %v317_v3  ;;  %v326_v20 = vrot.slane %v297_v55, %v325_v8  ;;  %v322_v21 = vrot.slane %v297_v55, %v321_v9  ;;  %p836_p4 = scmp.lt.s32.totalorder %s1075_s29, %s834_s9  ;;  %p837_p6 = scmp.lt.s32.totalorder %s835_s10, %s829_s7 }
  0x31   : > { %509 = vmatprep.subr.bf16.mxu0 %v748_v39  ;;  %552 = vmatprep.subr.bf16.mxu1 %v750_v40  ;;  %v330_v22 = vrot.slane %v297_v55, %v329_v14 }
  0x32   : > { %p838_p7 = por %p837_p6, %p836_p4 }
  0x33   : > { %759 = vmatmul.mubr.msk.bf16.vlgmr.msra.gmra.mrb[0].mxu0 %vm419_vm0, %v280_v43  ;;  %760 = vmatmul.mubr.msk.bf16.vlgmr.msra.gmra.mrb[0].mxu1 %vm419_vm0, %v280_v43 }
  0x34   : > { %510 = vmatpush1.bf16.msra.mxu0 %v747_v46  ;;  %553 = vmatpush1.bf16.msra.mxu1 %v749_v47  ;;  %p839_p8 = pnand %p838_p7, %p832_p3 }
  0x35   : > { %511 = vmatprep.subr.bf16.mxu0 %v756_v48  ;;  %554 = vmatprep.subr.bf16.mxu1 %v758_v49 }
  0x36   : > { %541 = vmatprep.mubr.bf16.mxu0 %v909_v16  ;;  %584 = vmatprep.mubr.bf16.mxu1 %v909_v16 }
  0x38   : > { %512 = vmatpush1.bf16.msra.mxu0 %v755_v50  ;;  %555 = vmatpush1.bf16.msra.mxu1 %v757_v51 }
  0x3b   : > { %761 = vmatmul.mubr.msk.bf16.vlgmr.msra.gmra.mrb[4].mxu0 %vm419_vm0, %v280_v43  ;;  %762 = vmatmul.mubr.msk.bf16.vlgmr.msra.gmra.mrb[4].mxu1 %vm419_vm0, %v280_v43 }
 0x106   : > { %v457_v63 = vpop.f32.mrb[0].mxu0  ;;  %v500_v1 = vpop.f32.mrb[0].mxu1 }
 0x107   : > { %v458_v0 = vadd.f32 %v457_v63, %v302_v59  ;;  %v459_v2 = vpop.f32.mrb[1].mxu0  ;;  %v501_v4 = vadd.f32 %v500_v1, %v310_v60  ;;  %v502_v6 = vpop.f32.mrb[1].mxu1 }
 0x108   : > { %v460_v5 = vadd.f32 %v459_v2, %v306_v61  ;;  %v461_v7 = vpop.f32.mrb[2].mxu0  ;;  %v503_v10 = vadd.f32 %v502_v6, %v314_v62  ;;  %v504_v12 = vpop.f32.mrb[2].mxu1 }
 0x109   : > { %595 = vst [vmem:[%s1055_s27] sm:$0xff] %v458_v0  ;;  %v462_v11 = vadd.f32 %v461_v7, %v302_v59  ;;  %v463_v13 = vpop.f32.mrb[3].mxu0  ;;  %597 = vst [vmem:[%s1055_s27 + $0x10] sm:$0xff] %v501_v4  ;;  %v505_v15 = vadd.f32 %v504_v12, %v310_v60  ;;  %v506_v17 = vpop.f32.mrb[3].mxu1 }
 0x10a   : > { %596 = vst [vmem:[%s1055_s27 + $0x8] sm:$0xff] %v460_v5  ;;  %v464_v16 = vadd.f32 %v463_v13, %v306_v61  ;;  %598 = vst [vmem:[%s1055_s27 + $0x18] sm:$0xff] %v503_v10  ;;  %v507_v18 = vadd.f32 %v506_v17, %v314_v62 }
 0x10b   : > { %603 = vst [vmem:[%s1055_s27 + $0x40] sm:$0xff] %v462_v11  ;;  %605 = vst [vmem:[%s1055_s27 + $0x50] sm:$0xff] %v505_v15 }
 0x10c   : > { %604 = vst [vmem:[%s1055_s27 + $0x48] sm:$0xff] %v464_v16  ;;  %606 = vst [vmem:[%s1055_s27 + $0x58] sm:$0xff] %v507_v18 }
 0x10e   : > { %v543_v23 = vpop.f32.mrb[4].mxu0  ;;  %v586_v25 = vpop.f32.mrb[4].mxu1 }
 0x10f   : > { %v544_v24 = vadd.f32 %v543_v23, %v318_v19  ;;  %v545_v26 = vpop.f32.mrb[5].mxu0  ;;  %v587_v27 = vadd.f32 %v586_v25, %v326_v20  ;;  %v588_v29 = vpop.f32.mrb[5].mxu1 }
 0x110   : > { %v546_v28 = vadd.f32 %v545_v26, %v322_v21  ;;  %v547_v30 = vpop.f32.mrb[6].mxu0  ;;  %v589_v31 = vadd.f32 %v588_v29, %v330_v22  ;;  %v590_v33 = vpop.f32.mrb[6].mxu1 }
 0x111   : > { %599 = vst [vmem:[%s1055_s27 + $0x20] sm:$0xff] %v544_v24  ;;  %v548_v32 = vadd.f32 %v547_v30, %v318_v19  ;;  %v549_v34 = vpop.f32.mrb[7].mxu0  ;;  %601 = vst [vmem:[%s1055_s27 + $0x30] sm:$0xff] %v587_v27  ;;  %v591_v35 = vadd.f32 %v590_v33, %v326_v20  ;;  %v592_v37 = vpop.f32.mrb[7].mxu1 }
 0x112   : > { %600 = vst [vmem:[%s1055_s27 + $0x28] sm:$0xff] %v546_v28  ;;  %v550_v36 = vadd.f32 %v549_v34, %v322_v21  ;;  %602 = vst [vmem:[%s1055_s27 + $0x38] sm:$0xff] %v589_v31  ;;  %v593_v38 = vadd.f32 %v592_v37, %v330_v22 }
 0x113   : > { %607 = vst [vmem:[%s1055_s27 + $0x60] sm:$0xff] %v548_v32  ;;  %609 = vst [vmem:[%s1055_s27 + $0x70] sm:$0xff] %v591_v35 }
 0x114   : > { %608 = vst [vmem:[%s1055_s27 + $0x68] sm:$0xff] %v550_v36  ;;  %610 = vst [vmem:[%s1055_s27 + $0x78] sm:$0xff] %v593_v38 }
 0x115   : > { %842 = shalt.err (!%p839_p8)
}
 0x116   : > { %s843_s6 = scalar_lea.hbm %s1071_s4, 2048  ;;  %s847_s19 = scalar_lea.hbm %s1134_s3, 4096 }
 0x117   : > { %p844_p11 = scmp.ne.s32.totalorder %s1071_s4, %s843_s6  ;;  %p848_p0 = scmp.lt.u32.totalorder %s1071_s4, %s1134_s3 }
 0x118   : > { %p849_p1 = scmp.lt.u32.totalorder %s847_s19, %s843_s6  ;;  %p851_p3 = scmp.lt.u32.totalorder %s843_s6, %s1071_s4 }
 0x119   : > { %p845_p12 = pnand %p844_p11, %p973_p5 }
 0x11a   : > { %p850_p2 = por %p849_p1, %p848_p0 }
 0x11b   : > { %p846_p13 = pneg %p845_p12 }
 0x11c   : > { %p852_p4 = por %p851_p3, %p850_p2 }
 0x11e   : > { %p853_p6 = pnand %p852_p4, %p846_p13 }
 0x120   : > { %856 = shalt.err (!%p853_p6)
}
 0x121   : > { %s911_s26 = smov 1024   ;;  %s912_s27 = smov 2048  }
 0x122   : > { %s913_s28 = smov 64  }
 0x123   : > { %770 = dma.vmem_to_hbm [thread:$0]  (%p973_p5), %s1075_s29, 2048, %s1071_s4, %s1084_s5, %s911_s26, %s912_s27, %s913_s28  }
 0x124 PF: > { %s643_s15 = sand.u32 1, %s887_s12   ;;  %p773_p7 = pnand %p735_p10, %p984_p9 }
 0x125   : > { %s644_s30 = scalar_lea.sflag [#allocation4], %s643_s15 }
 0x126   : > { %882 = dma.done.wait (!%p773_p7), %s644_s30, 2048  }
 0x127   : > { %884 = vsyncadd (!%p773_p7), %s644_s30, 4294965248  ;;  %s16_s17 = sadd.s32 1, %s907_s17   ;;  %s1137_s12 = smov %s891_s13 }
 0x128   : > { %p13_p8 = scmp.ge.s32.totalorder %s16_s17, 4   ;;  %s1138_s13 = smov %s895_s14 }
 0x129   : > { %s1139_s14 = smov %s982_s24  ;;  %s1140_s15 = smov %s903_s16 }
 0x12a   : > { %s1141_s16 = smov %s1143_s20  ;;  %15 = sbr.rel (!%p13_p8) target bundleno = 4 (0x4), region = 101 }
 0x131   :  { %649 = vsyncpa [#allocation4], 1 }
 0x132   :  { %651 = vsyncpa [#allocation4 + $0x1], 1 }

// kernel: masked_language_model_forward.3
= control target key start
LH: loop header
LB: loop body
LE: loop exit
PB: predicated region body
PF: predicated region fallthrough
CT: control target
= control target key end

     0   :  { %s3930_s0 = inlined_call_operand.hbm [shape: f32[2,8,32], index: 0, kind: input, shape index: {}]   ;;  %s3931_s1 = inlined_call_operand.hbm [shape: f32[2,1,8], index: 1, kind: input, shape index: {}]   ;;  %s3932_s2 = inlined_call_operand.hbm [shape: f32[1,32], index: 2, kind: input, shape index: {}]   ;;  %s3933_s3 = inlined_call_operand.hbm [shape: f32[1,32], index: 3, kind: input, shape index: {}]   ;;  %s3934_s4 = inlined_call_operand.hbm [shape: bf16[32,32], index: 4, kind: input, shape index: {}]   ;;  %s3935_s5 = inlined_call_operand.hbm [shape: bf16[32,32], index: 5, kind: input, shape index: {}]   ;;  %s3936_s6 = inlined_call_operand.hbm [shape: bf16[32,32], index: 6, kind: input, shape index: {}]   ;;  %s3937_s7 = inlined_call_operand.hbm [shape: bf16[32,32], index: 7, kind: input, shape index: {}]   ;;  %s3938_s8 = inlined_call_operand.hbm [shape: f32[1,32], index: 8, kind: input, shape index: {}]   ;;  %s3939_s9 = inlined_call_operand.hbm [shape: f32[1,32], index: 9, kind: input, shape index: {}]   ;;  %s3940_s10 = inlined_call_operand.hbm [shape: bf16[32,32], index: 10, kind: input, shape index: {}]   ;;  %s3941_s11 = inlined_call_operand.hbm [shape: f32[1,32], index: 11, kind: input, shape index: {}]   ;;  %s3942_s12 = inlined_call_operand.hbm [shape: bf16[32,32], index: 12, kind: input, shape index: {}]   ;;  %s3943_s13 = inlined_call_operand.hbm [shape: f32[1,32], index: 13, kind: input, shape index: {}]   ;;  %s3944_s14 = inlined_call_operand.hbm [shape: f32[1,32], index: 14, kind: input, shape index: {}]   ;;  %s3945_s15 = inlined_call_operand.hbm [shape: f32[1,32], index: 15, kind: input, shape index: {}]   ;;  %s3946_s16 = inlined_call_operand.hbm [shape: f32[2,8,32], index: 16, kind: output, shape index: {}]  }
   0x1   :  { %3960 = sst [smem:[#allocation45_spill]] %s3930_s0 }
   0x2   :  { %3961 = sst [smem:[#allocation46_spill]] %s3931_s1 }
   0x3   :  { %3962 = sst [smem:[#allocation47_spill]] %s3932_s2 }
   0x4   :  { %3963 = sst [smem:[#allocation48_spill]] %s3933_s3 }
   0x5   :  { %3964 = sst [smem:[#allocation49_spill]] %s3934_s4 }
   0x6   :  { %3965 = sst [smem:[#allocation50_spill]] %s3935_s5 }
   0x7   :  { %3966 = sst [smem:[#allocation51_spill]] %s3936_s6 }
   0x8   :  { %3967 = sst [smem:[#allocation52_spill]] %s3946_s16 }
   0x9   :  { %21 = vsyncpa [#allocation3], 0 }
   0xa   :  { %23 = vsyncpa [#allocation3 + $0x1], 0 }
   0xb   :  { %24 = vsyncpa [#allocation6], 0 }
   0xc   :  { %26 = vsyncpa [#allocation6 + $0x1], 0 }
   0xd   :  { %27 = vsyncpa [#allocation9], 0 }
   0xe   :  { %28 = vsyncpa [#allocation12], 0 }
   0xf   :  { %29 = vsyncpa [#allocation15], 0 }
  0x10   :  { %30 = vsyncpa [#allocation18], 0 }
  0x11   :  { %31 = vsyncpa [#allocation21], 0 }
  0x12   :  { %32 = vsyncpa [#allocation24], 0 }
  0x13   :  { %33 = vsyncpa [#allocation27], 0 }
  0x14   :  { %34 = vsyncpa [#allocation4], 0 }
  0x15   :  { %36 = vsyncpa [#allocation4 + $0x1], 0  ;;  %s3235_s21 = smov 0   ;;  %s3237_s22 = smov 0  }
  0x16   :  { %s3239_s23 = smov 0   ;;  %s3241_s24 = smov 0  }
  0x17 LB: > { %3968 = sst [smem:[#allocation40_spill]] %s3110_s21  ;;  %s3124_s25 = smov [#allocation7]   ;;  %s3122_s24 = sphi %s3241_s24, %s4023_s24   ;;  %s3118_s23 = sphi %s3239_s23, %s4022_s23   ;;  %s3114_s22 = sphi %s3237_s22, %s4021_s22   ;;  %s3110_s21 = sphi %s3235_s21, %s4020_s21  }
  0x18   : > { %3969 = sst [smem:[#allocation41_spill]] %s3114_s22  ;;  %s432_s26 = sshll.u32 %s3124_s25, 4  ;;  %s3261_s26 = int_to_ptr.vmem [resolvable:$true] %s432_s26 }
  0x19   : > { %3970 = sst [smem:[#allocation42_spill]] %s3118_s23  ;;  %s3256_s27 = sadd.s32 4294967295, %s3122_s24  }
  0x1a   : > { %3971 = sst [smem:[#allocation43_spill]] %s3256_s27  ;;  %p2165_p0 = scmp.ge.s32.totalorder %s3122_s24, 1 }
  0x1b   : > { %p3956_p1 = scmp.eq.s32.totalorder %s3256_s27, 0  ;;  %p419_p2 = scmp.lt.s32.totalorder %s3122_s24, 3 }
  0x1c   : > { %s3125_s29 = smov [#allocation8]   ;;  %s3126_s17 = smov [#allocation11]  }
  0x1d   : > { %p3263_p3 = pnand %p2165_p0, %p419_p2  ;;  %s443_s30 = sshll.u32 %s3125_s29, 4  ;;  %s3270_s30 = int_to_ptr.vmem [resolvable:$true] %s443_s30 }
  0x1e   : > { %s466_s18 = sshll.u32 %s3126_s17, 4  ;;  %s3975_s2 = sld [smem:[#allocation47_spill]]  ;;  %s3278_s18 = int_to_ptr.vmem [resolvable:$true] %s466_s18 }
  0x1f   : > { %s3972_s28 = scalar_select %p3263_p3, 1, 0 }
  0x20   : > { %p2403_p5 = pneg %p3263_p3 }
  0x21   : > { %3973 = sst [smem:[#allocation44_spill]] %s3972_s28 }
  0x22   : > { %p3274_p6 = pnand %p2403_p5, %p3956_p1 }
  0x24   : > { %s2568_s25 = scalar_lea.hbm %s3975_s2, 16  ;;  %p3288_p8 = pneg %p3274_p6 }
  0x25   : > { %p2569_p7 = scmp.ne.s32.totalorder %s3975_s2, %s2568_s25  ;;  %p2575_p11 = scmp.lt.u32.totalorder %s2568_s25, %s3975_s2 }
  0x27   : > { %p2571_p9 = pnand %p3288_p8, %p2569_p7 }
  0x29   : > { %p2572_p10 = pneg %p2571_p9 }
  0x2b   : > { %p2577_p12 = pnand %p2575_p11, %p2572_p10 }
  0x2d   : > { %2580 = shalt.err (!%p2577_p12)
}
  0x2e   : > { %s2581_s16 = scalar_lea.vmem %s3261_s26, 16  ;;  %s2588_s28 = scalar_lea.vmem %s3261_s26, 32 }
  0x2f   : > { %p2582_p13 = scmp.ne.s32.totalorder %s3261_s26, %s2581_s16  ;;  %p2589_p5 = scmp.lt.s32.totalorder %s3261_s26, %s3261_s26 }
  0x30   : > { %p2590_p7 = scmp.lt.s32.totalorder %s2588_s28, %s2581_s16 }
  0x31   : > { %p2584_p0 = pnand %p2582_p13, %p3288_p8 }
  0x32   : > { %p2591_p9 = por %p2590_p7, %p2589_p5 }
  0x33   : > { %p2585_p2 = pneg %p2584_p0 }
  0x35   : > { %p2592_p4 = pnand %p2591_p9, %p2585_p2 }
  0x37   : > { %2595 = shalt.err (!%p2592_p4)
}
  0x38   : > { %2406 = dma.hbm_to_vmem [thread:$0]  (!%p3274_p6), %s3975_s2, 16, %s3261_s26, [#allocation6]  }
  0x39   : > { %s3977_s3 = sld [smem:[#allocation48_spill]] }
  0x3f   : > { %s2596_s17 = scalar_lea.hbm %s3977_s3, 16 }
  0x40   : > { %p2597_p10 = scmp.ne.s32.totalorder %s3977_s3, %s2596_s17  ;;  %p2603_p4 = scmp.lt.u32.totalorder %s2596_s17, %s3977_s3 }
  0x42   : > { %p2599_p11 = pnand %p2597_p10, %p3288_p8 }
  0x44   : > { %p2600_p12 = pneg %p2599_p11 }
  0x46   : > { %p2605_p13 = pnand %p2603_p4, %p2600_p12 }
  0x48   : > { %2608 = shalt.err (!%p2605_p13)
}
  0x49   : > { %s2609_s26 = scalar_lea.vmem %s3270_s30, 16  ;;  %s2616_s21 = scalar_lea.vmem %s3270_s30, 32 }
  0x4a   : > { %p2610_p0 = scmp.ne.s32.totalorder %s3270_s30, %s2609_s26  ;;  %p2617_p7 = scmp.lt.s32.totalorder %s3270_s30, %s3270_s30 }
  0x4b   : > { %p2618_p9 = scmp.lt.s32.totalorder %s2616_s21, %s2609_s26 }
  0x4c   : > { %p2612_p2 = pnand %p2610_p0, %p3288_p8 }
  0x4d   : > { %p2619_p10 = por %p2618_p9, %p2617_p7 }
  0x4e   : > { %p2613_p5 = pneg %p2612_p2 }
  0x50   : > { %p2620_p11 = pnand %p2619_p10, %p2613_p5 }
  0x52   : > { %2623 = shalt.err (!%p2620_p11)
}
  0x53   : > { %2409 = dma.hbm_to_vmem [thread:$0]  (!%p3274_p6), %s3977_s3, 16, %s3270_s30, [#allocation9]  }
  0x54   : > { %s3978_s5 = sld [smem:[#allocation50_spill]] }
  0x5a   : > { %s2624_s25 = scalar_lea.hbm %s3978_s5, 256 }
  0x5b   : > { %p2625_p12 = scmp.ne.s32.totalorder %s3978_s5, %s2624_s25  ;;  %p2631_p0 = scmp.lt.u32.totalorder %s2624_s25, %s3978_s5 }
  0x5d   : > { %p2627_p4 = pnand %p2625_p12, %p3288_p8 }
  0x5f   : > { %p2628_p13 = pneg %p2627_p4 }
  0x61   : > { %p2633_p2 = pnand %p2631_p0, %p2628_p13 }
  0x63   : > { %2636 = shalt.err (!%p2633_p2)
}
  0x64   : > { %s2637_s30 = scalar_lea.vmem %s3278_s18, 256  ;;  %p2645_p10 = scmp.lt.s32.totalorder %s3278_s18, %s3278_s18 }
  0x65   : > { %p2638_p5 = scmp.ne.s32.totalorder %s3278_s18, %s2637_s30  ;;  %p2646_p11 = scmp.lt.s32.totalorder %s2637_s30, %s2637_s30 }
  0x67   : > { %p2640_p7 = pnand %p2638_p5, %p3288_p8  ;;  %p2647_p12 = por %p2646_p11, %p2645_p10 }
  0x69   : > { %p2641_p9 = pneg %p2640_p7 }
  0x6b   : > { %p2648_p4 = pnand %p2647_p12, %p2641_p9 }
  0x6d   : > { %2651 = shalt.err (!%p2648_p4)
}
  0x6e   : > { %s3127_s21 = smov 64   ;;  %s3128_s27 = smov 4  }
  0x6f   : > { %2415 = dma.hbm_to_vmem [thread:$0]  (!%p3274_p6), %s3978_s5, 256, %s3278_s18, [#allocation12], %s3127_s21, %s3127_s21, %s3128_s27  }
  0x70   : > { %s3129_s20 = smov [#allocation14]   ;;  %s3130_s17 = smov [#allocation17]  }
  0x71   : > { %s492_s25 = sshll.u32 %s3129_s20, 4  ;;  %s517_s16 = sshll.u32 %s3130_s17, 4  ;;  %s493_s25 = int_to_ptr.vmem [resolvable:$true] %s492_s25  ;;  %s518_s16 = int_to_ptr.vmem [resolvable:$true] %s517_s16 }
  0x72   : > { %s2652_s30 = scalar_lea.hbm %s3937_s7, 256 }
  0x73   : > { %p2653_p13 = scmp.ne.s32.totalorder %s3937_s7, %s2652_s30  ;;  %p2659_p5 = scmp.lt.u32.totalorder %s2652_s30, %s3937_s7 }
  0x75   : > { %p2655_p0 = pnand %p2653_p13, %p3288_p8 }
  0x77   : > { %p2656_p2 = pneg %p2655_p0 }
  0x79   : > { %p2661_p7 = pnand %p2659_p5, %p2656_p2 }
  0x7b   : > { %2664 = shalt.err (!%p2661_p7)
}
  0x7c   : > { %s2665_s18 = scalar_lea.vmem %s493_s25, 256  ;;  %p2673_p12 = scmp.lt.s32.totalorder %s493_s25, %s493_s25 }
  0x7d   : > { %p2666_p9 = scmp.ne.s32.totalorder %s493_s25, %s2665_s18  ;;  %p2674_p4 = scmp.lt.s32.totalorder %s2665_s18, %s2665_s18 }
  0x7f   : > { %p2668_p10 = pnand %p2666_p9, %p3288_p8  ;;  %p2675_p1 = por %p2674_p4, %p2673_p12 }
  0x81   : > { %p2669_p11 = pneg %p2668_p10 }
  0x83   : > { %p2676_p3 = pnand %p2675_p1, %p2669_p11 }
  0x85   : > { %2679 = shalt.err (!%p2676_p3)
}
  0x86   : > { %2421 = dma.hbm_to_vmem [thread:$0]  (!%p3274_p6), %s3937_s7, 256, %s493_s25, [#allocation15], %s3127_s21, %s3127_s21, %s3128_s27  }
  0x87   : > { %s2680_s1 = scalar_lea.hbm %s3939_s9, 16 }
  0x88   : > { %p2681_p1 = scmp.ne.s32.totalorder %s3939_s9, %s2680_s1  ;;  %p2687_p0 = scmp.lt.u32.totalorder %s2680_s1, %s3939_s9 }
  0x8a   : > { %p2683_p3 = pnand %p2681_p1, %p3288_p8 }
  0x8c   : > { %p2684_p13 = pneg %p2683_p3 }
  0x8e   : > { %p2689_p2 = pnand %p2687_p0, %p2684_p13 }
  0x90   : > { %2692 = shalt.err (!%p2689_p2)
}
  0x91   : > { %s2693_s26 = scalar_lea.vmem %s518_s16, 16  ;;  %s2700_s25 = scalar_lea.vmem %s518_s16, 32 }
  0x92   : > { %p2694_p5 = scmp.ne.s32.totalorder %s518_s16, %s2693_s26  ;;  %p2701_p10 = scmp.lt.s32.totalorder %s518_s16, %s518_s16 }
  0x93   : > { %p2702_p11 = scmp.lt.s32.totalorder %s2700_s25, %s2693_s26 }
  0x94   : > { %p2696_p7 = pnand %p2694_p5, %p3288_p8 }
  0x95   : > { %p2703_p12 = por %p2702_p11, %p2701_p10 }
  0x96   : > { %p2697_p9 = pneg %p2696_p7 }
  0x98   : > { %p2704_p4 = pnand %p2703_p12, %p2697_p9 }
  0x9a   : > { %2707 = shalt.err (!%p2704_p4)
}
  0x9b   : > { %2427 = dma.hbm_to_vmem [thread:$0]  (!%p3274_p6), %s3939_s9, 16, %s518_s16, [#allocation18]  }
  0x9c   : > { %s3131_s2 = smov [#allocation20]   ;;  %s3132_s22 = smov [#allocation23]  }
  0x9d   : > { %s541_s3 = sshll.u32 %s3131_s2, 4  ;;  %s565_s23 = sshll.u32 %s3132_s22, 4  ;;  %s542_s3 = int_to_ptr.vmem [resolvable:$true] %s541_s3  ;;  %s566_s23 = int_to_ptr.vmem [resolvable:$true] %s565_s23 }
  0x9e   : > { %s2708_s20 = scalar_lea.hbm %s3941_s11, 16 }
  0x9f   : > { %p2709_p1 = scmp.ne.s32.totalorder %s3941_s11, %s2708_s20  ;;  %p2715_p0 = scmp.lt.u32.totalorder %s2708_s20, %s3941_s11 }
  0xa1   : > { %p2711_p3 = pnand %p2709_p1, %p3288_p8 }
  0xa3   : > { %p2712_p13 = pneg %p2711_p3 }
  0xa5   : > { %p2717_p2 = pnand %p2715_p0, %p2712_p13 }
  0xa7   : > { %2720 = shalt.err (!%p2717_p2)
}
  0xa8   : > { %s2721_s16 = scalar_lea.vmem %s542_s3, 16  ;;  %s2728_s30 = scalar_lea.vmem %s542_s3, 32 }
  0xa9   : > { %p2722_p5 = scmp.ne.s32.totalorder %s542_s3, %s2721_s16  ;;  %p2729_p10 = scmp.lt.s32.totalorder %s542_s3, %s542_s3 }
  0xaa   : > { %p2730_p11 = scmp.lt.s32.totalorder %s2728_s30, %s2721_s16 }
  0xab   : > { %p2724_p7 = pnand %p2722_p5, %p3288_p8 }
  0xac   : > { %p2731_p12 = por %p2730_p11, %p2729_p10 }
  0xad   : > { %p2725_p9 = pneg %p2724_p7 }
  0xaf   : > { %p2732_p4 = pnand %p2731_p12, %p2725_p9 }
  0xb1   : > { %2735 = shalt.err (!%p2732_p4)
}
  0xb2   : > { %2433 = dma.hbm_to_vmem [thread:$0]  (!%p3274_p6), %s3941_s11, 16, %s542_s3, [#allocation21]  }
  0xb3   : > { %s2736_s19 = scalar_lea.hbm %s3943_s13, 16 }
  0xb4   : > { %p2737_p1 = scmp.ne.s32.totalorder %s3943_s13, %s2736_s19  ;;  %p2743_p0 = scmp.lt.u32.totalorder %s2736_s19, %s3943_s13 }
  0xb6   : > { %p2739_p3 = pnand %p2737_p1, %p3288_p8 }
  0xb8   : > { %p2740_p13 = pneg %p2739_p3 }
  0xba   : > { %p2745_p2 = pnand %p2743_p0, %p2740_p13 }
  0xbc   : > { %2748 = shalt.err (!%p2745_p2)
}
  0xbd   : > { %s2749_s25 = scalar_lea.vmem %s566_s23, 16  ;;  %s2756_s3 = scalar_lea.vmem %s566_s23, 32 }
  0xbe   : > { %p2750_p5 = scmp.ne.s32.totalorder %s566_s23, %s2749_s25  ;;  %p2757_p10 = scmp.lt.s32.totalorder %s566_s23, %s566_s23 }
  0xbf   : > { %p2758_p11 = scmp.lt.s32.totalorder %s2756_s3, %s2749_s25 }
  0xc0   : > { %p2752_p7 = pnand %p2750_p5, %p3288_p8 }
  0xc1   : > { %p2759_p12 = por %p2758_p11, %p2757_p10 }
  0xc2   : > { %p2753_p9 = pneg %p2752_p7 }
  0xc4   : > { %p2760_p4 = pnand %p2759_p12, %p2753_p9 }
  0xc6   : > { %2763 = shalt.err (!%p2760_p4)
}
  0xc7   : > { %2439 = dma.hbm_to_vmem [thread:$0]  (!%p3274_p6), %s3943_s13, 16, %s566_s23, [#allocation24]  }
  0xc8   : > { %s3133_s18 = smov [#allocation10]   ;;  %s3134_s22 = smov [#allocation13]  }
  0xc9   : > { %s453_s2 = sshll.u32 %s3133_s18, 4  ;;  %s479_s1 = sshll.u32 %s3134_s22, 4  ;;  %s454_s2 = int_to_ptr.vmem [resolvable:$true] %s453_s2  ;;  %s480_s1 = int_to_ptr.vmem [resolvable:$true] %s479_s1 }
  0xca   : > { %s3979_s4 = sld [smem:[#allocation49_spill]] }
  0xd0   : > { %s2764_s17 = scalar_lea.hbm %s3979_s4, 256 }
  0xd1   : > { %p2765_p1 = scmp.ne.s32.totalorder %s3979_s4, %s2764_s17  ;;  %p2771_p0 = scmp.lt.u32.totalorder %s2764_s17, %s3979_s4 }
  0xd3   : > { %p2767_p3 = pnand %p2765_p1, %p3288_p8 }
  0xd5   : > { %p2768_p13 = pneg %p2767_p3 }
  0xd7   : > { %p2773_p2 = pnand %p2771_p0, %p2768_p13 }
  0xd9   : > { %2776 = shalt.err (!%p2773_p2)
}
  0xda   : > { %s2777_s23 = scalar_lea.vmem %s454_s2, 256  ;;  %p2785_p10 = scmp.lt.s32.totalorder %s454_s2, %s454_s2 }
  0xdb   : > { %p2778_p5 = scmp.ne.s32.totalorder %s454_s2, %s2777_s23  ;;  %p2786_p11 = scmp.lt.s32.totalorder %s2777_s23, %s2777_s23 }
  0xdd   : > { %p2780_p7 = pnand %p2778_p5, %p3288_p8  ;;  %p2787_p12 = por %p2786_p11, %p2785_p10 }
  0xdf   : > { %p2781_p9 = pneg %p2780_p7 }
  0xe1   : > { %p2788_p4 = pnand %p2787_p12, %p2781_p9 }
  0xe3   : > { %2791 = shalt.err (!%p2788_p4)
}
  0xe4   : > { %2412 = dma.hbm_to_vmem [thread:$0]  (!%p3274_p6), %s3979_s4, 256, %s454_s2, [#allocation9], %s3127_s21, %s3127_s21, %s3128_s27  }
  0xe5   : > { %s3980_s6 = sld [smem:[#allocation51_spill]] }
  0xeb   : > { %s2792_s19 = scalar_lea.hbm %s3980_s6, 256 }
  0xec   : > { %p2793_p1 = scmp.ne.s32.totalorder %s3980_s6, %s2792_s19  ;;  %p2799_p0 = scmp.lt.u32.totalorder %s2792_s19, %s3980_s6 }
  0xee   : > { %p2795_p3 = pnand %p2793_p1, %p3288_p8 }
  0xf0   : > { %p2796_p13 = pneg %p2795_p3 }
  0xf2   : > { %p2801_p2 = pnand %p2799_p0, %p2796_p13 }
  0xf4   : > { %2804 = shalt.err (!%p2801_p2)
}
  0xf5   : > { %s2805_s25 = scalar_lea.vmem %s480_s1, 256  ;;  %p2813_p10 = scmp.lt.s32.totalorder %s480_s1, %s480_s1 }
  0xf6   : > { %p2806_p5 = scmp.ne.s32.totalorder %s480_s1, %s2805_s25  ;;  %p2814_p11 = scmp.lt.s32.totalorder %s2805_s25, %s2805_s25 }
  0xf8   : > { %p2808_p7 = pnand %p2806_p5, %p3288_p8  ;;  %p2815_p12 = por %p2814_p11, %p2813_p10 }
  0xfa   : > { %p2809_p9 = pneg %p2808_p7 }
  0xfc   : > { %p2816_p4 = pnand %p2815_p12, %p2809_p9 }
  0xfe   : > { %2819 = shalt.err (!%p2816_p4)
}
  0xff   : > { %2418 = dma.hbm_to_vmem [thread:$0]  (!%p3274_p6), %s3980_s6, 256, %s480_s1, [#allocation12], %s3127_s21, %s3127_s21, %s3128_s27  }
 0x100   : > { %s3135_s23 = smov [#allocation16]   ;;  %s3136_s30 = smov [#allocation19]  }
 0x101   : > { %s506_s16 = sshll.u32 %s3135_s23, 4  ;;  %s527_s18 = sshll.u32 %s3136_s30, 4  ;;  %s507_s16 = int_to_ptr.vmem [resolvable:$true] %s506_s16  ;;  %s528_s18 = int_to_ptr.vmem [resolvable:$true] %s527_s18 }
 0x102   : > { %s2820_s20 = scalar_lea.hbm %s3938_s8, 16 }
 0x103   : > { %p2821_p1 = scmp.ne.s32.totalorder %s3938_s8, %s2820_s20  ;;  %p2827_p0 = scmp.lt.u32.totalorder %s2820_s20, %s3938_s8 }
 0x105   : > { %p2823_p3 = pnand %p2821_p1, %p3288_p8 }
 0x107   : > { %p2824_p13 = pneg %p2823_p3 }
 0x109   : > { %p2829_p2 = pnand %p2827_p0, %p2824_p13 }
 0x10b   : > { %2832 = shalt.err (!%p2829_p2)
}
 0x10c   : > { %s2833_s1 = scalar_lea.vmem %s507_s16, 16  ;;  %s2840_s2 = scalar_lea.vmem %s507_s16, 32 }
 0x10d   : > { %p2834_p5 = scmp.ne.s32.totalorder %s507_s16, %s2833_s1  ;;  %p2841_p10 = scmp.lt.s32.totalorder %s507_s16, %s507_s16 }
 0x10e   : > { %p2842_p11 = scmp.lt.s32.totalorder %s2840_s2, %s2833_s1 }
 0x10f   : > { %p2836_p7 = pnand %p2834_p5, %p3288_p8 }
 0x110   : > { %p2843_p12 = por %p2842_p11, %p2841_p10 }
 0x111   : > { %p2837_p9 = pneg %p2836_p7 }
 0x113   : > { %p2844_p4 = pnand %p2843_p12, %p2837_p9 }
 0x115   : > { %2847 = shalt.err (!%p2844_p4)
}
 0x116   : > { %2424 = dma.hbm_to_vmem [thread:$0]  (!%p3274_p6), %s3938_s8, 16, %s507_s16, [#allocation15]  }
 0x117   : > { %s2848_s19 = scalar_lea.hbm %s3940_s10, 256 }
 0x118   : > { %p2849_p1 = scmp.ne.s32.totalorder %s3940_s10, %s2848_s19  ;;  %p2855_p0 = scmp.lt.u32.totalorder %s2848_s19, %s3940_s10 }
 0x11a   : > { %p2851_p3 = pnand %p2849_p1, %p3288_p8 }
 0x11c   : > { %p2852_p13 = pneg %p2851_p3 }
 0x11e   : > { %p2857_p2 = pnand %p2855_p0, %p2852_p13 }
 0x120   : > { %2860 = shalt.err (!%p2857_p2)
}
 0x121   : > { %s2861_s25 = scalar_lea.vmem %s528_s18, 256  ;;  %p2869_p10 = scmp.lt.s32.totalorder %s528_s18, %s528_s18 }
 0x122   : > { %p2862_p5 = scmp.ne.s32.totalorder %s528_s18, %s2861_s25  ;;  %p2870_p11 = scmp.lt.s32.totalorder %s2861_s25, %s2861_s25 }
 0x124   : > { %p2864_p7 = pnand %p2862_p5, %p3288_p8  ;;  %p2871_p12 = por %p2870_p11, %p2869_p10 }
 0x126   : > { %p2865_p9 = pneg %p2864_p7 }
 0x128   : > { %p2872_p4 = pnand %p2871_p12, %p2865_p9 }
 0x12a   : > { %2875 = shalt.err (!%p2872_p4)
}
 0x12b   : > { %2430 = dma.hbm_to_vmem [thread:$0]  (!%p3274_p6), %s3940_s10, 256, %s528_s18, [#allocation18], %s3127_s21, %s3127_s21, %s3128_s27  }
 0x12c   : > { %s3137_s2 = smov [#allocation22]   ;;  %s3138_s23 = smov [#allocation25]  }
 0x12d   : > { %s551_s3 = sshll.u32 %s3137_s2, 4  ;;  %s576_s30 = sshll.u32 %s3138_s23, 4  ;;  %s552_s3 = int_to_ptr.vmem [resolvable:$true] %s551_s3  ;;  %s577_s30 = int_to_ptr.vmem [resolvable:$true] %s576_s30 }
 0x12e   : > { %s2876_s20 = scalar_lea.hbm %s3942_s12, 256 }
 0x12f   : > { %p2877_p1 = scmp.ne.s32.totalorder %s3942_s12, %s2876_s20  ;;  %p2883_p0 = scmp.lt.u32.totalorder %s2876_s20, %s3942_s12 }
 0x131   : > { %p2879_p3 = pnand %p2877_p1, %p3288_p8 }
 0x133   : > { %p2880_p13 = pneg %p2879_p3 }
 0x135   : > { %p2885_p2 = pnand %p2883_p0, %p2880_p13 }
 0x137   : > { %2888 = shalt.err (!%p2885_p2)
}
 0x138   : > { %s2889_s18 = scalar_lea.vmem %s552_s3, 256  ;;  %p2897_p10 = scmp.lt.s32.totalorder %s552_s3, %s552_s3 }
 0x139   : > { %p2890_p5 = scmp.ne.s32.totalorder %s552_s3, %s2889_s18  ;;  %p2898_p11 = scmp.lt.s32.totalorder %s2889_s18, %s2889_s18 }
 0x13b   : > { %p2892_p7 = pnand %p2890_p5, %p3288_p8  ;;  %p2899_p12 = por %p2898_p11, %p2897_p10 }
 0x13d   : > { %p2893_p9 = pneg %p2892_p7 }
 0x13f   : > { %p2900_p4 = pnand %p2899_p12, %p2893_p9 }
 0x141   : > { %2903 = shalt.err (!%p2900_p4)
}
 0x142   : > { %2436 = dma.hbm_to_vmem [thread:$0]  (!%p3274_p6), %s3942_s12, 256, %s552_s3, [#allocation21], %s3127_s21, %s3127_s21, %s3128_s27  }
 0x143   : > { %s2904_s22 = scalar_lea.hbm %s3944_s14, 16 }
 0x144   : > { %p2905_p1 = scmp.ne.s32.totalorder %s3944_s14, %s2904_s22  ;;  %p2911_p0 = scmp.lt.u32.totalorder %s2904_s22, %s3944_s14 }
 0x146   : > { %p2907_p3 = pnand %p2905_p1, %p3288_p8 }
 0x148   : > { %p2908_p13 = pneg %p2907_p3 }
 0x14a   : > { %p2913_p2 = pnand %p2911_p0, %p2908_p13 }
 0x14c   : > { %2916 = shalt.err (!%p2913_p2)
}
 0x14d   : > { %s2917_s26 = scalar_lea.vmem %s577_s30, 16  ;;  %s2924_s21 = scalar_lea.vmem %s577_s30, 32 }
 0x14e   : > { %p2918_p5 = scmp.ne.s32.totalorder %s577_s30, %s2917_s26  ;;  %p2925_p10 = scmp.lt.s32.totalorder %s577_s30, %s577_s30 }
 0x14f   : > { %p2926_p11 = scmp.lt.s32.totalorder %s2924_s21, %s2917_s26 }
 0x150   : > { %p2920_p7 = pnand %p2918_p5, %p3288_p8 }
 0x151   : > { %p2927_p12 = por %p2926_p11, %p2925_p10 }
 0x152   : > { %p2921_p9 = pneg %p2920_p7 }
 0x154   : > { %p2928_p4 = pnand %p2927_p12, %p2921_p9 }
 0x156   : > { %2931 = shalt.err (!%p2928_p4)
}
 0x157   : > { %2442 = dma.hbm_to_vmem [thread:$0]  (!%p3274_p6), %s3944_s14, 16, %s577_s30, [#allocation24]  }
 0x158   : > { %s3139_s25 = smov [#allocation26]   ;;  %s2932_s2 = scalar_lea.hbm %s3945_s15, 16 }
 0x159   : > { %s587_s18 = sshll.u32 %s3139_s25, 4  ;;  %p2933_p1 = scmp.ne.s32.totalorder %s3945_s15, %s2932_s2  ;;  %s588_s18 = int_to_ptr.vmem [resolvable:$true] %s587_s18 }
 0x15a   : > { %p2939_p0 = scmp.lt.u32.totalorder %s2932_s2, %s3945_s15 }
 0x15b   : > { %p2935_p3 = pnand %p2933_p1, %p3288_p8 }
 0x15d   : > { %p2936_p13 = pneg %p2935_p3 }
 0x15f   : > { %p2941_p2 = pnand %p2939_p0, %p2936_p13 }
 0x161   : > { %2944 = shalt.err (!%p2941_p2)
}
 0x162   : > { %s2945_s30 = scalar_lea.vmem %s588_s18, 16  ;;  %s2952_s17 = scalar_lea.vmem %s588_s18, 32 }
 0x163   : > { %p2946_p5 = scmp.ne.s32.totalorder %s588_s18, %s2945_s30  ;;  %p2953_p10 = scmp.lt.s32.totalorder %s588_s18, %s588_s18 }
 0x164   : > { %p2954_p11 = scmp.lt.s32.totalorder %s2952_s17, %s2945_s30 }
 0x165   : > { %p2948_p7 = pnand %p2946_p5, %p3288_p8 }
 0x166   : > { %p2955_p12 = por %p2954_p11, %p2953_p10 }
 0x167   : > { %p2949_p9 = pneg %p2948_p7 }
 0x169   : > { %p2956_p4 = pnand %p2955_p12, %p2949_p9 }
 0x16b   : > { %2959 = shalt.err (!%p2956_p4)
}
 0x16c   : > { %s3981_s21 = sld [smem:[#allocation42_spill]]  ;;  %s3982_s27 = sld [smem:[#allocation41_spill]] }
 0x16d   : > { %s3983_s29 = sld [smem:[#allocation40_spill]]  ;;  %s3984_s3 = sld [smem:[#allocation43_spill]] }
 0x16e   : > { %2445 = dma.hbm_to_vmem [thread:$0]  (!%p3274_p6), %s3945_s15, 16, %s588_s18, [#allocation27]  }
 0x16f   : > { %s2164_s25 = sadd.s32 4294967294, %s3122_s24   ;;  %s3575_s0 = sadd.s32 1, %s3122_s24  }
 0x170   : > { %s46_s16 = ssub.s32 %s3122_s24, %s3575_s0  ;;  %p57_p3 = scmp.eq.s32.totalorder %s3122_s24, 0 }
 0x171   : > { %p47_p8 = scmp.eq.s32.totalorder %s46_s16, 0  ;;  %p412_p7 = scmp.eq.s32.totalorder %s2164_s25, 1 }
 0x172   : > { %s49_s1 = sadd.s32 1, %s3981_s21  ;;  %p56_p1 = scmp.ne.s32.totalorder %s3981_s21, %s3982_s27 }
 0x173   : > { %p62_p13 = scmp.ne.s32.totalorder %s3982_s27, %s3983_s29  ;;  %p3986_p2 = scmp.eq.s32.totalorder %s3984_s3, 0 }
 0x174   : > { %s3586_s2 = scalar_select %p47_p8, %s3981_s21, %s49_s1  }
 0x175   : > { %p3588_p0 = por %p57_p3, %p56_p1  ;;  %p3594_p6 = por %p3986_p2, %p62_p13 }
 0x176   : > { %p406_p5 = scmp.eq.s32.totalorder %s3984_s3, 1  ;;  %p2471_p9 = scmp.lt.s32.totalorder %s3122_s24, 2 }
 0x177   : > { %s3987_s18 = scalar_select %p3594_p6, 1, 0 }
 0x178   : > { %s3601_s22 = sand.u32 1, %s3981_s21   ;;  %p3603_p10 = por %p406_p5, %p56_p1 }
 0x179   : > { %p3607_p11 = por %p412_p7, %p62_p13  ;;  %s2181_s30 = sshll.u32 %s3601_s22, 3 }
 0x17a   : > { %s3988_s19 = scalar_select %p3603_p10, 1, 0 }
 0x17b   : > { %s3989_s20 = scalar_select %p3607_p11, 1, 0 }
 0x17c   : > { %s2182_s17 = sshll.u32 %s3122_s24, 7  ;;  %s3990_s27 = sld [smem:[#allocation45_spill]] }
 0x17d   : > { %s602_s21 = scalar_lea.vmem [#allocation2], %s2181_s30  ;;  %p3622_p12 = pnand %p2471_p9, %p3588_p0 }
 0x17e   : > { %s609_s3 = sshll.u32 %s602_s21, 4  ;;  %s599_s1 = scalar_lea.sflag [#allocation3], %s3601_s22  ;;  %s3618_s3 = int_to_ptr.vmem [resolvable:$true] %s609_s3 }
 0x17f   : > { %p2962_p8 = pneg %p3622_p12 }
 0x182   : > { %s3616_s29 = scalar_lea.hbm %s3990_s27, %s2182_s17  ;;  %s2965_s23 = scalar_lea.hbm %s3990_s27, 256 }
 0x183   : > { %s2960_s28 = scalar_lea.hbm %s3616_s29, 128  ;;  %p2966_p13 = scmp.lt.u32.totalorder %s3616_s29, %s3990_s27 }
 0x184   : > { %p2961_p4 = scmp.ne.s32.totalorder %s3616_s29, %s2960_s28  ;;  %p2967_p0 = scmp.lt.u32.totalorder %s2965_s23, %s2960_s28 }
 0x185   : > { %p2969_p5 = scmp.lt.u32.totalorder %s2960_s28, %s3616_s29 }
 0x186   : > { %p2963_p1 = pnand %p2962_p8, %p2961_p4  ;;  %p2968_p2 = por %p2967_p0, %p2966_p13 }
 0x188   : > { %p2964_p3 = pneg %p2963_p1  ;;  %p2970_p7 = por %p2969_p5, %p2968_p2 }
 0x18a   : > { %p2971_p9 = pnand %p2970_p7, %p2964_p3 }
 0x18c   : > { %2974 = shalt.err (!%p2971_p9)
}
 0x18d   : > { %s2975_s16 = scalar_lea.vmem %s3618_s3, 128  ;;  %s3140_s30 = smov [#allocation2]  }
 0x18e   : > { %p2976_p4 = scmp.ne.s32.totalorder %s3618_s3, %s2975_s16  ;;  %s2980_s17 = sshll.u32 %s3140_s30, 4  ;;  %s2981_s17 = int_to_ptr.vmem [resolvable:$false] %s2980_s17 }
 0x18f   : > { %s2982_s26 = scalar_lea.vmem %s2981_s17, 256  ;;  %p2983_p10 = scmp.lt.s32.totalorder %s3618_s3, %s2981_s17 }
 0x190   : > { %p2978_p1 = pnand %p2976_p4, %p2962_p8  ;;  %p2984_p13 = scmp.lt.s32.totalorder %s2982_s26, %s2975_s16 }
 0x192   : > { %p2979_p11 = pneg %p2978_p1  ;;  %p2985_p0 = por %p2984_p13, %p2983_p10 }
 0x194   : > { %p2986_p2 = pnand %p2985_p0, %p2979_p11 }
 0x196   : > { %2989 = shalt.err (!%p2986_p2)
}
 0x197   : > { %2449 = dma.hbm_to_vmem [thread:$0]  (!%p3622_p12), %s3616_s29, 128, %s3618_s3, %s599_s1  }
 0x198   : > { %s2183_s28 = sshll.u32 %s3122_s24, 4  ;;  %s619_s23 = scalar_lea.vmem [#allocation5], %s3601_s22 }
 0x199   : > { %s626_s21 = sshll.u32 %s619_s23, 4  ;;  %s3992_s5 = sld [smem:[#allocation46_spill]]  ;;  %s627_s21 = int_to_ptr.vmem [resolvable:$true] %s626_s21 }
 0x19a   : > { %s3993_s16 = sand.u32 1, %s3122_s24  }
 0x19b   : > { %s617_s26 = scalar_lea.sflag [#allocation6], %s3993_s16 }
 0x19f   : > { %s3658_s17 = scalar_lea.hbm %s3992_s5, %s2183_s28  ;;  %s2995_s3 = scalar_lea.hbm %s3992_s5, 32 }
 0x1a0   : > { %s2990_s6 = scalar_lea.hbm %s3658_s17, 16  ;;  %p2996_p5 = scmp.lt.u32.totalorder %s3658_s17, %s3992_s5 }
 0x1a1   : > { %p2991_p10 = scmp.ne.s32.totalorder %s3658_s17, %s2990_s6  ;;  %p2997_p7 = scmp.lt.u32.totalorder %s2995_s3, %s2990_s6 }
 0x1a2   : > { %p2999_p4 = scmp.lt.u32.totalorder %s2990_s6, %s3658_s17 }
 0x1a3   : > { %p2993_p11 = pnand %p2991_p10, %p2962_p8  ;;  %p2998_p9 = por %p2997_p7, %p2996_p5 }
 0x1a5   : > { %p2994_p3 = pneg %p2993_p11  ;;  %p3000_p1 = por %p2999_p4, %p2998_p9 }
 0x1a7   : > { %p3001_p13 = pnand %p3000_p1, %p2994_p3 }
 0x1a9   : > { %3004 = shalt.err (!%p3001_p13)
}
 0x1aa   : > { %s3005_s28 = scalar_lea.vmem %s627_s21, 16  ;;  %s3141_s23 = smov [#allocation5]  }
 0x1ab   : > { %p3006_p0 = scmp.ne.s32.totalorder %s627_s21, %s3005_s28  ;;  %s3010_s30 = sshll.u32 %s3141_s23, 4  ;;  %s3011_s30 = int_to_ptr.vmem [resolvable:$false] %s3010_s30 }
 0x1ac   : > { %s3012_s16 = scalar_lea.vmem %s3011_s30, 32  ;;  %p3013_p11 = scmp.lt.s32.totalorder %s627_s21, %s3011_s30 }
 0x1ad   : > { %p3008_p2 = pnand %p3006_p0, %p2962_p8  ;;  %p3014_p6 = scmp.lt.s32.totalorder %s3012_s16, %s3005_s28 }
 0x1af   : > { %p3009_p10 = pneg %p3008_p2  ;;  %p3015_p5 = por %p3014_p6, %p3013_p11 }
 0x1b1   : > { %p3016_p7 = pnand %p3015_p5, %p3009_p10 }
 0x1b3   : > { %3019 = shalt.err (!%p3016_p7)
}
 0x1b4   : > { %2452 = dma.hbm_to_vmem [thread:$0]  (!%p3622_p12), %s3658_s17, 16, %s627_s21, %s617_s26  }
 0x1b5   : > { %s3994_s6 = sld [smem:[#allocation44_spill]] }
 0x1bb   : > { %p3995_p3 = scmp.ne.s32.totalorder %s3994_s6, 0 }
 0x1bc   : > { %s3996_s22 = sld [smem:[#allocation41_spill]] (!%p3995_p3)  ;;  %p3997_p6 = scmp.ne.s32.totalorder (!%p3995_p3), %s3987_s18, 0 }
 0x1bd   : > { %635 = sbr.rel (%p3995_p3) target bundleno = 3343 (0xd0f), region = 84 }
 0x1c2   : > { %s3684_s29 = sand.u32 (!%p3995_p3), 1, %s3996_s22  }
 0x1c3   : > { %s2185_s3 = sshll.u32 (!%p3995_p3), %s3684_s29, 3  ;;  %s638_s4 = scalar_lea.sflag (!%p3995_p3), [#allocation3], %s3684_s29 }
 0x1c4   : > { %s641_s1 = scalar_lea.vmem [#allocation2], %s2185_s3 }
 0x1c5   : > { %3065 = dma.done.wait (%p3997_p6), %s638_s4, 128  }
 0x1c6   : > { %3067 = vsyncadd (%p3997_p6), %s638_s4, 4294967168  ;;  %s3998_s25 = sld [smem:[#allocation43_spill]]  ;;  %s649_s26 = scalar_lea.vmem [#allocation5], %s3684_s29 }
 0x1cc   : > { %s646_s21 = sand.u32 1, %s3998_s25  }
 0x1cd   : > { %s647_s17 = scalar_lea.sflag [#allocation6], %s646_s21 }
 0x1ce   : > { %3069 = dma.done.wait (%p3997_p6), %s647_s17, 16  }
 0x1cf   : > { %3071 = vsyncadd (%p3997_p6), %s647_s17, 4294967280  ;;  %p3999_p12 = scmp.eq.s32.totalorder %s3998_s25, 0 }
 0x1d1   : > { %3073 = dma.done.wait (%p3999_p12), [#allocation6], 16   ;;  %p4000_p8 = pmov %p3999_p12 }
 0x1d3   : > { %3075 = vsyncadd (%p4000_p8), [#allocation6], 4294967280  ;;  %p4001_p9 = pmov %p4000_p8 }
 0x1d4   : > { %p4002_p4 = pmov %p4000_p8 }
 0x1d5   : > { %3077 = dma.done.wait (%p4001_p9), [#allocation9], 272  }
 0x1d6   : > { %3079 = vsyncadd (%p4002_p4), [#allocation9], 4294967024  ;;  %p4003_p1 = pmov %p4002_p4 }
 0x1d8   : > { %3081 = dma.done.wait (%p4003_p1), [#allocation12], 512   ;;  %p4004_p13 = pmov %p4003_p1 }
 0x1d9   : > { %p4005_p0 = pmov %p4003_p1 }
 0x1da   : > { %3083 = vsyncadd (%p4004_p13), [#allocation12], 4294966784 }
 0x1db   : > { %3085 = dma.done.wait (%p4005_p0), [#allocation15], 272   ;;  %p4006_p2 = pmov %p4005_p0 }
 0x1dc   : > { %p4007_p10 = pmov %p4005_p0 }
 0x1dd   : > { %3087 = vsyncadd (%p4006_p2), [#allocation15], 4294967024 }
 0x1de   : > { %3089 = dma.done.wait (%p4007_p10), [#allocation18], 272   ;;  %p4008_p11 = pmov %p4005_p0 }
 0x1df   : > { %p4009_p5 = pmov %p4005_p0 }
 0x1e0   : > { %3091 = vsyncadd (%p4008_p11), [#allocation18], 4294967024 }
 0x1e1   : > { %3093 = dma.done.wait (%p4009_p5), [#allocation21], 272   ;;  %p4010_p7 = pmov %p4005_p0 }
 0x1e2   : > { %p4011_p3 = pmov %p4005_p0 }
 0x1e3   : > { %3095 = vsyncadd (%p4010_p7), [#allocation21], 4294967024 }
 0x1e4   : > { %3097 = dma.done.wait (%p4011_p3), [#allocation24], 32   ;;  %p4012_p6 = pmov %p4005_p0 }
 0x1e5   : > { %p4013_p12 = pmov %p4005_p0 }
 0x1e6   : > { %3099 = vsyncadd (%p4012_p6), [#allocation24], 4294967264 }
 0x1e7   : > { %3101 = dma.done.wait (%p4013_p12), [#allocation27], 16   ;;  %p4014_p8 = pmov %p4005_p0 }
 0x1e8   : > { %vm762_vm0 = vcmask 261120   ;;  %v759_v0 = vld [vmem:[%s641_s1] sm:$0xff]  ;;  %v2542_v7 = vld [vmem:[#allocation10] sm:$0xff]   ;;  %v3142_v9 = vmov 0.0   ;;  %vm3143_vm1 = vmmov 0   ;;  %s3144_s18 = smov 112   ;;  %v972_v39 = vlaneseq }
 0x1e9   : > { %3103 = vsyncadd (%p4014_p8), [#allocation27], 4294967280  ;;  %v763_v1 = vsel %vm762_vm0, %v759_v0, 0.0  ;;  %v2543_v8 = vld [vmem:[#allocation11] sm:$0xff]   ;;  %2269 = vmatprep.subr.bf16.mxu0 %v3142_v9  ;;  %2277 = vmatprep.subr.bf16.mxu1 %v3142_v9  ;;  %v2544_v10 = vld [vmem:[#allocation10 + $0x8] sm:$0xff]   ;;  %vm1328_vm2 = vcmask 130048  }
 0x1ea   : > { %764 = vadd.xlane.f32.xlu0 %v763_v1  ;;  %2270 = vmatpush3.bf16.msra.mxu0 %v2542_v7  ;;  %v2545_v11 = vld [vmem:[#allocation11 + $0x8] sm:$0xff]   ;;  %v2546_v21 = vld [vmem:[#allocation13] sm:$0xff]   ;;  %v2547_v23 = vld [vmem:[#allocation13 + $0x8] sm:$0xff]   ;;  %v3145_v37 = vmov 1983009808   ;;  %v3763_v41 = vshrl.u32 %v972_v39, 7 }
 0x1eb   : > { %2278 = vmatpush3.bf16.msra.mxu1 %v2543_v8  ;;  %2271 = vmatprep.subr.bf16.mxu0 %v3142_v9  ;;  %v2201_v16 = vld [vmem:[#allocation7] ss:$0 sm:$0xff]  ;;  %v2202_v18 = vld [vmem:[#allocation8] ss:$0 sm:$0xff]  ;;  %v970_v38 = vunpack.c.l.s4 %v3145_v37  ;;  %v3146_v42 = vmov 1934713408  }
 0x1ec   : > { %2279 = vmatprep.subr.bf16.mxu1 %v3142_v9  ;;  %2273 = vmatprep.mubr.msk.bf16.mxu0 %vm3143_vm1, %v3142_v9  ;;  %v1001_v43 = vunpack.c.l.s4 %v3146_v42  ;;  %vm1431_vm5 = vcmask 64512   ;;  %vm1461_vm6 = vcmask 1043456   ;;  %s3148_s28 = smov 16   ;;  %s2240_s23 = sshll.u32 %s3998_s25, 7 }
 0x1ed   : > { %2281 = vmatprep.mubr.msk.bf16.mxu1 %vm3143_vm1, %v3142_v9  ;;  %v971_v40 = vunpack.c.0.s8 %v970_v38  ;;  %s757_s30 = scalar_lea.vmem [#allocation28], %s2185_s3  ;;  %s4015_s4 = sld [smem:[#allocation52_spill]] }
 0x1ee   : > { %2272 = vmatpush3.bf16.msra.mxu0 %v2544_v10  ;;  %v1002_v45 = vunpack.c.0.s8 %v1001_v43  ;;  %s1941_s16 = sshll.u32 %s757_s30, 4  ;;  %s1928_s21 = scalar_lea.sflag [#allocation4], %s3684_s29  ;;  %s3887_s16 = int_to_ptr.vmem [resolvable:$true] %s1941_s16 }
 0x1ef   : > { %2280 = vmatpush3.bf16.msra.mxu1 %v2545_v11  ;;  %2285 = vmatprep.subr.bf16.mxu0 %v3142_v9  ;;  %v3766_v44 = vsub.s32 %v971_v40, %v3763_v41  ;;  %s3020_s17 = scalar_lea.vmem %s3887_s16, 128  ;;  %p4016_p4 = scmp.ne.s32.totalorder %s3988_s19, 0 }
 0x1f0   : > { %2293 = vmatprep.subr.bf16.mxu1 %v3142_v9  ;;  %v3771_v49 = vsub.s32 %v1002_v45, %v3763_v41  ;;  %p3021_p9 = scmp.ne.s32.totalorder %s3887_s16, %s3020_s17  ;;  %s3149_s3 = smov [#allocation28]  }
 0x1f1   : > { %s3024_s25 = sshll.u32 %s3149_s3, 4  ;;  %s3025_s25 = int_to_ptr.vmem [resolvable:$false] %s3024_s25 }
 0x1f2   : > { %p3022_p1 = pnand %p3021_p9, %p4016_p4  ;;  %p3027_p0 = scmp.lt.s32.totalorder %s3887_s16, %s3025_s25 }
 0x1f3   : > { %s3885_s1 = scalar_lea.hbm %s4015_s4, %s2240_s23 }
 0x1f4   : > { %p3023_p13 = pneg %p3022_p1 }
 0x277   : > { %v765_v2 = vpop.xlane.xlu0 %764 }
 0x278   : > { %v767_v3 = vmul.f32 0.03125, %v765_v2 }
 0x27a   : > { %v768_v4 = vsub.f32 %v759_v0, %v767_v3 }
 0x27c   : > { %v769_v5 = vmul.f32 %v768_v4, %v768_v4 }
 0x27e   : > { %v770_v6 = vsel %vm762_vm0, %v769_v5, 0.0 }
 0x27f   : > { %771 = vadd.xlane.f32.xlu0 %v770_v6 }
 0x30c   : > { %v772_v12 = vpop.xlane.xlu0 %771 }
 0x30d   : > { %v773_v13 = vmul.f32 0.03125, %v772_v12 }
 0x30f   : > { %v774_v14 = vadd.f32 1e-06, %v773_v13 }
 0x311   : > { %2554 = vrsqrt.f32 %v774_v14 }
 0x31b   : > { %v2555_v15 = vpop.eup %2554 }
 0x31c   : > { %v776_v17 = vmul.f32 %v2555_v15, %v768_v4 }
 0x31e   : > { %v783_v19 = vmul.f32 %v2201_v16, %v776_v17 }
 0x320   : > { %v3744_v20 = vadd.f32 %v2202_v18, %v783_v19 }
 0x322   : > { %v791_v22 = vpack.c.bf16 %v3744_v20, %v3744_v20 }
 0x324   : > { %2274 = vmatmul.mubr.msk.bf16.vlgmr.msra.gmra.mrb[0].mxu0 %vm762_vm0, %v791_v22  ;;  %2282 = vmatmul.mubr.msk.bf16.vlgmr.msra.gmra.mrb[0].mxu1 %vm762_vm0, %v791_v22 }
 0x325   : > { %2286 = vmatpush3.bf16.msra.mxu0 %v2546_v21  ;;  %2289 = vmatprep.mubr.msk.bf16.mxu0 %vm3143_vm1, %v3142_v9 }
 0x326   : > { %2287 = vmatprep.subr.bf16.mxu0 %v3142_v9  ;;  %2295 = vmatprep.mubr.msk.bf16.mxu1 %vm3143_vm1, %v3142_v9 }
 0x329   : > { %2288 = vmatpush3.bf16.msra.mxu0 %v2547_v23 }
 0x32a   : > { %2299 = vmatprep.subr.bf16.mxu0 %v3142_v9 }
 0x32c   : > { %2290 = vmatmul.mubr.msk.bf16.vlgmr.msra.gmra.mrb[4].mxu0 %vm762_vm0, %v791_v22 }
 0x32d   : > { %2301 = vmatprep.mubr.msk.bf16.mxu0 %vm3143_vm1, %v3142_v9 }
 0x3f7   : > { %v845_v24 = vpop.f32.mrb[0].mxu0  ;;  %v901_v25 = vpop.f32.mrb[0].mxu1 }
 0x3f8   : > { %1085 = vrot.lane.b32.xlu1 %v901_v25, %s3144_s18  ;;  %v2275_v26 = vpop.f32.mrb[1].mxu0  ;;  %v2283_v27 = vpop.f32.mrb[1].mxu1  ;;  %v963_v30 = vmul.f32 0.25, %v845_v24  ;;  %v1088_v46 = vcombine.high %v901_v25, %v3142_v9  ;;  %v1095_v48 = vrot.slane %v901_v25, %v3766_v44 }
 0x3f9   : > { %v848_v28 = vpop.f32.mrb[2].mxu0  ;;  %v904_v29 = vpop.f32.mrb[2].mxu1 }
 0x3fa   : > { %v2276_v31 = vpop.f32.mrb[3].mxu0  ;;  %v2284_v32 = vpop.f32.mrb[3].mxu1  ;;  %v1102_v52 = vrot.slane %v1088_v46, %v3766_v44  ;;  %v968_v56 = vcombine.high %v963_v30, %v3142_v9  ;;  %v975_v62 = vrot.slane %v963_v30, %v3766_v44 }
 0x3fc   : > { %965 = vrot.lane.b32.xlu1 %v963_v30, %s3144_s18  ;;  %v982_v5 = vrot.slane %v968_v56, %v3766_v44 }
 0x3ff   : > { %v3761_v33 = vpop.f32.mrb[4].mxu0 }
 0x400   : > { %v2291_v34 = vpop.f32.mrb[5].mxu0 }
 0x401   : > { %v960_v35 = vpop.f32.mrb[6].mxu0 }
 0x402   : > { %v2292_v36 = vpop.f32.mrb[7].mxu0 }
 0x46a   : > { %v1086_v47 = vpop.permute.xlu1 %1085 }
 0x46b   : > { %v1103_v50 = vcombine.high %v1086_v47, %v3142_v9  ;;  %v1110_v51 = vrot.slane %v1086_v47, %v3766_v44 }
 0x46d   : > { %v1117_v53 = vrot.slane %v1103_v50, %v3766_v44  ;;  %v1118_v54 = vcombine.low %v1095_v48, %v1110_v51  ;;  %v1119_v55 = vcombine.high %v1095_v48, %v1110_v51 }
 0x46e   : > { %v966_v57 = vpop.permute.xlu1 %965 }
 0x46f   : > { %v1126_v58 = vrot.slane %v1118_v54, %v3771_v49  ;;  %v1133_v59 = vrot.slane %v1119_v55, %v3771_v49  ;;  %v1134_v60 = vcombine.low %v1102_v52, %v1117_v53  ;;  %v1135_v61 = vcombine.high %v1102_v52, %v1117_v53  ;;  %v1421_v53 = vld [vmem:[%s649_s26] sm:$0x1]  ;;  %s3026_s26 = scalar_lea.vmem %s3025_s25, 256 }
 0x470   : > { %v983_v63 = vcombine.high %v966_v57, %v3142_v9  ;;  %v990_v0 = vrot.slane %v966_v57, %v3766_v44  ;;  %vm1422_vm3 = vcmp.gt.f32.partialorder %v1421_v53, 0.0  ;;  %v1426_v54 = vsub.s32 0, %v3763_v41  ;;  %p3028_p2 = scmp.lt.s32.totalorder %s3026_s26, %s3020_s17 }
 0x471   : > { %v1142_v1 = vrot.slane %v1134_v60, %v3771_v49  ;;  %v1149_v2 = vrot.slane %v1135_v61, %v3771_v49  ;;  %v1154_v3 = vcombine.low %v1126_v58, %v1133_v59  ;;  %v2214_v4 = vcombine.high %v1126_v58, %v1133_v59 }
 0x472   : > { %v997_v6 = vrot.slane %v983_v63, %v3766_v44  ;;  %v998_v7 = vcombine.low %v975_v62, %v990_v0  ;;  %v999_v8 = vcombine.high %v975_v62, %v990_v0  ;;  %v3147_v55 = vmov 0   ;;  %p3029_p10 = por %p3028_p2, %p3027_p0 }
 0x473   : > { %v1161_v10 = vrot.slane %v1154_v3, %v3766_v44  ;;  %v1169_v11 = vrot.slane %v2214_v4, %v3766_v44  ;;  %v1170_v12 = vcombine.low %v1142_v1, %v1149_v2  ;;  %v2215_v13 = vcombine.high %v1142_v1, %v1149_v2 }
 0x474   : > { %v1006_v14 = vrot.slane %v998_v7, %v3771_v49  ;;  %v1013_v15 = vrot.slane %v999_v8, %v3771_v49  ;;  %v1014_v16 = vcombine.low %v982_v5, %v997_v6  ;;  %v1015_v17 = vcombine.high %v982_v5, %v997_v6  ;;  %p3030_p11 = pnand %p3029_p10, %p3023_p13 }
 0x475   : > { %v1177_v18 = vrot.slane %v1170_v12, %v3766_v44  ;;  %v1185_v19 = vrot.slane %v2215_v13, %v3766_v44  ;;  %v1186_v21 = vcombine.low %v1161_v10, %v1169_v11  ;;  %v1423_v56 = vsel %vm1422_vm3, 1, %v3147_v55 }
 0x476   : > { %v1022_v22 = vrot.slane %v1014_v16, %v3771_v49  ;;  %v1029_v23 = vrot.slane %v1015_v17, %v3771_v49  ;;  %v1034_v24 = vcombine.low %v1006_v14, %v1013_v15  ;;  %v2212_v25 = vcombine.high %v1006_v14, %v1013_v15 }
 0x477   : > { %v1194_v26 = vcombine.low %v1177_v18, %v1185_v19  ;;  %v1193_v31 = vrot.slane %v1186_v21, %v3771_v49  ;;  %v1427_v57 = vrot.slane %v1423_v56, %v1426_v54  ;;  %v1208_v18 = vcombine.high %v3761_v33, %v3142_v9 }
 0x478   : > { %v1041_v27 = vrot.slane %v1034_v24, %v3766_v44  ;;  %v1049_v28 = vrot.slane %v2212_v25, %v3766_v44  ;;  %v1050_v29 = vcombine.low %v1022_v22, %v1029_v23  ;;  %v2213_v30 = vcombine.high %v1022_v22, %v1029_v23 }
 0x479   : > { %v1201_v32 = vrot.slane %v1194_v26, %v3771_v49  ;;  %vm1428_vm4 = vcmp.eq.s32.totalorder %v1427_v57, 1  ;;  %v1215_v21 = vrot.slane %v3761_v33, %v3766_v44  ;;  %v1222_v24 = vrot.slane %v1208_v18, %v3766_v44  ;;  %v2549_v18 = vld [vmem:[#allocation14 + $0x8] sm:$0xff]  }
 0x47a   : > { %v1057_v34 = vrot.slane %v1050_v29, %v3766_v44  ;;  %v1065_v35 = vrot.slane %v2213_v30, %v3766_v44  ;;  %v1066_v36 = vcombine.low %v1041_v27, %v1049_v28 }
 0x47b   : > { %v1202_v37 = vcombine.low %v1193_v31, %v1201_v32  ;;  %v1203_v38 = vcombine.high %v1193_v31, %v1201_v32 }
 0x47c   : > { %v1074_v39 = vcombine.low %v1057_v34, %v1065_v35  ;;  %v1073_v45 = vrot.slane %v1066_v36, %v3771_v49 }
 0x47d   : > { %v1326_v40 = vpack.c.bf16 %v1202_v37, %v1202_v37  ;;  %v1327_v42 = vpack.c.bf16 %v1203_v38, %v1203_v38 }
 0x47e   : > { %v1081_v43 = vrot.slane %v1074_v39, %v3771_v49 }
 0x47f   : > { %v1333_v46 = vsel %vm1328_vm2, %v1326_v40, 0  ;;  %v1379_v47 = vsel %vm1328_vm2, %v1327_v42, 0 }
 0x480   : > { %2294 = vmatpush3.bf16.xpose.msra.mxu1 %v1333_v46  ;;  %2300 = vmatpush3.bf16.xpose.msra.mxu0 %v1379_v47  ;;  %v1082_v48 = vcombine.low %v1073_v45, %v1081_v43  ;;  %v1083_v50 = vcombine.high %v1073_v45, %v1081_v43 }
 0x481   : > { %2305 = vmatprep.subr.bf16.mxu1 %v3142_v9  ;;  %2311 = vmatprep.subr.bf16.mxu0 %v3142_v9 }
 0x482   : > { %v1324_v51 = vpack.c.bf16 %v1082_v48, %v1082_v48  ;;  %v1325_v52 = vpack.c.bf16 %v1083_v50, %v1083_v50 }
 0x487   : > { %2296 = vmatmul.mubr.msk.bf16.vlgmr.msra.gmra.mrb[4].mxu1 %vm1328_vm2, %v1324_v51  ;;  %2302 = vmatmul.mubr.msk.bf16.vlgmr.msra.gmra.mrb[8].mxu0 %vm1328_vm2, %v1325_v52 }
 0x488   : > { %2307 = vmatprep.mubr.msk.bf16.mxu1 %vm3143_vm1, %v3142_v9  ;;  %2313 = vmatprep.mubr.msk.bf16.mxu0 %vm3143_vm1, %v3142_v9 }
 0x55a   : > { %v1369_v58 = vpop.f32.mrb[4].mxu1  ;;  %v1415_v59 = vpop.f32.mrb[8].mxu0 }
 0x55b   : > { %v1429_v60 = vsel %vm1428_vm4, %v1369_v58, -1e+09  ;;  %v1430_v61 = vsel %vm1428_vm4, %v1415_v59, -1e+09  ;;  %v2297_v62 = vpop.f32.mrb[5].mxu1  ;;  %v2303_v63 = vpop.f32.mrb[9].mxu0 }
 0x55c   : > { %v1372_v0 = vpop.f32.mrb[6].mxu1  ;;  %v1418_v1 = vpop.f32.mrb[10].mxu0  ;;  %v1432_v2 = vsel %vm1431_vm5, %v1429_v60, -inf  ;;  %v1435_v3 = vsel %vm1431_vm5, %v1430_v61, -inf }
 0x55d   : > { %1433 = vmax.xlane.f32.xlu0 %v1432_v2  ;;  %v2298_v4 = vpop.f32.mrb[7].mxu1  ;;  %1436 = vmax.xlane.f32.xlu1 %v1435_v3  ;;  %v2304_v41 = vpop.f32.mrb[11].mxu0 }
 0x5ea   : > { %v1434_v5 = vpop.xlane.xlu0 %1433  ;;  %v1437_v6 = vpop.xlane.xlu1 %1436 }
 0x5eb   : > { %v1438_v7 = vsub.f32 %v1429_v60, %v1434_v5  ;;  %v1439_v8 = vsub.f32 %v1430_v61, %v1437_v6  ;;  %v2548_v61 = vld [vmem:[#allocation14] sm:$0xff]  }
 0x5ed   : > { %v1440_v10 = vmul.f32 1.442695, %v1438_v7  ;;  %v1442_v11 = vmul.f32 1.442695, %v1439_v8 }
 0x5ef   : > { %2556 = vpow2.f32 %v1440_v10 }
 0x5f0   : > { %2558 = vpow2.f32 %v1442_v11 }
 0x5f9   : > { %v2557_v12 = vpop.eup %2556 }
 0x5fa   : > { %v1444_v13 = vsel %vm1431_vm5, %v2557_v12, 0.0  ;;  %v2559_v14 = vpop.eup %2558 }
 0x5fb   : > { %1445 = vadd.xlane.f32.xlu0 %v1444_v13  ;;  %v1447_v15 = vsel %vm1431_vm5, %v2559_v14, 0.0 }
 0x5ff   : > { %1448 = vadd.xlane.f32.xlu0 %v1447_v15 }
 0x615   : > { %1205 = vrot.lane.b32.xlu0 %v3761_v33, %s3144_s18 }
 0x688   : > { %v1446_v16 = vpop.xlane.xlu0 %1445 }
 0x689   : > { %2560 = vrcp.f32 %v1446_v16 }
 0x68c   : > { %v1449_v17 = vpop.xlane.xlu0 %1448 }
 0x68d   : > { %2562 = vrcp.f32 %v1449_v17 }
 0x690   : > { %v1206_v19 = vpop.permute.xlu0 %1205 }
 0x691   : > { %v1223_v22 = vcombine.high %v1206_v19, %v3142_v9  ;;  %v1230_v23 = vrot.slane %v1206_v19, %v3766_v44 }
 0x693   : > { %v1237_v25 = vrot.slane %v1223_v22, %v3766_v44  ;;  %v1238_v26 = vcombine.low %v1215_v21, %v1230_v23  ;;  %v1239_v27 = vcombine.high %v1215_v21, %v1230_v23  ;;  %v2561_v46 = vpop.eup %2560 }
 0x694   : > { %v1452_v53 = vmul.f32 %v2561_v46, %v2557_v12 }
 0x695   : > { %v1246_v28 = vrot.slane %v1238_v26, %v3771_v49  ;;  %v1253_v29 = vrot.slane %v1239_v27, %v3771_v49  ;;  %v1254_v30 = vcombine.low %v1222_v24, %v1237_v25  ;;  %v1255_v31 = vcombine.high %v1222_v24, %v1237_v25 }
 0x696   : > { %v1454_v59 = vpack.c.bf16 %v1452_v53, %v1452_v53 }
 0x697   : > { %v1262_v33 = vrot.slane %v1254_v30, %v3771_v49  ;;  %v1269_v32 = vrot.slane %v1255_v31, %v3771_v49  ;;  %v1274_v34 = vcombine.low %v1246_v28, %v1253_v29  ;;  %v2216_v35 = vcombine.high %v1246_v28, %v1253_v29  ;;  %v2563_v50 = vpop.eup %2562 }
 0x698   : > { %v1453_v54 = vmul.f32 %v2563_v50, %v2559_v14 }
 0x699   : > { %v1281_v36 = vrot.slane %v1274_v34, %v3766_v44  ;;  %v1289_v37 = vrot.slane %v2216_v35, %v3766_v44  ;;  %v1290_v38 = vcombine.low %v1262_v33, %v1269_v32  ;;  %v2217_v39 = vcombine.high %v1262_v33, %v1269_v32 }
 0x69a   : > { %v1455_v60 = vpack.c.bf16 %v1453_v54, %v1453_v54 }
 0x69b   : > { %v1297_v40 = vrot.slane %v1290_v38, %v3766_v44  ;;  %v1305_v42 = vrot.slane %v2217_v39, %v3766_v44  ;;  %v1306_v43 = vcombine.low %v1281_v36, %v1289_v37 }
 0x69d   : > { %v1314_v45 = vcombine.low %v1297_v40, %v1305_v42  ;;  %v1313_v47 = vrot.slane %v1306_v43, %v3771_v49 }
 0x69f   : > { %v1321_v48 = vrot.slane %v1314_v45, %v3771_v49 }
 0x6a1   : > { %v1322_v51 = vcombine.low %v1313_v47, %v1321_v48  ;;  %v1323_v52 = vcombine.high %v1313_v47, %v1321_v48 }
 0x6a3   : > { %v1456_v55 = vpack.c.bf16 %v1322_v51, %v1322_v51  ;;  %v1457_v56 = vpack.c.bf16 %v1323_v52, %v1323_v52  ;;  %v2550_v51 = vld [vmem:[#allocation19] sm:$0xff]   ;;  %v2551_v52 = vld [vmem:[#allocation19 + $0x8] sm:$0xff]  }
 0x6a5   : > { %v1463_v57 = vsel %vm1461_vm6, %v1456_v55, 0  ;;  %v1509_v58 = vsel %vm1461_vm6, %v1457_v56, 0  ;;  %v2227_v56 = vld [vmem:[#allocation16] ss:$0 sm:$0xff] }
 0x6a6   : > { %2306 = vmatpush3.bf16.msra.mxu1 %v1463_v57  ;;  %2312 = vmatpush3.bf16.msra.mxu0 %v1509_v58  ;;  %v2228_v58 = vld [vmem:[#allocation17] ss:$0 sm:$0xff] }
 0x6a7   : > { %2317 = vmatprep.subr.bf16.mxu1 %v3142_v9  ;;  %2325 = vmatprep.subr.bf16.mxu0 %v3142_v9 }
 0x6a9   : > { %2308 = vmatmul.mubr.msk.bf16.vlgmr.msra.gmra.mrb[8].mxu1 %vm1431_vm5, %v1454_v59  ;;  %2314 = vmatmul.mubr.msk.bf16.vlgmr.msra.gmra.mrb[12].mxu0 %vm1431_vm5, %v1455_v60 }
 0x6aa   : > { %2321 = vmatprep.mubr.msk.bf16.mxu1 %vm3143_vm1, %v3142_v9  ;;  %2329 = vmatprep.mubr.msk.bf16.mxu0 %vm3143_vm1, %v3142_v9 }
 0x6ab   : > { %2318 = vmatpush3.bf16.msra.mxu1 %v2548_v61  ;;  %2326 = vmatpush3.bf16.msra.mxu0 %v2550_v51 }
 0x6ac   : > { %2319 = vmatprep.subr.bf16.mxu1 %v3142_v9  ;;  %2327 = vmatprep.subr.bf16.mxu0 %v3142_v9 }
 0x6af   : > { %2320 = vmatpush3.bf16.msra.mxu1 %v2549_v18  ;;  %2328 = vmatpush3.bf16.msra.mxu0 %v2551_v52 }
 0x6b0   : > { %2333 = vmatprep.subr.bf16.mxu1 %v3142_v9 }
 0x77c   : > { %v1499_v62 = vpop.f32.mrb[8].mxu1  ;;  %v1545_v63 = vpop.f32.mrb[12].mxu0 }
 0x77d   : > { %v1551_v0 = vcombine.high %v1499_v62, %v3142_v9  ;;  %v1558_v1 = vrot.slane %v1499_v62, %v3766_v44  ;;  %v1566_v2 = vcombine.high %v1545_v63, %v3142_v9  ;;  %v1573_v3 = vrot.slane %v1545_v63, %v3766_v44  ;;  %v2309_v4 = vpop.f32.mrb[9].mxu1  ;;  %v2315_v41 = vpop.f32.mrb[13].mxu0  ;;  %v2552_v62 = vld [vmem:[#allocation22] sm:$0xff]   ;;  %v2553_v63 = vld [vmem:[#allocation22 + $0x8] sm:$0xff]  }
 0x77e   : > { %v1502_v5 = vpop.f32.mrb[10].mxu1  ;;  %v1548_v6 = vpop.f32.mrb[14].mxu0 }
 0x77f   : > { %v1565_v7 = vrot.slane %v1551_v0, %v3766_v44  ;;  %v1580_v8 = vrot.slane %v1566_v2, %v3766_v44  ;;  %v1581_v10 = vcombine.low %v1558_v1, %v1573_v3  ;;  %v1582_v11 = vcombine.high %v1558_v1, %v1573_v3  ;;  %v2310_v12 = vpop.f32.mrb[11].mxu1  ;;  %v2316_v13 = vpop.f32.mrb[15].mxu0  ;;  %v2229_v0 = vld [vmem:[#allocation20] ss:$0 sm:$0xff] }
 0x781   : > { %v1589_v14 = vrot.slane %v1581_v10, %v3771_v49  ;;  %v1596_v15 = vrot.slane %v1582_v11, %v3771_v49  ;;  %v1597_v16 = vcombine.low %v1565_v7, %v1580_v8  ;;  %v1598_v17 = vcombine.high %v1565_v7, %v1580_v8  ;;  %v2233_v7 = vld [vmem:[#allocation23] ss:$0 sm:$0xff] }
 0x783   : > { %v1605_v19 = vrot.slane %v1597_v16, %v3771_v49  ;;  %v1612_v21 = vrot.slane %v1598_v17, %v3771_v49  ;;  %v1617_v22 = vcombine.low %v1589_v14, %v1596_v15  ;;  %v2222_v23 = vcombine.high %v1589_v14, %v1596_v15 }
 0x785   : > { %v1624_v24 = vrot.slane %v1617_v22, %v3766_v44  ;;  %v1632_v25 = vrot.slane %v2222_v23, %v3766_v44  ;;  %v1633_v26 = vcombine.low %v1605_v19, %v1612_v21  ;;  %v2223_v27 = vcombine.high %v1605_v19, %v1612_v21 }
 0x787   : > { %v1640_v28 = vrot.slane %v1633_v26, %v3766_v44  ;;  %v1648_v29 = vrot.slane %v2223_v27, %v3766_v44  ;;  %v1649_v30 = vcombine.low %v1624_v24, %v1632_v25  ;;  %v2237_v25 = vld [vmem:[#allocation25] ss:$0 sm:$0xff]  ;;  %v2238_v27 = vld [vmem:[#allocation26] ss:$0 sm:$0xff] }
 0x789   : > { %v1657_v31 = vcombine.low %v1640_v28, %v1648_v29  ;;  %v1656_v33 = vrot.slane %v1649_v30, %v3771_v49 }
 0x78b   : > { %v1664_v32 = vrot.slane %v1657_v31, %v3771_v49 }
 0x78d   : > { %v1666_v34 = vcombine.high %v1656_v33, %v1664_v32  ;;  %v1665_v35 = vcombine.low %v1656_v33, %v1664_v32 }
 0x78f   : > { %1668 = vrot.lane.b32.xlu0 %v1666_v34, %s3148_s28 }
 0x801   : > { %v1669_v36 = vpop.permute.xlu0 %1668 }
 0x802   : > { %v1671_v37 = vsel %vm1328_vm2, %v1665_v35, %v1669_v36 }
 0x803   : > { %v1672_v38 = vpack.c.bf16 %v1671_v37, %v1671_v37 }
 0x805   : > { %2322 = vmatmul.mubr.msk.bf16.vlgmr.msra.gmra.mrb[12].mxu1 %vm762_vm0, %v1672_v38 }
 0x806   : > { %2337 = vmatprep.mubr.msk.bf16.mxu1 %vm3143_vm1, %v3142_v9  ;;  %2334 = vmatpush3.bf16.msra.mxu1 %v2552_v62 }
 0x807   : > { %2335 = vmatprep.subr.bf16.mxu1 %v3142_v9 }
 0x80a   : > { %2336 = vmatpush3.bf16.msra.mxu1 %v2553_v63 }
 0x8d8   : > { %v1726_v44 = vpop.f32.mrb[12].mxu1 }
 0x8d9   : > { %v1727_v39 = vadd.f32 %v1726_v44, %v3744_v20  ;;  %v2323_v40 = vpop.f32.mrb[13].mxu1 }
 0x8da   : > { %v1729_v42 = vpop.f32.mrb[14].mxu1 }
 0x8db   : > { %v2324_v43 = vpop.f32.mrb[15].mxu1  ;;  %v1734_v49 = vsel %vm762_vm0, %v1727_v39, 0.0 }
 0x8dc   : > { %1735 = vadd.xlane.f32.xlu1 %v1734_v49 }
 0x969   : > { %v1736_v45 = vpop.xlane.xlu1 %1735 }
 0x96a   : > { %v1737_v46 = vmul.f32 0.03125, %v1736_v45 }
 0x96c   : > { %v1738_v47 = vsub.f32 %v1727_v39, %v1737_v46 }
 0x96e   : > { %v1739_v48 = vmul.f32 %v1738_v47, %v1738_v47 }
 0x970   : > { %v1740_v50 = vsel %vm762_vm0, %v1739_v48, 0.0 }
 0x971   : > { %1741 = vadd.xlane.f32.xlu0 %v1740_v50 }
 0x9fe   : > { %v1742_v20 = vpop.xlane.xlu0 %1741 }
 0x9ff   : > { %v1743_v53 = vmul.f32 0.03125, %v1742_v20 }
 0xa01   : > { %v1744_v54 = vadd.f32 1e-06, %v1743_v53 }
 0xa03   : > { %2564 = vrsqrt.f32 %v1744_v54 }
 0xa0d   : > { %v2565_v55 = vpop.eup %2564 }
 0xa0e   : > { %v1746_v57 = vmul.f32 %v2565_v55, %v1738_v47 }
 0xa10   : > { %v1753_v59 = vmul.f32 %v2227_v56, %v1746_v57 }
 0xa12   : > { %v1760_v60 = vadd.f32 %v2228_v58, %v1753_v59 }
 0xa14   : > { %v1761_v61 = vpack.c.bf16 %v1760_v60, %v1760_v60 }
 0xa16   : > { %2330 = vmatmul.mubr.msk.bf16.vlgmr.msra.gmra.mrb[16].mxu0 %vm762_vm0, %v1761_v61 }
 0xae9   : > { %v1822_v1 = vpop.f32.mrb[16].mxu0 }
 0xaea   : > { %v1823_v2 = vadd.f32 %v2229_v0, %v1822_v1  ;;  %v2331_v3 = vpop.f32.mrb[17].mxu0 }
 0xaeb   : > { %v1825_v4 = vpop.f32.mrb[18].mxu0 }
 0xaec   : > { %v1828_v41 = vmax.f32 %v1823_v2, 0.0  ;;  %v2332_v5 = vpop.f32.mrb[19].mxu0 }
 0xaee   : > { %v1829_v6 = vpack.c.bf16 %v1828_v41, %v1828_v41 }
 0xaf0   : > { %2338 = vmatmul.mubr.msk.bf16.vlgmr.msra.gmra.mrb[16].mxu1 %vm762_vm0, %v1829_v6 }
 0xbc3   : > { %v1890_v8 = vpop.f32.mrb[16].mxu1 }
 0xbc4   : > { %v1891_v10 = vadd.f32 %v2233_v7, %v1890_v8  ;;  %v2339_v11 = vpop.f32.mrb[17].mxu1 }
 0xbc5   : > { %v1893_v12 = vpop.f32.mrb[18].mxu1 }
 0xbc6   : > { %v2340_v13 = vpop.f32.mrb[19].mxu1  ;;  %v1896_v14 = vadd.f32 %v1891_v10, %v1760_v60 }
 0xbc8   : > { %v1899_v9 = vsel %vm762_vm0, %v1896_v14, 0.0 }
 0xbc9   : > { %1900 = vadd.xlane.f32.xlu1 %v1899_v9 }
 0xc56   : > { %v1901_v15 = vpop.xlane.xlu1 %1900 }
 0xc57   : > { %v1902_v16 = vmul.f32 0.03125, %v1901_v15 }
 0xc59   : > { %v1903_v17 = vsub.f32 %v1896_v14, %v1902_v16 }
 0xc5b   : > { %v1904_v18 = vmul.f32 %v1903_v17, %v1903_v17 }
 0xc5d   : > { %v1905_v19 = vsel %vm762_vm0, %v1904_v18, 0.0 }
 0xc5e   : > { %1906 = vadd.xlane.f32.xlu1 %v1905_v19 }
 0xceb   : > { %v1907_v21 = vpop.xlane.xlu1 %1906 }
 0xcec   : > { %v1908_v22 = vmul.f32 0.03125, %v1907_v21 }
 0xcee   : > { %v1909_v23 = vadd.f32 1e-06, %v1908_v22 }
 0xcf0   : > { %2566 = vrsqrt.f32 %v1909_v23 }
 0xcfa   : > { %v2567_v24 = vpop.eup %2566 }
 0xcfb   : > { %v1911_v26 = vmul.f32 %v2567_v24, %v1903_v17 }
 0xcfd   : > { %v1918_v28 = vmul.f32 %v2237_v25, %v1911_v26 }
 0xcff   : > { %v1925_v29 = vadd.f32 %v2238_v27, %v1918_v28 }
 0xd01   : > { %1926 = vst.msk [vmem:[%s757_s30] sm:$0xff] %vm762_vm0, %v1925_v29 }
 0xd02   : > { %3033 = shalt.err (!%p3030_p11)
}
 0xd03   : > { %s3034_s29 = scalar_lea.hbm %s3885_s1, 128  ;;  %s3038_s23 = scalar_lea.hbm %s4015_s4, 256 }
 0xd04   : > { %p3035_p5 = scmp.ne.s32.totalorder %s3885_s1, %s3034_s29  ;;  %p3039_p6 = scmp.lt.u32.totalorder %s3885_s1, %s4015_s4 }
 0xd05   : > { %p3040_p12 = scmp.lt.u32.totalorder %s3038_s23, %s3034_s29  ;;  %p3042_p9 = scmp.lt.u32.totalorder %s3034_s29, %s3885_s1 }
 0xd06   : > { %p3036_p7 = pnand %p3035_p5, %p4016_p4 }
 0xd07   : > { %p3041_p8 = por %p3040_p12, %p3039_p6 }
 0xd08   : > { %p3037_p3 = pneg %p3036_p7 }
 0xd09   : > { %p3043_p1 = por %p3042_p9, %p3041_p8 }
 0xd0b   : > { %p3044_p13 = pnand %p3043_p1, %p3037_p3 }
 0xd0d   : > { %3047 = shalt.err (!%p3044_p13)
}
 0xd0e   : > { %2401 = dma.vmem_to_hbm [thread:$0]  (%p4016_p4), %s3887_s16, 128, %s3885_s1, %s1928_s21  }
 0xd0f PF: > { %s4017_s22 = sld [smem:[#allocation40_spill]]  ;;  %p4018_p0 = scmp.ne.s32.totalorder %s3989_s20, 0 }
 0xd10   : > { %p4019_p2 = scmp.ge.s32.totalorder %s3122_s24, 2 }
 0xd12   : > { %p2454_p10 = pnand %p4019_p2, %p4018_p0 }
 0xd15   : > { %s1953_s17 = sand.u32 1, %s4017_s22  }
 0xd16   : > { %s1954_s3 = scalar_lea.sflag [#allocation4], %s1953_s17 }
 0xd17   : > { %3105 = dma.done.wait (!%p2454_p10), %s1954_s3, 128  }
 0xd18   : > { %3107 = vsyncadd (!%p2454_p10), %s1954_s3, 4294967168  ;;  %s4020_s21 = sld [smem:[#allocation41_spill]]  ;;  %s4021_s22 = sld [smem:[#allocation42_spill]] }
 0xd19   : > { %p39_p11 = scmp.ge.s32.totalorder %s3575_s0, 4   ;;  %s4022_s23 = smov %s3586_s2 }
 0xd1a   : > { %s4023_s24 = smov %s3575_s0 }
 0xd1b   :  { %41 = sbr.rel (!%p39_p11) target bundleno = 23 (0x17), region = 198 }
 0xd22   :  { %1959 = vsyncpa [#allocation3], 1 }
 0xd23   :  { %1961 = vsyncpa [#allocation3 + $0x1], 1 }
 0xd24   :  { %1962 = vsyncpa [#allocation6], 1 }
 0xd25   :  { %1964 = vsyncpa [#allocation6 + $0x1], 1 }
 0xd26   :  { %1965 = vsyncpa [#allocation9], 1 }
 0xd27   :  { %1966 = vsyncpa [#allocation12], 1 }
 0xd28   :  { %1967 = vsyncpa [#allocation15], 1 }
 0xd29   :  { %1968 = vsyncpa [#allocation18], 1 }
 0xd2a   :  { %1969 = vsyncpa [#allocation21], 1 }
 0xd2b   :  { %1970 = vsyncpa [#allocation24], 1 }
 0xd2c   :  { %1971 = vsyncpa [#allocation27], 1 }
 0xd2d   :  { %1972 = vsyncpa [#allocation4], 1 }
 0xd2e   :  { %1974 = vsyncpa [#allocation4 + $0x1], 1 }

// kernel: masked_language_model_forward.4
= control target key start
LH: loop header
LB: loop body
LE: loop exit
PB: predicated region body
PF: predicated region fallthrough
CT: control target
= control target key end

     0   :  { %s3893_s0 = inlined_call_operand.hbm [shape: f32[2,8,32], index: 0, kind: input, shape index: {}]   ;;  %s3894_s1 = inlined_call_operand.hbm [shape: f32[2,1,8], index: 1, kind: input, shape index: {}]   ;;  %s3895_s2 = inlined_call_operand.hbm [shape: f32[1,32], index: 2, kind: input, shape index: {}, may-alias: {2,8}]   ;;  %s3896_s3 = inlined_call_operand.hbm [shape: f32[1,32], index: 3, kind: input, shape index: {}, may-alias: {3,9}]   ;;  %s3897_s4 = inlined_call_operand.hbm [shape: bf16[32,32], index: 4, kind: input, shape index: {}]   ;;  %s3898_s5 = inlined_call_operand.hbm [shape: bf16[32,32], index: 5, kind: input, shape index: {}]   ;;  %s3899_s6 = inlined_call_operand.hbm [shape: bf16[32,32], index: 6, kind: input, shape index: {}]   ;;  %s3900_s7 = inlined_call_operand.hbm [shape: bf16[32,32], index: 7, kind: input, shape index: {}]   ;;  %s3901_s8 = inlined_call_operand.hbm [shape: f32[1,32], index: 8, kind: input, shape index: {}, may-alias: {2,8}]   ;;  %s3902_s9 = inlined_call_operand.hbm [shape: f32[1,32], index: 9, kind: input, shape index: {}, may-alias: {3,9}]   ;;  %s3903_s10 = inlined_call_operand.hbm [shape: bf16[32,32], index: 10, kind: input, shape index: {}]   ;;  %s3904_s11 = inlined_call_operand.hbm [shape: f32[1,32], index: 11, kind: input, shape index: {}]   ;;  %s3905_s12 = inlined_call_operand.hbm [shape: bf16[32,32], index: 12, kind: input, shape index: {}]   ;;  %s3906_s13 = inlined_call_operand.hbm [shape: f32[1,32], index: 13, kind: input, shape index: {}]   ;;  %s3907_s14 = inlined_call_operand.hbm [shape: f32[1,32], index: 14, kind: input, shape index: {}]   ;;  %s3908_s15 = inlined_call_operand.hbm [shape: f32[1,32], index: 15, kind: input, shape index: {}]   ;;  %s3909_s16 = inlined_call_operand.hbm [shape: f32[2,8,32], index: 16, kind: output, shape index: {}]  }
   0x1   :  { %3923 = sst [smem:[#allocation45_spill]] %s3893_s0 }
   0x2   :  { %3924 = sst [smem:[#allocation46_spill]] %s3894_s1 }
   0x3   :  { %3925 = sst [smem:[#allocation47_spill]] %s3895_s2 }
   0x4   :  { %3926 = sst [smem:[#allocation48_spill]] %s3896_s3 }
   0x5   :  { %3927 = sst [smem:[#allocation49_spill]] %s3897_s4 }
   0x6   :  { %3928 = sst [smem:[#allocation50_spill]] %s3898_s5 }
   0x7   :  { %3929 = sst [smem:[#allocation51_spill]] %s3899_s6 }
   0x8   :  { %3930 = sst [smem:[#allocation52_spill]] %s3909_s16 }
   0x9   :  { %21 = vsyncpa [#allocation3], 0 }
   0xa   :  { %23 = vsyncpa [#allocation3 + $0x1], 0 }
   0xb   :  { %24 = vsyncpa [#allocation6], 0 }
   0xc   :  { %26 = vsyncpa [#allocation6 + $0x1], 0 }
   0xd   :  { %27 = vsyncpa [#allocation9], 0 }
   0xe   :  { %28 = vsyncpa [#allocation12], 0 }
   0xf   :  { %29 = vsyncpa [#allocation15], 0 }
  0x10   :  { %30 = vsyncpa [#allocation18], 0 }
  0x11   :  { %31 = vsyncpa [#allocation21], 0 }
  0x12   :  { %32 = vsyncpa [#allocation24], 0 }
  0x13   :  { %33 = vsyncpa [#allocation27], 0 }
  0x14   :  { %34 = vsyncpa [#allocation4], 0 }
  0x15   :  { %36 = vsyncpa [#allocation4 + $0x1], 0  ;;  %s3202_s21 = smov 0   ;;  %s3204_s22 = smov 0  }
  0x16   :  { %s3206_s23 = smov 0   ;;  %s3208_s24 = smov 0  }
  0x17 LB: > { %3931 = sst [smem:[#allocation40_spill]] %s3077_s21  ;;  %s3091_s25 = smov [#allocation7]   ;;  %s3089_s24 = sphi %s3208_s24, %s3986_s24   ;;  %s3085_s23 = sphi %s3206_s23, %s3985_s23   ;;  %s3081_s22 = sphi %s3204_s22, %s3984_s22   ;;  %s3077_s21 = sphi %s3202_s21, %s3983_s21  }
  0x18   : > { %3932 = sst [smem:[#allocation41_spill]] %s3081_s22  ;;  %s432_s26 = sshll.u32 %s3091_s25, 4  ;;  %s3228_s26 = int_to_ptr.vmem [resolvable:$true] %s432_s26 }
  0x19   : > { %3933 = sst [smem:[#allocation42_spill]] %s3085_s23  ;;  %s3223_s27 = sadd.s32 4294967295, %s3089_s24  }
  0x1a   : > { %3934 = sst [smem:[#allocation43_spill]] %s3223_s27  ;;  %p2136_p0 = scmp.ge.s32.totalorder %s3089_s24, 1 }
  0x1b   : > { %p3919_p1 = scmp.eq.s32.totalorder %s3223_s27, 0  ;;  %p419_p2 = scmp.lt.s32.totalorder %s3089_s24, 3 }
  0x1c   : > { %s3092_s29 = smov [#allocation8]   ;;  %s3093_s17 = smov [#allocation11]  }
  0x1d   : > { %p3230_p3 = pnand %p2136_p0, %p419_p2  ;;  %s443_s30 = sshll.u32 %s3092_s29, 4  ;;  %s3237_s30 = int_to_ptr.vmem [resolvable:$true] %s443_s30 }
  0x1e   : > { %s466_s18 = sshll.u32 %s3093_s17, 4  ;;  %s3938_s2 = sld [smem:[#allocation47_spill]]  ;;  %s3245_s18 = int_to_ptr.vmem [resolvable:$true] %s466_s18 }
  0x1f   : > { %s3935_s28 = scalar_select %p3230_p3, 1, 0 }
  0x20   : > { %p2372_p5 = pneg %p3230_p3 }
  0x21   : > { %3936 = sst [smem:[#allocation44_spill]] %s3935_s28 }
  0x22   : > { %p3241_p6 = pnand %p2372_p5, %p3919_p1 }
  0x24   : > { %s2535_s25 = scalar_lea.hbm %s3938_s2, 16  ;;  %p3255_p8 = pneg %p3241_p6 }
  0x25   : > { %p2536_p7 = scmp.ne.s32.totalorder %s3938_s2, %s2535_s25  ;;  %p2542_p11 = scmp.lt.u32.totalorder %s2535_s25, %s3938_s2 }
  0x27   : > { %p2538_p9 = pnand %p3255_p8, %p2536_p7 }
  0x29   : > { %p2539_p10 = pneg %p2538_p9 }
  0x2b   : > { %p2544_p12 = pnand %p2542_p11, %p2539_p10 }
  0x2d   : > { %2547 = shalt.err (!%p2544_p12)
}
  0x2e   : > { %s2548_s16 = scalar_lea.vmem %s3228_s26, 16  ;;  %s2555_s28 = scalar_lea.vmem %s3228_s26, 32 }
  0x2f   : > { %p2549_p13 = scmp.ne.s32.totalorder %s3228_s26, %s2548_s16  ;;  %p2556_p5 = scmp.lt.s32.totalorder %s3228_s26, %s3228_s26 }
  0x30   : > { %p2557_p7 = scmp.lt.s32.totalorder %s2555_s28, %s2548_s16 }
  0x31   : > { %p2551_p0 = pnand %p2549_p13, %p3255_p8 }
  0x32   : > { %p2558_p9 = por %p2557_p7, %p2556_p5 }
  0x33   : > { %p2552_p2 = pneg %p2551_p0 }
  0x35   : > { %p2559_p4 = pnand %p2558_p9, %p2552_p2 }
  0x37   : > { %2562 = shalt.err (!%p2559_p4)
}
  0x38   : > { %2375 = dma.hbm_to_vmem [thread:$0]  (!%p3241_p6), %s3938_s2, 16, %s3228_s26, [#allocation6]  }
  0x39   : > { %s3940_s3 = sld [smem:[#allocation48_spill]] }
  0x3f   : > { %s2563_s17 = scalar_lea.hbm %s3940_s3, 16 }
  0x40   : > { %p2564_p10 = scmp.ne.s32.totalorder %s3940_s3, %s2563_s17  ;;  %p2570_p4 = scmp.lt.u32.totalorder %s2563_s17, %s3940_s3 }
  0x42   : > { %p2566_p11 = pnand %p2564_p10, %p3255_p8 }
  0x44   : > { %p2567_p12 = pneg %p2566_p11 }
  0x46   : > { %p2572_p13 = pnand %p2570_p4, %p2567_p12 }
  0x48   : > { %2575 = shalt.err (!%p2572_p13)
}
  0x49   : > { %s2576_s26 = scalar_lea.vmem %s3237_s30, 16  ;;  %s2583_s21 = scalar_lea.vmem %s3237_s30, 32 }
  0x4a   : > { %p2577_p0 = scmp.ne.s32.totalorder %s3237_s30, %s2576_s26  ;;  %p2584_p7 = scmp.lt.s32.totalorder %s3237_s30, %s3237_s30 }
  0x4b   : > { %p2585_p9 = scmp.lt.s32.totalorder %s2583_s21, %s2576_s26 }
  0x4c   : > { %p2579_p2 = pnand %p2577_p0, %p3255_p8 }
  0x4d   : > { %p2586_p10 = por %p2585_p9, %p2584_p7 }
  0x4e   : > { %p2580_p5 = pneg %p2579_p2 }
  0x50   : > { %p2587_p11 = pnand %p2586_p10, %p2580_p5 }
  0x52   : > { %2590 = shalt.err (!%p2587_p11)
}
  0x53   : > { %2378 = dma.hbm_to_vmem [thread:$0]  (!%p3241_p6), %s3940_s3, 16, %s3237_s30, [#allocation9]  }
  0x54   : > { %s3941_s5 = sld [smem:[#allocation50_spill]] }
  0x5a   : > { %s2591_s25 = scalar_lea.hbm %s3941_s5, 256 }
  0x5b   : > { %p2592_p12 = scmp.ne.s32.totalorder %s3941_s5, %s2591_s25  ;;  %p2598_p0 = scmp.lt.u32.totalorder %s2591_s25, %s3941_s5 }
  0x5d   : > { %p2594_p4 = pnand %p2592_p12, %p3255_p8 }
  0x5f   : > { %p2595_p13 = pneg %p2594_p4 }
  0x61   : > { %p2600_p2 = pnand %p2598_p0, %p2595_p13 }
  0x63   : > { %2603 = shalt.err (!%p2600_p2)
}
  0x64   : > { %s2604_s30 = scalar_lea.vmem %s3245_s18, 256  ;;  %p2612_p10 = scmp.lt.s32.totalorder %s3245_s18, %s3245_s18 }
  0x65   : > { %p2605_p5 = scmp.ne.s32.totalorder %s3245_s18, %s2604_s30  ;;  %p2613_p11 = scmp.lt.s32.totalorder %s2604_s30, %s2604_s30 }
  0x67   : > { %p2607_p7 = pnand %p2605_p5, %p3255_p8  ;;  %p2614_p12 = por %p2613_p11, %p2612_p10 }
  0x69   : > { %p2608_p9 = pneg %p2607_p7 }
  0x6b   : > { %p2615_p4 = pnand %p2614_p12, %p2608_p9 }
  0x6d   : > { %2618 = shalt.err (!%p2615_p4)
}
  0x6e   : > { %s3094_s21 = smov 64   ;;  %s3095_s27 = smov 4  }
  0x6f   : > { %2384 = dma.hbm_to_vmem [thread:$0]  (!%p3241_p6), %s3941_s5, 256, %s3245_s18, [#allocation12], %s3094_s21, %s3094_s21, %s3095_s27  }
  0x70   : > { %s3096_s20 = smov [#allocation14]   ;;  %s3097_s17 = smov [#allocation17]  }
  0x71   : > { %s492_s25 = sshll.u32 %s3096_s20, 4  ;;  %s517_s16 = sshll.u32 %s3097_s17, 4  ;;  %s493_s25 = int_to_ptr.vmem [resolvable:$true] %s492_s25  ;;  %s518_s16 = int_to_ptr.vmem [resolvable:$true] %s517_s16 }
  0x72   : > { %s2619_s30 = scalar_lea.hbm %s3900_s7, 256 }
  0x73   : > { %p2620_p13 = scmp.ne.s32.totalorder %s3900_s7, %s2619_s30  ;;  %p2626_p5 = scmp.lt.u32.totalorder %s2619_s30, %s3900_s7 }
  0x75   : > { %p2622_p0 = pnand %p2620_p13, %p3255_p8 }
  0x77   : > { %p2623_p2 = pneg %p2622_p0 }
  0x79   : > { %p2628_p7 = pnand %p2626_p5, %p2623_p2 }
  0x7b   : > { %2631 = shalt.err (!%p2628_p7)
}
  0x7c   : > { %s2632_s18 = scalar_lea.vmem %s493_s25, 256  ;;  %p2640_p12 = scmp.lt.s32.totalorder %s493_s25, %s493_s25 }
  0x7d   : > { %p2633_p9 = scmp.ne.s32.totalorder %s493_s25, %s2632_s18  ;;  %p2641_p4 = scmp.lt.s32.totalorder %s2632_s18, %s2632_s18 }
  0x7f   : > { %p2635_p10 = pnand %p2633_p9, %p3255_p8  ;;  %p2642_p1 = por %p2641_p4, %p2640_p12 }
  0x81   : > { %p2636_p11 = pneg %p2635_p10 }
  0x83   : > { %p2643_p3 = pnand %p2642_p1, %p2636_p11 }
  0x85   : > { %2646 = shalt.err (!%p2643_p3)
}
  0x86   : > { %2390 = dma.hbm_to_vmem [thread:$0]  (!%p3241_p6), %s3900_s7, 256, %s493_s25, [#allocation15], %s3094_s21, %s3094_s21, %s3095_s27  }
  0x87   : > { %s2647_s1 = scalar_lea.hbm %s3902_s9, 16 }
  0x88   : > { %p2648_p1 = scmp.ne.s32.totalorder %s3902_s9, %s2647_s1  ;;  %p2654_p0 = scmp.lt.u32.totalorder %s2647_s1, %s3902_s9 }
  0x8a   : > { %p2650_p3 = pnand %p2648_p1, %p3255_p8 }
  0x8c   : > { %p2651_p13 = pneg %p2650_p3 }
  0x8e   : > { %p2656_p2 = pnand %p2654_p0, %p2651_p13 }
  0x90   : > { %2659 = shalt.err (!%p2656_p2)
}
  0x91   : > { %s2660_s26 = scalar_lea.vmem %s518_s16, 16  ;;  %s2667_s25 = scalar_lea.vmem %s518_s16, 32 }
  0x92   : > { %p2661_p5 = scmp.ne.s32.totalorder %s518_s16, %s2660_s26  ;;  %p2668_p10 = scmp.lt.s32.totalorder %s518_s16, %s518_s16 }
  0x93   : > { %p2669_p11 = scmp.lt.s32.totalorder %s2667_s25, %s2660_s26 }
  0x94   : > { %p2663_p7 = pnand %p2661_p5, %p3255_p8 }
  0x95   : > { %p2670_p12 = por %p2669_p11, %p2668_p10 }
  0x96   : > { %p2664_p9 = pneg %p2663_p7 }
  0x98   : > { %p2671_p4 = pnand %p2670_p12, %p2664_p9 }
  0x9a   : > { %2674 = shalt.err (!%p2671_p4)
}
  0x9b   : > { %2396 = dma.hbm_to_vmem [thread:$0]  (!%p3241_p6), %s3902_s9, 16, %s518_s16, [#allocation18]  }
  0x9c   : > { %s3098_s2 = smov [#allocation20]   ;;  %s3099_s22 = smov [#allocation23]  }
  0x9d   : > { %s541_s3 = sshll.u32 %s3098_s2, 4  ;;  %s565_s23 = sshll.u32 %s3099_s22, 4  ;;  %s542_s3 = int_to_ptr.vmem [resolvable:$true] %s541_s3  ;;  %s566_s23 = int_to_ptr.vmem [resolvable:$true] %s565_s23 }
  0x9e   : > { %s2675_s20 = scalar_lea.hbm %s3904_s11, 16 }
  0x9f   : > { %p2676_p1 = scmp.ne.s32.totalorder %s3904_s11, %s2675_s20  ;;  %p2682_p0 = scmp.lt.u32.totalorder %s2675_s20, %s3904_s11 }
  0xa1   : > { %p2678_p3 = pnand %p2676_p1, %p3255_p8 }
  0xa3   : > { %p2679_p13 = pneg %p2678_p3 }
  0xa5   : > { %p2684_p2 = pnand %p2682_p0, %p2679_p13 }
  0xa7   : > { %2687 = shalt.err (!%p2684_p2)
}
  0xa8   : > { %s2688_s16 = scalar_lea.vmem %s542_s3, 16  ;;  %s2695_s30 = scalar_lea.vmem %s542_s3, 32 }
  0xa9   : > { %p2689_p5 = scmp.ne.s32.totalorder %s542_s3, %s2688_s16  ;;  %p2696_p10 = scmp.lt.s32.totalorder %s542_s3, %s542_s3 }
  0xaa   : > { %p2697_p11 = scmp.lt.s32.totalorder %s2695_s30, %s2688_s16 }
  0xab   : > { %p2691_p7 = pnand %p2689_p5, %p3255_p8 }
  0xac   : > { %p2698_p12 = por %p2697_p11, %p2696_p10 }
  0xad   : > { %p2692_p9 = pneg %p2691_p7 }
  0xaf   : > { %p2699_p4 = pnand %p2698_p12, %p2692_p9 }
  0xb1   : > { %2702 = shalt.err (!%p2699_p4)
}
  0xb2   : > { %2402 = dma.hbm_to_vmem [thread:$0]  (!%p3241_p6), %s3904_s11, 16, %s542_s3, [#allocation21]  }
  0xb3   : > { %s2703_s19 = scalar_lea.hbm %s3906_s13, 16 }
  0xb4   : > { %p2704_p1 = scmp.ne.s32.totalorder %s3906_s13, %s2703_s19  ;;  %p2710_p0 = scmp.lt.u32.totalorder %s2703_s19, %s3906_s13 }
  0xb6   : > { %p2706_p3 = pnand %p2704_p1, %p3255_p8 }
  0xb8   : > { %p2707_p13 = pneg %p2706_p3 }
  0xba   : > { %p2712_p2 = pnand %p2710_p0, %p2707_p13 }
  0xbc   : > { %2715 = shalt.err (!%p2712_p2)
}
  0xbd   : > { %s2716_s25 = scalar_lea.vmem %s566_s23, 16  ;;  %s2723_s3 = scalar_lea.vmem %s566_s23, 32 }
  0xbe   : > { %p2717_p5 = scmp.ne.s32.totalorder %s566_s23, %s2716_s25  ;;  %p2724_p10 = scmp.lt.s32.totalorder %s566_s23, %s566_s23 }
  0xbf   : > { %p2725_p11 = scmp.lt.s32.totalorder %s2723_s3, %s2716_s25 }
  0xc0   : > { %p2719_p7 = pnand %p2717_p5, %p3255_p8 }
  0xc1   : > { %p2726_p12 = por %p2725_p11, %p2724_p10 }
  0xc2   : > { %p2720_p9 = pneg %p2719_p7 }
  0xc4   : > { %p2727_p4 = pnand %p2726_p12, %p2720_p9 }
  0xc6   : > { %2730 = shalt.err (!%p2727_p4)
}
  0xc7   : > { %2408 = dma.hbm_to_vmem [thread:$0]  (!%p3241_p6), %s3906_s13, 16, %s566_s23, [#allocation24]  }
  0xc8   : > { %s3100_s18 = smov [#allocation10]   ;;  %s3101_s22 = smov [#allocation13]  }
  0xc9   : > { %s453_s2 = sshll.u32 %s3100_s18, 4  ;;  %s479_s1 = sshll.u32 %s3101_s22, 4  ;;  %s454_s2 = int_to_ptr.vmem [resolvable:$true] %s453_s2  ;;  %s480_s1 = int_to_ptr.vmem [resolvable:$true] %s479_s1 }
  0xca   : > { %s3942_s4 = sld [smem:[#allocation49_spill]] }
  0xd0   : > { %s2731_s17 = scalar_lea.hbm %s3942_s4, 256 }
  0xd1   : > { %p2732_p1 = scmp.ne.s32.totalorder %s3942_s4, %s2731_s17  ;;  %p2738_p0 = scmp.lt.u32.totalorder %s2731_s17, %s3942_s4 }
  0xd3   : > { %p2734_p3 = pnand %p2732_p1, %p3255_p8 }
  0xd5   : > { %p2735_p13 = pneg %p2734_p3 }
  0xd7   : > { %p2740_p2 = pnand %p2738_p0, %p2735_p13 }
  0xd9   : > { %2743 = shalt.err (!%p2740_p2)
}
  0xda   : > { %s2744_s23 = scalar_lea.vmem %s454_s2, 256  ;;  %p2752_p10 = scmp.lt.s32.totalorder %s454_s2, %s454_s2 }
  0xdb   : > { %p2745_p5 = scmp.ne.s32.totalorder %s454_s2, %s2744_s23  ;;  %p2753_p11 = scmp.lt.s32.totalorder %s2744_s23, %s2744_s23 }
  0xdd   : > { %p2747_p7 = pnand %p2745_p5, %p3255_p8  ;;  %p2754_p12 = por %p2753_p11, %p2752_p10 }
  0xdf   : > { %p2748_p9 = pneg %p2747_p7 }
  0xe1   : > { %p2755_p4 = pnand %p2754_p12, %p2748_p9 }
  0xe3   : > { %2758 = shalt.err (!%p2755_p4)
}
  0xe4   : > { %2381 = dma.hbm_to_vmem [thread:$0]  (!%p3241_p6), %s3942_s4, 256, %s454_s2, [#allocation9], %s3094_s21, %s3094_s21, %s3095_s27  }
  0xe5   : > { %s3943_s6 = sld [smem:[#allocation51_spill]] }
  0xeb   : > { %s2759_s19 = scalar_lea.hbm %s3943_s6, 256 }
  0xec   : > { %p2760_p1 = scmp.ne.s32.totalorder %s3943_s6, %s2759_s19  ;;  %p2766_p0 = scmp.lt.u32.totalorder %s2759_s19, %s3943_s6 }
  0xee   : > { %p2762_p3 = pnand %p2760_p1, %p3255_p8 }
  0xf0   : > { %p2763_p13 = pneg %p2762_p3 }
  0xf2   : > { %p2768_p2 = pnand %p2766_p0, %p2763_p13 }
  0xf4   : > { %2771 = shalt.err (!%p2768_p2)
}
  0xf5   : > { %s2772_s25 = scalar_lea.vmem %s480_s1, 256  ;;  %p2780_p10 = scmp.lt.s32.totalorder %s480_s1, %s480_s1 }
  0xf6   : > { %p2773_p5 = scmp.ne.s32.totalorder %s480_s1, %s2772_s25  ;;  %p2781_p11 = scmp.lt.s32.totalorder %s2772_s25, %s2772_s25 }
  0xf8   : > { %p2775_p7 = pnand %p2773_p5, %p3255_p8  ;;  %p2782_p12 = por %p2781_p11, %p2780_p10 }
  0xfa   : > { %p2776_p9 = pneg %p2775_p7 }
  0xfc   : > { %p2783_p4 = pnand %p2782_p12, %p2776_p9 }
  0xfe   : > { %2786 = shalt.err (!%p2783_p4)
}
  0xff   : > { %2387 = dma.hbm_to_vmem [thread:$0]  (!%p3241_p6), %s3943_s6, 256, %s480_s1, [#allocation12], %s3094_s21, %s3094_s21, %s3095_s27  }
 0x100   : > { %s3102_s23 = smov [#allocation16]   ;;  %s3103_s30 = smov [#allocation19]  }
 0x101   : > { %s506_s16 = sshll.u32 %s3102_s23, 4  ;;  %s527_s18 = sshll.u32 %s3103_s30, 4  ;;  %s507_s16 = int_to_ptr.vmem [resolvable:$true] %s506_s16  ;;  %s528_s18 = int_to_ptr.vmem [resolvable:$true] %s527_s18 }
 0x102   : > { %s2787_s20 = scalar_lea.hbm %s3901_s8, 16 }
 0x103   : > { %p2788_p1 = scmp.ne.s32.totalorder %s3901_s8, %s2787_s20  ;;  %p2794_p0 = scmp.lt.u32.totalorder %s2787_s20, %s3901_s8 }
 0x105   : > { %p2790_p3 = pnand %p2788_p1, %p3255_p8 }
 0x107   : > { %p2791_p13 = pneg %p2790_p3 }
 0x109   : > { %p2796_p2 = pnand %p2794_p0, %p2791_p13 }
 0x10b   : > { %2799 = shalt.err (!%p2796_p2)
}
 0x10c   : > { %s2800_s1 = scalar_lea.vmem %s507_s16, 16  ;;  %s2807_s2 = scalar_lea.vmem %s507_s16, 32 }
 0x10d   : > { %p2801_p5 = scmp.ne.s32.totalorder %s507_s16, %s2800_s1  ;;  %p2808_p10 = scmp.lt.s32.totalorder %s507_s16, %s507_s16 }
 0x10e   : > { %p2809_p11 = scmp.lt.s32.totalorder %s2807_s2, %s2800_s1 }
 0x10f   : > { %p2803_p7 = pnand %p2801_p5, %p3255_p8 }
 0x110   : > { %p2810_p12 = por %p2809_p11, %p2808_p10 }
 0x111   : > { %p2804_p9 = pneg %p2803_p7 }
 0x113   : > { %p2811_p4 = pnand %p2810_p12, %p2804_p9 }
 0x115   : > { %2814 = shalt.err (!%p2811_p4)
}
 0x116   : > { %2393 = dma.hbm_to_vmem [thread:$0]  (!%p3241_p6), %s3901_s8, 16, %s507_s16, [#allocation15]  }
 0x117   : > { %s2815_s19 = scalar_lea.hbm %s3903_s10, 256 }
 0x118   : > { %p2816_p1 = scmp.ne.s32.totalorder %s3903_s10, %s2815_s19  ;;  %p2822_p0 = scmp.lt.u32.totalorder %s2815_s19, %s3903_s10 }
 0x11a   : > { %p2818_p3 = pnand %p2816_p1, %p3255_p8 }
 0x11c   : > { %p2819_p13 = pneg %p2818_p3 }
 0x11e   : > { %p2824_p2 = pnand %p2822_p0, %p2819_p13 }
 0x120   : > { %2827 = shalt.err (!%p2824_p2)
}
 0x121   : > { %s2828_s25 = scalar_lea.vmem %s528_s18, 256  ;;  %p2836_p10 = scmp.lt.s32.totalorder %s528_s18, %s528_s18 }
 0x122   : > { %p2829_p5 = scmp.ne.s32.totalorder %s528_s18, %s2828_s25  ;;  %p2837_p11 = scmp.lt.s32.totalorder %s2828_s25, %s2828_s25 }
 0x124   : > { %p2831_p7 = pnand %p2829_p5, %p3255_p8  ;;  %p2838_p12 = por %p2837_p11, %p2836_p10 }
 0x126   : > { %p2832_p9 = pneg %p2831_p7 }
 0x128   : > { %p2839_p4 = pnand %p2838_p12, %p2832_p9 }
 0x12a   : > { %2842 = shalt.err (!%p2839_p4)
}
 0x12b   : > { %2399 = dma.hbm_to_vmem [thread:$0]  (!%p3241_p6), %s3903_s10, 256, %s528_s18, [#allocation18], %s3094_s21, %s3094_s21, %s3095_s27  }
 0x12c   : > { %s3104_s2 = smov [#allocation22]   ;;  %s3105_s23 = smov [#allocation25]  }
 0x12d   : > { %s551_s3 = sshll.u32 %s3104_s2, 4  ;;  %s576_s30 = sshll.u32 %s3105_s23, 4  ;;  %s552_s3 = int_to_ptr.vmem [resolvable:$true] %s551_s3  ;;  %s577_s30 = int_to_ptr.vmem [resolvable:$true] %s576_s30 }
 0x12e   : > { %s2843_s20 = scalar_lea.hbm %s3905_s12, 256 }
 0x12f   : > { %p2844_p1 = scmp.ne.s32.totalorder %s3905_s12, %s2843_s20  ;;  %p2850_p0 = scmp.lt.u32.totalorder %s2843_s20, %s3905_s12 }
 0x131   : > { %p2846_p3 = pnand %p2844_p1, %p3255_p8 }
 0x133   : > { %p2847_p13 = pneg %p2846_p3 }
 0x135   : > { %p2852_p2 = pnand %p2850_p0, %p2847_p13 }
 0x137   : > { %2855 = shalt.err (!%p2852_p2)
}
 0x138   : > { %s2856_s18 = scalar_lea.vmem %s552_s3, 256  ;;  %p2864_p10 = scmp.lt.s32.totalorder %s552_s3, %s552_s3 }
 0x139   : > { %p2857_p5 = scmp.ne.s32.totalorder %s552_s3, %s2856_s18  ;;  %p2865_p11 = scmp.lt.s32.totalorder %s2856_s18, %s2856_s18 }
 0x13b   : > { %p2859_p7 = pnand %p2857_p5, %p3255_p8  ;;  %p2866_p12 = por %p2865_p11, %p2864_p10 }
 0x13d   : > { %p2860_p9 = pneg %p2859_p7 }
 0x13f   : > { %p2867_p4 = pnand %p2866_p12, %p2860_p9 }
 0x141   : > { %2870 = shalt.err (!%p2867_p4)
}
 0x142   : > { %2405 = dma.hbm_to_vmem [thread:$0]  (!%p3241_p6), %s3905_s12, 256, %s552_s3, [#allocation21], %s3094_s21, %s3094_s21, %s3095_s27  }
 0x143   : > { %s2871_s22 = scalar_lea.hbm %s3907_s14, 16 }
 0x144   : > { %p2872_p1 = scmp.ne.s32.totalorder %s3907_s14, %s2871_s22  ;;  %p2878_p0 = scmp.lt.u32.totalorder %s2871_s22, %s3907_s14 }
 0x146   : > { %p2874_p3 = pnand %p2872_p1, %p3255_p8 }
 0x148   : > { %p2875_p13 = pneg %p2874_p3 }
 0x14a   : > { %p2880_p2 = pnand %p2878_p0, %p2875_p13 }
 0x14c   : > { %2883 = shalt.err (!%p2880_p2)
}
 0x14d   : > { %s2884_s26 = scalar_lea.vmem %s577_s30, 16  ;;  %s2891_s21 = scalar_lea.vmem %s577_s30, 32 }
 0x14e   : > { %p2885_p5 = scmp.ne.s32.totalorder %s577_s30, %s2884_s26  ;;  %p2892_p10 = scmp.lt.s32.totalorder %s577_s30, %s577_s30 }
 0x14f   : > { %p2893_p11 = scmp.lt.s32.totalorder %s2891_s21, %s2884_s26 }
 0x150   : > { %p2887_p7 = pnand %p2885_p5, %p3255_p8 }
 0x151   : > { %p2894_p12 = por %p2893_p11, %p2892_p10 }
 0x152   : > { %p2888_p9 = pneg %p2887_p7 }
 0x154   : > { %p2895_p4 = pnand %p2894_p12, %p2888_p9 }
 0x156   : > { %2898 = shalt.err (!%p2895_p4)
}
 0x157   : > { %2411 = dma.hbm_to_vmem [thread:$0]  (!%p3241_p6), %s3907_s14, 16, %s577_s30, [#allocation24]  }
 0x158   : > { %s3106_s25 = smov [#allocation26]   ;;  %s2899_s2 = scalar_lea.hbm %s3908_s15, 16 }
 0x159   : > { %s587_s18 = sshll.u32 %s3106_s25, 4  ;;  %p2900_p1 = scmp.ne.s32.totalorder %s3908_s15, %s2899_s2  ;;  %s588_s18 = int_to_ptr.vmem [resolvable:$true] %s587_s18 }
 0x15a   : > { %p2906_p0 = scmp.lt.u32.totalorder %s2899_s2, %s3908_s15 }
 0x15b   : > { %p2902_p3 = pnand %p2900_p1, %p3255_p8 }
 0x15d   : > { %p2903_p13 = pneg %p2902_p3 }
 0x15f   : > { %p2908_p2 = pnand %p2906_p0, %p2903_p13 }
 0x161   : > { %2911 = shalt.err (!%p2908_p2)
}
 0x162   : > { %s2912_s30 = scalar_lea.vmem %s588_s18, 16  ;;  %s2919_s17 = scalar_lea.vmem %s588_s18, 32 }
 0x163   : > { %p2913_p5 = scmp.ne.s32.totalorder %s588_s18, %s2912_s30  ;;  %p2920_p10 = scmp.lt.s32.totalorder %s588_s18, %s588_s18 }
 0x164   : > { %p2921_p11 = scmp.lt.s32.totalorder %s2919_s17, %s2912_s30 }
 0x165   : > { %p2915_p7 = pnand %p2913_p5, %p3255_p8 }
 0x166   : > { %p2922_p12 = por %p2921_p11, %p2920_p10 }
 0x167   : > { %p2916_p9 = pneg %p2915_p7 }
 0x169   : > { %p2923_p4 = pnand %p2922_p12, %p2916_p9 }
 0x16b   : > { %2926 = shalt.err (!%p2923_p4)
}
 0x16c   : > { %s3944_s21 = sld [smem:[#allocation42_spill]]  ;;  %s3945_s27 = sld [smem:[#allocation41_spill]] }
 0x16d   : > { %s3946_s29 = sld [smem:[#allocation40_spill]]  ;;  %s3947_s3 = sld [smem:[#allocation43_spill]] }
 0x16e   : > { %2414 = dma.hbm_to_vmem [thread:$0]  (!%p3241_p6), %s3908_s15, 16, %s588_s18, [#allocation27]  }
 0x16f   : > { %s2135_s25 = sadd.s32 4294967294, %s3089_s24   ;;  %s3542_s0 = sadd.s32 1, %s3089_s24  }
 0x170   : > { %s46_s16 = ssub.s32 %s3089_s24, %s3542_s0  ;;  %p57_p3 = scmp.eq.s32.totalorder %s3089_s24, 0 }
 0x171   : > { %p47_p8 = scmp.eq.s32.totalorder %s46_s16, 0  ;;  %p412_p7 = scmp.eq.s32.totalorder %s2135_s25, 1 }
 0x172   : > { %s49_s1 = sadd.s32 1, %s3944_s21  ;;  %p56_p1 = scmp.ne.s32.totalorder %s3944_s21, %s3945_s27 }
 0x173   : > { %p62_p13 = scmp.ne.s32.totalorder %s3945_s27, %s3946_s29  ;;  %p3949_p2 = scmp.eq.s32.totalorder %s3947_s3, 0 }
 0x174   : > { %s3553_s2 = scalar_select %p47_p8, %s3944_s21, %s49_s1  }
 0x175   : > { %p3555_p0 = por %p57_p3, %p56_p1  ;;  %p3561_p6 = por %p3949_p2, %p62_p13 }
 0x176   : > { %p406_p5 = scmp.eq.s32.totalorder %s3947_s3, 1  ;;  %p2440_p9 = scmp.lt.s32.totalorder %s3089_s24, 2 }
 0x177   : > { %s3950_s18 = scalar_select %p3561_p6, 1, 0 }
 0x178   : > { %s3568_s22 = sand.u32 1, %s3944_s21   ;;  %p3570_p10 = por %p406_p5, %p56_p1 }
 0x179   : > { %p3574_p11 = por %p412_p7, %p62_p13  ;;  %s2152_s30 = sshll.u32 %s3568_s22, 3 }
 0x17a   : > { %s3951_s19 = scalar_select %p3570_p10, 1, 0 }
 0x17b   : > { %s3952_s20 = scalar_select %p3574_p11, 1, 0 }
 0x17c   : > { %s2153_s17 = sshll.u32 %s3089_s24, 7  ;;  %s3953_s27 = sld [smem:[#allocation45_spill]] }
 0x17d   : > { %s602_s21 = scalar_lea.vmem [#allocation2], %s2152_s30  ;;  %p3589_p12 = pnand %p2440_p9, %p3555_p0 }
 0x17e   : > { %s609_s3 = sshll.u32 %s602_s21, 4  ;;  %s599_s1 = scalar_lea.sflag [#allocation3], %s3568_s22  ;;  %s3585_s3 = int_to_ptr.vmem [resolvable:$true] %s609_s3 }
 0x17f   : > { %p2929_p8 = pneg %p3589_p12 }
 0x182   : > { %s3583_s29 = scalar_lea.hbm %s3953_s27, %s2153_s17  ;;  %s2932_s23 = scalar_lea.hbm %s3953_s27, 256 }
 0x183   : > { %s2927_s28 = scalar_lea.hbm %s3583_s29, 128  ;;  %p2933_p13 = scmp.lt.u32.totalorder %s3583_s29, %s3953_s27 }
 0x184   : > { %p2928_p4 = scmp.ne.s32.totalorder %s3583_s29, %s2927_s28  ;;  %p2934_p0 = scmp.lt.u32.totalorder %s2932_s23, %s2927_s28 }
 0x185   : > { %p2936_p5 = scmp.lt.u32.totalorder %s2927_s28, %s3583_s29 }
 0x186   : > { %p2930_p1 = pnand %p2929_p8, %p2928_p4  ;;  %p2935_p2 = por %p2934_p0, %p2933_p13 }
 0x188   : > { %p2931_p3 = pneg %p2930_p1  ;;  %p2937_p7 = por %p2936_p5, %p2935_p2 }
 0x18a   : > { %p2938_p9 = pnand %p2937_p7, %p2931_p3 }
 0x18c   : > { %2941 = shalt.err (!%p2938_p9)
}
 0x18d   : > { %s2942_s16 = scalar_lea.vmem %s3585_s3, 128  ;;  %s3107_s30 = smov [#allocation2]  }
 0x18e   : > { %p2943_p4 = scmp.ne.s32.totalorder %s3585_s3, %s2942_s16  ;;  %s2947_s17 = sshll.u32 %s3107_s30, 4  ;;  %s2948_s17 = int_to_ptr.vmem [resolvable:$false] %s2947_s17 }
 0x18f   : > { %s2949_s26 = scalar_lea.vmem %s2948_s17, 256  ;;  %p2950_p10 = scmp.lt.s32.totalorder %s3585_s3, %s2948_s17 }
 0x190   : > { %p2945_p1 = pnand %p2943_p4, %p2929_p8  ;;  %p2951_p13 = scmp.lt.s32.totalorder %s2949_s26, %s2942_s16 }
 0x192   : > { %p2946_p11 = pneg %p2945_p1  ;;  %p2952_p0 = por %p2951_p13, %p2950_p10 }
 0x194   : > { %p2953_p2 = pnand %p2952_p0, %p2946_p11 }
 0x196   : > { %2956 = shalt.err (!%p2953_p2)
}
 0x197   : > { %2418 = dma.hbm_to_vmem [thread:$0]  (!%p3589_p12), %s3583_s29, 128, %s3585_s3, %s599_s1  }
 0x198   : > { %s2154_s28 = sshll.u32 %s3089_s24, 4  ;;  %s619_s23 = scalar_lea.vmem [#allocation5], %s3568_s22 }
 0x199   : > { %s626_s21 = sshll.u32 %s619_s23, 4  ;;  %s3955_s5 = sld [smem:[#allocation46_spill]]  ;;  %s627_s21 = int_to_ptr.vmem [resolvable:$true] %s626_s21 }
 0x19a   : > { %s3956_s16 = sand.u32 1, %s3089_s24  }
 0x19b   : > { %s617_s26 = scalar_lea.sflag [#allocation6], %s3956_s16 }
 0x19f   : > { %s3625_s17 = scalar_lea.hbm %s3955_s5, %s2154_s28  ;;  %s2962_s3 = scalar_lea.hbm %s3955_s5, 32 }
 0x1a0   : > { %s2957_s6 = scalar_lea.hbm %s3625_s17, 16  ;;  %p2963_p5 = scmp.lt.u32.totalorder %s3625_s17, %s3955_s5 }
 0x1a1   : > { %p2958_p10 = scmp.ne.s32.totalorder %s3625_s17, %s2957_s6  ;;  %p2964_p7 = scmp.lt.u32.totalorder %s2962_s3, %s2957_s6 }
 0x1a2   : > { %p2966_p4 = scmp.lt.u32.totalorder %s2957_s6, %s3625_s17 }
 0x1a3   : > { %p2960_p11 = pnand %p2958_p10, %p2929_p8  ;;  %p2965_p9 = por %p2964_p7, %p2963_p5 }
 0x1a5   : > { %p2961_p3 = pneg %p2960_p11  ;;  %p2967_p1 = por %p2966_p4, %p2965_p9 }
 0x1a7   : > { %p2968_p13 = pnand %p2967_p1, %p2961_p3 }
 0x1a9   : > { %2971 = shalt.err (!%p2968_p13)
}
 0x1aa   : > { %s2972_s28 = scalar_lea.vmem %s627_s21, 16  ;;  %s3108_s23 = smov [#allocation5]  }
 0x1ab   : > { %p2973_p0 = scmp.ne.s32.totalorder %s627_s21, %s2972_s28  ;;  %s2977_s30 = sshll.u32 %s3108_s23, 4  ;;  %s2978_s30 = int_to_ptr.vmem [resolvable:$false] %s2977_s30 }
 0x1ac   : > { %s2979_s16 = scalar_lea.vmem %s2978_s30, 32  ;;  %p2980_p11 = scmp.lt.s32.totalorder %s627_s21, %s2978_s30 }
 0x1ad   : > { %p2975_p2 = pnand %p2973_p0, %p2929_p8  ;;  %p2981_p6 = scmp.lt.s32.totalorder %s2979_s16, %s2972_s28 }
 0x1af   : > { %p2976_p10 = pneg %p2975_p2  ;;  %p2982_p5 = por %p2981_p6, %p2980_p11 }
 0x1b1   : > { %p2983_p7 = pnand %p2982_p5, %p2976_p10 }
 0x1b3   : > { %2986 = shalt.err (!%p2983_p7)
}
 0x1b4   : > { %2421 = dma.hbm_to_vmem [thread:$0]  (!%p3589_p12), %s3625_s17, 16, %s627_s21, %s617_s26  }
 0x1b5   : > { %s3957_s6 = sld [smem:[#allocation44_spill]] }
 0x1bb   : > { %p3958_p3 = scmp.ne.s32.totalorder %s3957_s6, 0 }
 0x1bc   : > { %s3959_s22 = sld [smem:[#allocation41_spill]] (!%p3958_p3)  ;;  %p3960_p6 = scmp.ne.s32.totalorder (!%p3958_p3), %s3950_s18, 0 }
 0x1bd   : > { %635 = sbr.rel (%p3958_p3) target bundleno = 3037 (0xbdd), region = 84 }
 0x1c2   : > { %s3651_s29 = sand.u32 (!%p3958_p3), 1, %s3959_s22  }
 0x1c3   : > { %s2156_s3 = sshll.u32 (!%p3958_p3), %s3651_s29, 3  ;;  %s638_s4 = scalar_lea.sflag (!%p3958_p3), [#allocation3], %s3651_s29 }
 0x1c4   : > { %s3657_s1 = scalar_lea.vmem [#allocation2], %s2156_s3 }
 0x1c5   : > { %3032 = dma.done.wait (%p3960_p6), %s638_s4, 128  }
 0x1c6   : > { %3034 = vsyncadd (%p3960_p6), %s638_s4, 4294967168  ;;  %s3961_s25 = sld [smem:[#allocation43_spill]]  ;;  %s649_s26 = scalar_lea.vmem [#allocation5], %s3651_s29 }
 0x1cc   : > { %s646_s21 = sand.u32 1, %s3961_s25  }
 0x1cd   : > { %s647_s17 = scalar_lea.sflag [#allocation6], %s646_s21 }
 0x1ce   : > { %3036 = dma.done.wait (%p3960_p6), %s647_s17, 16  }
 0x1cf   : > { %3038 = vsyncadd (%p3960_p6), %s647_s17, 4294967280  ;;  %p3962_p12 = scmp.eq.s32.totalorder %s3961_s25, 0 }
 0x1d1   : > { %3040 = dma.done.wait (%p3962_p12), [#allocation6], 16   ;;  %p3963_p8 = pmov %p3962_p12 }
 0x1d3   : > { %3042 = vsyncadd (%p3963_p8), [#allocation6], 4294967280  ;;  %p3964_p9 = pmov %p3963_p8 }
 0x1d4   : > { %p3965_p4 = pmov %p3963_p8 }
 0x1d5   : > { %3044 = dma.done.wait (%p3964_p9), [#allocation9], 272  }
 0x1d6   : > { %3046 = vsyncadd (%p3965_p4), [#allocation9], 4294967024  ;;  %p3966_p1 = pmov %p3965_p4 }
 0x1d8   : > { %3048 = dma.done.wait (%p3966_p1), [#allocation12], 512   ;;  %p3967_p13 = pmov %p3966_p1 }
 0x1d9   : > { %p3968_p0 = pmov %p3966_p1 }
 0x1da   : > { %3050 = vsyncadd (%p3967_p13), [#allocation12], 4294966784 }
 0x1db   : > { %3052 = dma.done.wait (%p3968_p0), [#allocation15], 272   ;;  %p3969_p2 = pmov %p3968_p0 }
 0x1dc   : > { %p3970_p10 = pmov %p3968_p0 }
 0x1dd   : > { %3054 = vsyncadd (%p3969_p2), [#allocation15], 4294967024 }
 0x1de   : > { %3056 = dma.done.wait (%p3970_p10), [#allocation18], 272   ;;  %p3971_p11 = pmov %p3968_p0 }
 0x1df   : > { %p3972_p5 = pmov %p3968_p0 }
 0x1e0   : > { %3058 = vsyncadd (%p3971_p11), [#allocation18], 4294967024 }
 0x1e1   : > { %3060 = dma.done.wait (%p3972_p5), [#allocation21], 272   ;;  %p3973_p7 = pmov %p3968_p0 }
 0x1e2   : > { %p3974_p3 = pmov %p3968_p0 }
 0x1e3   : > { %3062 = vsyncadd (%p3973_p7), [#allocation21], 4294967024 }
 0x1e4   : > { %3064 = dma.done.wait (%p3974_p3), [#allocation24], 32   ;;  %p3975_p6 = pmov %p3968_p0 }
 0x1e5   : > { %p3976_p12 = pmov %p3968_p0 }
 0x1e6   : > { %3066 = vsyncadd (%p3975_p6), [#allocation24], 4294967264 }
 0x1e7   : > { %3068 = dma.done.wait (%p3976_p12), [#allocation27], 16   ;;  %p3977_p8 = pmov %p3968_p0 }
 0x1e8   : > { %v3109_v0 = vmov 0.0   ;;  %vm3110_vm0 = vmmov 0   ;;  %v2511_v1 = vld [vmem:[#allocation11] sm:$0xff]   ;;  %v2512_v2 = vld [vmem:[#allocation10] sm:$0xff]   ;;  %v2513_v3 = vld [vmem:[#allocation11 + $0x8] sm:$0xff]   ;;  %vm777_vm1 = vcmask 261120   ;;  %v942_v20 = vlaneseq }
 0x1e9   : > { %3070 = vsyncadd (%p3977_p8), [#allocation27], 4294967280  ;;  %2246 = vmatprep.subr.bf16.mxu1 %v3109_v0  ;;  %2238 = vmatprep.subr.bf16.mxu0 %v3109_v0  ;;  %v2514_v4 = vld [vmem:[#allocation10 + $0x8] sm:$0xff]   ;;  %v2515_v7 = vld [vmem:[#allocation13] sm:$0xff]   ;;  %s3111_s18 = smov 112   ;;  %vm1298_vm2 = vcmask 130048  }
 0x1ea   : > { %2250 = vmatprep.mubr.msk.bf16.mxu1 %vm3110_vm0, %v3109_v0  ;;  %2242 = vmatprep.mubr.msk.bf16.mxu0 %vm3110_vm0, %v3109_v0  ;;  %v3710_v5 = vld [vmem:[%s3657_s1] sm:$0xff]  ;;  %v3112_v18 = vmov 1983009808   ;;  %v3729_v22 = vshrl.u32 %v942_v20, 7  ;;  %v3113_v23 = vmov 1934713408  }
 0x1eb   : > { %2247 = vmatpush3.bf16.msra.mxu1 %v2511_v1  ;;  %2239 = vmatpush3.bf16.msra.mxu0 %v2512_v2  ;;  %v760_v6 = vpack.c.bf16 %v3710_v5, %v3710_v5  ;;  %v2516_v8 = vld [vmem:[#allocation13 + $0x8] sm:$0xff]   ;;  %v940_v19 = vunpack.c.l.s4 %v3112_v18  ;;  %v971_v24 = vunpack.c.l.s4 %v3113_v23  ;;  %vm1401_vm5 = vcmask 64512   ;;  %s3115_s28 = smov 16   ;;  %s2209_s23 = sshll.u32 %s3961_s25, 7 }
 0x1ec   : > { %2248 = vmatprep.subr.bf16.mxu1 %v3109_v0  ;;  %2240 = vmatprep.subr.bf16.mxu0 %v3109_v0  ;;  %vm1431_vm6 = vcmask 1043456   ;;  %s757_s30 = scalar_lea.vmem [#allocation28], %s2156_s3  ;;  %s3978_s4 = sld [smem:[#allocation52_spill]] }
 0x1ed   : > { %v941_v21 = vunpack.c.0.s8 %v940_v19  ;;  %v972_v26 = vunpack.c.0.s8 %v971_v24  ;;  %s1912_s16 = sshll.u32 %s757_s30, 4  ;;  %s1899_s21 = scalar_lea.sflag [#allocation4], %s3651_s29  ;;  %s3850_s16 = int_to_ptr.vmem [resolvable:$true] %s1912_s16 }
 0x1ee   : > { %s2987_s17 = scalar_lea.vmem %s3850_s16, 128  ;;  %p3979_p4 = scmp.ne.s32.totalorder %s3951_s19, 0 }
 0x1ef   : > { %2249 = vmatpush3.bf16.msra.mxu1 %v2513_v3  ;;  %2241 = vmatpush3.bf16.msra.mxu0 %v2514_v4  ;;  %v3732_v25 = vsub.s32 %v941_v21, %v3729_v22  ;;  %v3737_v30 = vsub.s32 %v972_v26, %v3729_v22  ;;  %p2988_p9 = scmp.ne.s32.totalorder %s3850_s16, %s2987_s17  ;;  %s3116_s3 = smov [#allocation28]  }
 0x1f0   : > { %2262 = vmatprep.subr.bf16.mxu1 %v3109_v0  ;;  %2254 = vmatprep.subr.bf16.mxu0 %v3109_v0  ;;  %s2991_s25 = sshll.u32 %s3116_s3, 4  ;;  %s2992_s25 = int_to_ptr.vmem [resolvable:$false] %s2991_s25 }
 0x1f1   : > { %p2989_p1 = pnand %p2988_p9, %p3979_p4  ;;  %p2994_p0 = scmp.lt.s32.totalorder %s3850_s16, %s2992_s25 }
 0x1f2   : > { %2251 = vmatmul.mubr.msk.bf16.vlgmr.msra.gmra.mrb[0].mxu1 %vm777_vm1, %v760_v6  ;;  %2243 = vmatmul.mubr.msk.bf16.vlgmr.msra.gmra.mrb[0].mxu0 %vm777_vm1, %v760_v6  ;;  %s3848_s1 = scalar_lea.hbm %s3978_s4, %s2209_s23 }
 0x1f3   : > { %2264 = vmatprep.mubr.msk.bf16.mxu1 %vm3110_vm0, %v3109_v0  ;;  %2258 = vmatprep.mubr.msk.bf16.mxu0 %vm3110_vm0, %v3109_v0  ;;  %p2990_p13 = pneg %p2989_p1 }
 0x1f4   : > { %2255 = vmatpush3.bf16.msra.mxu0 %v2515_v7 }
 0x1f5   : > { %2256 = vmatprep.subr.bf16.mxu0 %v3109_v0 }
 0x1f8   : > { %2257 = vmatpush3.bf16.msra.mxu0 %v2516_v8 }
 0x1f9   : > { %2268 = vmatprep.subr.bf16.mxu0 %v3109_v0 }
 0x1fb   : > { %2259 = vmatmul.mubr.msk.bf16.vlgmr.msra.gmra.mrb[4].mxu0 %vm777_vm1, %v760_v6 }
 0x1fc   : > { %2270 = vmatprep.mubr.msk.bf16.mxu0 %vm3110_vm0, %v3109_v0 }
 0x2c5   : > { %v871_v9 = vpop.f32.mrb[0].mxu1  ;;  %v815_v11 = vpop.f32.mrb[0].mxu0 }
 0x2c6   : > { %1055 = vrot.lane.b32.xlu0 %v871_v9, %s3111_s18  ;;  %v2252_v10 = vpop.f32.mrb[1].mxu1  ;;  %v933_v12 = vmul.f32 0.25, %v815_v11  ;;  %v2244_v14 = vpop.f32.mrb[1].mxu0  ;;  %v1058_v27 = vcombine.high %v871_v9, %v3109_v0  ;;  %v1065_v29 = vrot.slane %v871_v9, %v3732_v25 }
 0x2c7   : > { %v874_v13 = vpop.f32.mrb[2].mxu1  ;;  %v818_v16 = vpop.f32.mrb[2].mxu0 }
 0x2c8   : > { %v2253_v15 = vpop.f32.mrb[3].mxu1  ;;  %v2245_v17 = vpop.f32.mrb[3].mxu0  ;;  %v1072_v33 = vrot.slane %v1058_v27, %v3732_v25  ;;  %v938_v37 = vcombine.high %v933_v12, %v3109_v0  ;;  %v945_v43 = vrot.slane %v933_v12, %v3732_v25 }
 0x2ca   : > { %935 = vrot.lane.b32.xlu0 %v933_v12, %s3111_s18  ;;  %v952_v50 = vrot.slane %v938_v37, %v3732_v25  ;;  %v1391_v37 = vld [vmem:[%s649_s26] sm:$0x1]  ;;  %s2993_s26 = scalar_lea.vmem %s2992_s25, 256 }
 0x2cb   : > { %vm1392_vm3 = vcmp.gt.f32.partialorder %v1391_v37, 0.0  ;;  %p2995_p2 = scmp.lt.s32.totalorder %s2993_s26, %s2987_s17 }
 0x2cd   : > { %p2996_p10 = por %p2995_p2, %p2994_p0 }
 0x2cf   : > { %p2997_p11 = pnand %p2996_p10, %p2990_p13 }
 0x338   : > { %v1056_v28 = vpop.permute.xlu0 %1055 }
 0x339   : > { %v1073_v31 = vcombine.high %v1056_v28, %v3109_v0  ;;  %v1080_v32 = vrot.slane %v1056_v28, %v3732_v25 }
 0x33b   : > { %v1087_v34 = vrot.slane %v1073_v31, %v3732_v25  ;;  %v1088_v35 = vcombine.low %v1065_v29, %v1080_v32  ;;  %v1089_v36 = vcombine.high %v1065_v29, %v1080_v32 }
 0x33c   : > { %v936_v38 = vpop.permute.xlu0 %935 }
 0x33d   : > { %v1096_v39 = vrot.slane %v1088_v35, %v3737_v30  ;;  %v1103_v40 = vrot.slane %v1089_v36, %v3737_v30  ;;  %v1104_v41 = vcombine.low %v1072_v33, %v1087_v34  ;;  %v1105_v42 = vcombine.high %v1072_v33, %v1087_v34  ;;  %v927_v33 = vpop.f32.mrb[4].mxu0 }
 0x33e   : > { %v953_v44 = vcombine.high %v936_v38, %v3109_v0  ;;  %v960_v45 = vrot.slane %v936_v38, %v3732_v25  ;;  %v2260_v34 = vpop.f32.mrb[5].mxu0  ;;  %v1396_v38 = vsub.s32 0, %v3729_v22 }
 0x33f   : > { %v1112_v46 = vrot.slane %v1104_v41, %v3737_v30  ;;  %v1119_v47 = vrot.slane %v1105_v42, %v3737_v30  ;;  %v1124_v48 = vcombine.low %v1096_v39, %v1103_v40  ;;  %v2183_v49 = vcombine.high %v1096_v39, %v1103_v40  ;;  %v930_v35 = vpop.f32.mrb[6].mxu0 }
 0x340   : > { %v967_v51 = vrot.slane %v953_v44, %v3732_v25  ;;  %v968_v52 = vcombine.low %v945_v43, %v960_v45  ;;  %v969_v53 = vcombine.high %v945_v43, %v960_v45  ;;  %v2261_v36 = vpop.f32.mrb[7].mxu0  ;;  %v3114_v39 = vmov 0  }
 0x341   : > { %v1131_v54 = vrot.slane %v1124_v48, %v3732_v25  ;;  %v1139_v55 = vrot.slane %v2183_v49, %v3732_v25  ;;  %v1140_v56 = vcombine.low %v1112_v46, %v1119_v47  ;;  %v2184_v57 = vcombine.high %v1112_v46, %v1119_v47 }
 0x342   : > { %v976_v58 = vrot.slane %v968_v52, %v3737_v30  ;;  %v983_v59 = vrot.slane %v969_v53, %v3737_v30  ;;  %v984_v60 = vcombine.low %v952_v50, %v967_v51  ;;  %v985_v61 = vcombine.high %v952_v50, %v967_v51 }
 0x343   : > { %v1147_v62 = vrot.slane %v1140_v56, %v3732_v25  ;;  %v1155_v63 = vrot.slane %v2184_v57, %v3732_v25  ;;  %v1156_v1 = vcombine.low %v1131_v54, %v1139_v55  ;;  %v1393_v40 = vsel %vm1392_vm3, 1, %v3114_v39 }
 0x344   : > { %v992_v2 = vrot.slane %v984_v60, %v3737_v30  ;;  %v999_v3 = vrot.slane %v985_v61, %v3737_v30  ;;  %v1004_v4 = vcombine.low %v976_v58, %v983_v59  ;;  %v2181_v6 = vcombine.high %v976_v58, %v983_v59 }
 0x345   : > { %v1164_v7 = vcombine.low %v1147_v62, %v1155_v63  ;;  %v1163_v12 = vrot.slane %v1156_v1, %v3737_v30  ;;  %v1397_v41 = vrot.slane %v1393_v40, %v1396_v38  ;;  %v1178_v1 = vcombine.high %v927_v33, %v3109_v0 }
 0x346   : > { %v1011_v8 = vrot.slane %v1004_v4, %v3732_v25  ;;  %v1019_v9 = vrot.slane %v2181_v6, %v3732_v25  ;;  %v1020_v10 = vcombine.low %v992_v2, %v999_v3  ;;  %v2182_v11 = vcombine.high %v992_v2, %v999_v3 }
 0x347   : > { %v1171_v13 = vrot.slane %v1164_v7, %v3737_v30  ;;  %vm1398_vm4 = vcmp.eq.s32.totalorder %v1397_v41, 1  ;;  %v1185_v3 = vrot.slane %v927_v33, %v3732_v25 }
 0x348   : > { %v1027_v14 = vrot.slane %v1020_v10, %v3732_v25  ;;  %v1035_v15 = vrot.slane %v2182_v11, %v3732_v25  ;;  %v1036_v16 = vcombine.low %v1011_v8, %v1019_v9  ;;  %v1192_v8 = vrot.slane %v1178_v1, %v3732_v25 }
 0x349   : > { %v1172_v17 = vcombine.low %v1163_v12, %v1171_v13  ;;  %v1173_v18 = vcombine.high %v1163_v12, %v1171_v13 }
 0x34a   : > { %v1044_v19 = vcombine.low %v1027_v14, %v1035_v15  ;;  %v1043_v24 = vrot.slane %v1036_v16, %v3737_v30 }
 0x34b   : > { %v1296_v20 = vpack.c.bf16 %v1172_v17, %v1172_v17  ;;  %v1297_v21 = vpack.c.bf16 %v1173_v18, %v1173_v18 }
 0x34c   : > { %v1051_v23 = vrot.slane %v1044_v19, %v3737_v30 }
 0x34d   : > { %v1303_v26 = vsel %vm1298_vm2, %v1296_v20, 0  ;;  %v1349_v27 = vsel %vm1298_vm2, %v1297_v21, 0 }
 0x34e   : > { %2263 = vmatpush3.bf16.xpose.msra.mxu1 %v1303_v26  ;;  %2269 = vmatpush3.bf16.xpose.msra.mxu0 %v1349_v27  ;;  %v1052_v28 = vcombine.low %v1043_v24, %v1051_v23  ;;  %v1053_v29 = vcombine.high %v1043_v24, %v1051_v23 }
 0x34f   : > { %2274 = vmatprep.subr.bf16.mxu1 %v3109_v0  ;;  %2280 = vmatprep.subr.bf16.mxu0 %v3109_v0 }
 0x350   : > { %v1294_v31 = vpack.c.bf16 %v1052_v28, %v1052_v28  ;;  %v1295_v32 = vpack.c.bf16 %v1053_v29, %v1053_v29 }
 0x355   : > { %2265 = vmatmul.mubr.msk.bf16.vlgmr.msra.gmra.mrb[4].mxu1 %vm1298_vm2, %v1294_v31  ;;  %2271 = vmatmul.mubr.msk.bf16.vlgmr.msra.gmra.mrb[8].mxu0 %vm1298_vm2, %v1295_v32 }
 0x356   : > { %2276 = vmatprep.mubr.msk.bf16.mxu1 %vm3110_vm0, %v3109_v0  ;;  %2282 = vmatprep.mubr.msk.bf16.mxu0 %vm3110_vm0, %v3109_v0 }
 0x428   : > { %v1339_v42 = vpop.f32.mrb[4].mxu1  ;;  %v1385_v43 = vpop.f32.mrb[8].mxu0 }
 0x429   : > { %v1399_v44 = vsel %vm1398_vm4, %v1339_v42, -1e+09  ;;  %v2266_v45 = vpop.f32.mrb[5].mxu1  ;;  %v2272_v46 = vpop.f32.mrb[9].mxu0  ;;  %v1400_v50 = vsel %vm1398_vm4, %v1385_v43, -1e+09 }
 0x42a   : > { %v1342_v47 = vpop.f32.mrb[6].mxu1  ;;  %v1388_v48 = vpop.f32.mrb[10].mxu0  ;;  %v1402_v49 = vsel %vm1401_vm5, %v1399_v44, -inf  ;;  %v1405_v22 = vsel %vm1401_vm5, %v1400_v50, -inf  ;;  %v2517_v45 = vld [vmem:[#allocation14] sm:$0xff]  }
 0x42b   : > { %1403 = vmax.xlane.f32.xlu1 %v1402_v49  ;;  %v2267_v51 = vpop.f32.mrb[7].mxu1  ;;  %v2273_v52 = vpop.f32.mrb[11].mxu0 }
 0x42f   : > { %1406 = vmax.xlane.f32.xlu1 %v1405_v22 }
 0x4b8   : > { %v1404_v53 = vpop.xlane.xlu1 %1403 }
 0x4b9   : > { %v1408_v54 = vsub.f32 %v1399_v44, %v1404_v53 }
 0x4bb   : > { %v1410_v55 = vmul.f32 1.442695, %v1408_v54 }
 0x4bc   : > { %v1407_v56 = vpop.xlane.xlu1 %1406 }
 0x4bd   : > { %2523 = vpow2.f32 %v1410_v55  ;;  %v1409_v57 = vsub.f32 %v1400_v50, %v1407_v56 }
 0x4bf   : > { %v1412_v58 = vmul.f32 1.442695, %v1409_v57 }
 0x4c1   : > { %2525 = vpow2.f32 %v1412_v58 }
 0x4c7   : > { %v2524_v59 = vpop.eup %2523 }
 0x4c8   : > { %v1414_v60 = vsel %vm1401_vm5, %v2524_v59, 0.0 }
 0x4c9   : > { %1415 = vadd.xlane.f32.xlu0 %v1414_v60 }
 0x4cb   : > { %v2526_v61 = vpop.eup %2525 }
 0x4cc   : > { %v1417_v62 = vsel %vm1401_vm5, %v2526_v61, 0.0 }
 0x4cd   : > { %1418 = vadd.xlane.f32.xlu1 %v1417_v62 }
 0x4de   : > { %1175 = vrot.lane.b32.xlu1 %v927_v33, %s3111_s18 }
 0x556   : > { %v1416_v4 = vpop.xlane.xlu0 %1415 }
 0x557   : > { %2527 = vrcp.f32 %v1416_v4 }
 0x55a   : > { %v1419_v63 = vpop.xlane.xlu1 %1418 }
 0x55b   : > { %2529 = vrcp.f32 %v1419_v63 }
 0x55e   : > { %v1176_v2 = vpop.permute.xlu1 %1175 }
 0x55f   : > { %v1193_v6 = vcombine.high %v1176_v2, %v3109_v0  ;;  %v1200_v7 = vrot.slane %v1176_v2, %v3732_v25  ;;  %v2518_v2 = vld [vmem:[#allocation14 + $0x8] sm:$0xff]  }
 0x561   : > { %v1207_v9 = vrot.slane %v1193_v6, %v3732_v25  ;;  %v1208_v10 = vcombine.low %v1185_v3, %v1200_v7  ;;  %v1209_v11 = vcombine.high %v1185_v3, %v1200_v7  ;;  %v2528_v31 = vpop.eup %2527 }
 0x562   : > { %v1422_v37 = vmul.f32 %v2528_v31, %v2524_v59 }
 0x563   : > { %v1216_v12 = vrot.slane %v1208_v10, %v3737_v30  ;;  %v1223_v13 = vrot.slane %v1209_v11, %v3737_v30  ;;  %v1224_v14 = vcombine.low %v1192_v8, %v1207_v9  ;;  %v1225_v15 = vcombine.high %v1192_v8, %v1207_v9 }
 0x564   : > { %v1424_v43 = vpack.c.bf16 %v1422_v37, %v1422_v37 }
 0x565   : > { %v1232_v16 = vrot.slane %v1224_v14, %v3737_v30  ;;  %v1239_v17 = vrot.slane %v1225_v15, %v3737_v30  ;;  %v1244_v18 = vcombine.low %v1216_v12, %v1223_v13  ;;  %v2185_v19 = vcombine.high %v1216_v12, %v1223_v13  ;;  %v2530_v34 = vpop.eup %2529 }
 0x566   : > { %v1423_v38 = vmul.f32 %v2530_v34, %v2526_v61 }
 0x567   : > { %v1251_v20 = vrot.slane %v1244_v18, %v3732_v25  ;;  %v1259_v21 = vrot.slane %v2185_v19, %v3732_v25  ;;  %v1260_v23 = vcombine.low %v1232_v16, %v1239_v17  ;;  %v2186_v24 = vcombine.high %v1232_v16, %v1239_v17 }
 0x568   : > { %v1425_v44 = vpack.c.bf16 %v1423_v38, %v1423_v38 }
 0x569   : > { %v1267_v26 = vrot.slane %v1260_v23, %v3732_v25  ;;  %v1275_v27 = vrot.slane %v2186_v24, %v3732_v25  ;;  %v1276_v28 = vcombine.low %v1251_v20, %v1259_v21 }
 0x56b   : > { %v1284_v29 = vcombine.low %v1267_v26, %v1275_v27  ;;  %v1283_v32 = vrot.slane %v1276_v28, %v3737_v30 }
 0x56d   : > { %v1291_v33 = vrot.slane %v1284_v29, %v3737_v30 }
 0x56f   : > { %v1292_v35 = vcombine.low %v1283_v32, %v1291_v33  ;;  %v1293_v36 = vcombine.high %v1283_v32, %v1291_v33 }
 0x571   : > { %v1426_v39 = vpack.c.bf16 %v1292_v35, %v1292_v35  ;;  %v1427_v40 = vpack.c.bf16 %v1293_v36, %v1293_v36  ;;  %v2519_v35 = vld [vmem:[#allocation19] sm:$0xff]   ;;  %v2520_v36 = vld [vmem:[#allocation19 + $0x8] sm:$0xff]  }
 0x573   : > { %v1433_v41 = vsel %vm1431_vm6, %v1426_v39, 0  ;;  %v1479_v42 = vsel %vm1431_vm6, %v1427_v40, 0  ;;  %v2196_v40 = vld [vmem:[#allocation16] ss:$0 sm:$0xff] }
 0x574   : > { %2275 = vmatpush3.bf16.msra.mxu1 %v1433_v41  ;;  %2281 = vmatpush3.bf16.msra.mxu0 %v1479_v42  ;;  %v2197_v42 = vld [vmem:[#allocation17] ss:$0 sm:$0xff] }
 0x575   : > { %2286 = vmatprep.subr.bf16.mxu1 %v3109_v0  ;;  %2294 = vmatprep.subr.bf16.mxu0 %v3109_v0 }
 0x577   : > { %2277 = vmatmul.mubr.msk.bf16.vlgmr.msra.gmra.mrb[8].mxu1 %vm1401_vm5, %v1424_v43  ;;  %2283 = vmatmul.mubr.msk.bf16.vlgmr.msra.gmra.mrb[12].mxu0 %vm1401_vm5, %v1425_v44 }
 0x578   : > { %2290 = vmatprep.mubr.msk.bf16.mxu1 %vm3110_vm0, %v3109_v0  ;;  %2298 = vmatprep.mubr.msk.bf16.mxu0 %vm3110_vm0, %v3109_v0 }
 0x579   : > { %2287 = vmatpush3.bf16.msra.mxu1 %v2517_v45  ;;  %2295 = vmatpush3.bf16.msra.mxu0 %v2519_v35 }
 0x57a   : > { %2288 = vmatprep.subr.bf16.mxu1 %v3109_v0  ;;  %2296 = vmatprep.subr.bf16.mxu0 %v3109_v0 }
 0x57d   : > { %2289 = vmatpush3.bf16.msra.mxu1 %v2518_v2  ;;  %2297 = vmatpush3.bf16.msra.mxu0 %v2520_v36 }
 0x57e   : > { %2302 = vmatprep.subr.bf16.mxu1 %v3109_v0 }
 0x64a   : > { %v1469_v46 = vpop.f32.mrb[8].mxu1  ;;  %v1515_v47 = vpop.f32.mrb[12].mxu0 }
 0x64b   : > { %v1521_v48 = vcombine.high %v1469_v46, %v3109_v0  ;;  %v1528_v49 = vrot.slane %v1469_v46, %v3732_v25  ;;  %v1536_v50 = vcombine.high %v1515_v47, %v3109_v0  ;;  %v1543_v51 = vrot.slane %v1515_v47, %v3732_v25  ;;  %v2278_v52 = vpop.f32.mrb[9].mxu1  ;;  %v2284_v22 = vpop.f32.mrb[13].mxu0  ;;  %v2521_v46 = vld [vmem:[#allocation22] sm:$0xff]   ;;  %v2522_v47 = vld [vmem:[#allocation22 + $0x8] sm:$0xff]  }
 0x64c   : > { %v1472_v53 = vpop.f32.mrb[10].mxu1  ;;  %v1518_v54 = vpop.f32.mrb[14].mxu0 }
 0x64d   : > { %v1535_v55 = vrot.slane %v1521_v48, %v3732_v25  ;;  %v1550_v56 = vrot.slane %v1536_v50, %v3732_v25  ;;  %v1551_v57 = vcombine.low %v1528_v49, %v1543_v51  ;;  %v1552_v58 = vcombine.high %v1528_v49, %v1543_v51  ;;  %v2279_v59 = vpop.f32.mrb[11].mxu1  ;;  %v2285_v60 = vpop.f32.mrb[15].mxu0  ;;  %v2198_v48 = vld [vmem:[#allocation20] ss:$0 sm:$0xff] }
 0x64f   : > { %v1559_v61 = vrot.slane %v1551_v57, %v3737_v30  ;;  %v1566_v62 = vrot.slane %v1552_v58, %v3737_v30  ;;  %v1567_v63 = vcombine.low %v1535_v55, %v1550_v56  ;;  %v1568_v1 = vcombine.high %v1535_v55, %v1550_v56  ;;  %v2202_v55 = vld [vmem:[#allocation23] ss:$0 sm:$0xff] }
 0x651   : > { %v1575_v3 = vrot.slane %v1567_v63, %v3737_v30  ;;  %v1582_v4 = vrot.slane %v1568_v1, %v3737_v30  ;;  %v1587_v6 = vcombine.low %v1559_v61, %v1566_v62  ;;  %v2191_v7 = vcombine.high %v1559_v61, %v1566_v62 }
 0x653   : > { %v1594_v8 = vrot.slane %v1587_v6, %v3732_v25  ;;  %v1602_v9 = vrot.slane %v2191_v7, %v3732_v25  ;;  %v1603_v10 = vcombine.low %v1575_v3, %v1582_v4  ;;  %v2192_v11 = vcombine.high %v1575_v3, %v1582_v4 }
 0x655   : > { %v1610_v12 = vrot.slane %v1603_v10, %v3732_v25  ;;  %v1618_v13 = vrot.slane %v2192_v11, %v3732_v25  ;;  %v1619_v14 = vcombine.low %v1594_v8, %v1602_v9  ;;  %v2206_v9 = vld [vmem:[#allocation25] ss:$0 sm:$0xff]  ;;  %v2207_v11 = vld [vmem:[#allocation26] ss:$0 sm:$0xff] }
 0x657   : > { %v1627_v15 = vcombine.low %v1610_v12, %v1618_v13  ;;  %v1626_v16 = vrot.slane %v1619_v14, %v3737_v30 }
 0x659   : > { %v1634_v17 = vrot.slane %v1627_v15, %v3737_v30 }
 0x65b   : > { %v1636_v18 = vcombine.high %v1626_v16, %v1634_v17  ;;  %v1635_v19 = vcombine.low %v1626_v16, %v1634_v17 }
 0x65d   : > { %1638 = vrot.lane.b32.xlu1 %v1636_v18, %s3115_s28 }
 0x6cf   : > { %v1639_v20 = vpop.permute.xlu1 %1638 }
 0x6d0   : > { %v1641_v21 = vsel %vm1298_vm2, %v1635_v19, %v1639_v20 }
 0x6d1   : > { %v1642_v23 = vpack.c.bf16 %v1641_v21, %v1641_v21 }
 0x6d3   : > { %2291 = vmatmul.mubr.msk.bf16.vlgmr.msra.gmra.mrb[12].mxu1 %vm777_vm1, %v1642_v23 }
 0x6d4   : > { %2306 = vmatprep.mubr.msk.bf16.mxu1 %vm3110_vm0, %v3109_v0  ;;  %2303 = vmatpush3.bf16.msra.mxu1 %v2521_v46 }
 0x6d5   : > { %2304 = vmatprep.subr.bf16.mxu1 %v3109_v0 }
 0x6d8   : > { %2305 = vmatpush3.bf16.msra.mxu1 %v2522_v47 }
 0x7a6   : > { %v1696_v25 = vpop.f32.mrb[12].mxu1 }
 0x7a7   : > { %v1697_v24 = vadd.f32 %v1696_v25, %v3710_v5  ;;  %v2292_v26 = vpop.f32.mrb[13].mxu1 }
 0x7a8   : > { %v1699_v27 = vpop.f32.mrb[14].mxu1 }
 0x7a9   : > { %v2293_v28 = vpop.f32.mrb[15].mxu1  ;;  %v1704_v30 = vsel %vm777_vm1, %v1697_v24, 0.0 }
 0x7aa   : > { %1705 = vadd.xlane.f32.xlu1 %v1704_v30 }
 0x837   : > { %v1706_v29 = vpop.xlane.xlu1 %1705 }
 0x838   : > { %v1708_v31 = vmul.f32 0.03125, %v1706_v29 }
 0x83a   : > { %v1709_v32 = vsub.f32 %v1697_v24, %v1708_v31 }
 0x83c   : > { %v1710_v33 = vmul.f32 %v1709_v32, %v1709_v32 }
 0x83e   : > { %v1711_v34 = vsel %vm777_vm1, %v1710_v33, 0.0 }
 0x83f   : > { %1712 = vadd.xlane.f32.xlu0 %v1711_v34 }
 0x8cc   : > { %v1713_v5 = vpop.xlane.xlu0 %1712 }
 0x8cd   : > { %v1714_v37 = vmul.f32 0.03125, %v1713_v5 }
 0x8cf   : > { %v1715_v38 = vadd.f32 1e-06, %v1714_v37 }
 0x8d1   : > { %2531 = vrsqrt.f32 %v1715_v38 }
 0x8db   : > { %v2532_v39 = vpop.eup %2531 }
 0x8dc   : > { %v1717_v41 = vmul.f32 %v2532_v39, %v1709_v32 }
 0x8de   : > { %v1724_v43 = vmul.f32 %v2196_v40, %v1717_v41 }
 0x8e0   : > { %v1731_v44 = vadd.f32 %v2197_v42, %v1724_v43 }
 0x8e2   : > { %v1732_v45 = vpack.c.bf16 %v1731_v44, %v1731_v44 }
 0x8e4   : > { %2299 = vmatmul.mubr.msk.bf16.vlgmr.msra.gmra.mrb[16].mxu0 %vm777_vm1, %v1732_v45 }
 0x9b7   : > { %v1793_v49 = vpop.f32.mrb[16].mxu0 }
 0x9b8   : > { %v1794_v50 = vadd.f32 %v2198_v48, %v1793_v49  ;;  %v2300_v51 = vpop.f32.mrb[17].mxu0 }
 0x9b9   : > { %v1796_v52 = vpop.f32.mrb[18].mxu0 }
 0x9ba   : > { %v1799_v22 = vmax.f32 %v1794_v50, 0.0  ;;  %v2301_v53 = vpop.f32.mrb[19].mxu0 }
 0x9bc   : > { %v1800_v54 = vpack.c.bf16 %v1799_v22, %v1799_v22 }
 0x9be   : > { %2307 = vmatmul.mubr.msk.bf16.vlgmr.msra.gmra.mrb[16].mxu1 %vm777_vm1, %v1800_v54 }
 0xa91   : > { %v1861_v56 = vpop.f32.mrb[16].mxu1 }
 0xa92   : > { %v1862_v57 = vadd.f32 %v2202_v55, %v1861_v56  ;;  %v2308_v58 = vpop.f32.mrb[17].mxu1 }
 0xa93   : > { %v1864_v59 = vpop.f32.mrb[18].mxu1 }
 0xa94   : > { %v2309_v60 = vpop.f32.mrb[19].mxu1  ;;  %v1867_v61 = vadd.f32 %v1862_v57, %v1731_v44 }
 0xa96   : > { %v1870_v0 = vsel %vm777_vm1, %v1867_v61, 0.0 }
 0xa97   : > { %1871 = vadd.xlane.f32.xlu0 %v1870_v0 }
 0xb24   : > { %v1872_v62 = vpop.xlane.xlu0 %1871 }
 0xb25   : > { %v1873_v63 = vmul.f32 0.03125, %v1872_v62 }
 0xb27   : > { %v1874_v1 = vsub.f32 %v1867_v61, %v1873_v63 }
 0xb29   : > { %v1875_v2 = vmul.f32 %v1874_v1, %v1874_v1 }
 0xb2b   : > { %v1876_v3 = vsel %vm777_vm1, %v1875_v2, 0.0 }
 0xb2c   : > { %1877 = vadd.xlane.f32.xlu0 %v1876_v3 }
 0xbb9   : > { %v1878_v4 = vpop.xlane.xlu0 %1877 }
 0xbba   : > { %v1879_v6 = vmul.f32 0.03125, %v1878_v4 }
 0xbbc   : > { %v1880_v7 = vadd.f32 1e-06, %v1879_v6 }
 0xbbe   : > { %2533 = vrsqrt.f32 %v1880_v7 }
 0xbc8   : > { %v2534_v8 = vpop.eup %2533 }
 0xbc9   : > { %v1882_v10 = vmul.f32 %v2534_v8, %v1874_v1 }
 0xbcb   : > { %v1889_v12 = vmul.f32 %v2206_v9, %v1882_v10 }
 0xbcd   : > { %v1896_v13 = vadd.f32 %v2207_v11, %v1889_v12 }
 0xbcf   : > { %1897 = vst.msk [vmem:[%s757_s30] sm:$0xff] %vm777_vm1, %v1896_v13 }
 0xbd0   : > { %3000 = shalt.err (!%p2997_p11)
}
 0xbd1   : > { %s3001_s29 = scalar_lea.hbm %s3848_s1, 128  ;;  %s3005_s23 = scalar_lea.hbm %s3978_s4, 256 }
 0xbd2   : > { %p3002_p5 = scmp.ne.s32.totalorder %s3848_s1, %s3001_s29  ;;  %p3006_p6 = scmp.lt.u32.totalorder %s3848_s1, %s3978_s4 }
 0xbd3   : > { %p3007_p12 = scmp.lt.u32.totalorder %s3005_s23, %s3001_s29  ;;  %p3009_p9 = scmp.lt.u32.totalorder %s3001_s29, %s3848_s1 }
 0xbd4   : > { %p3003_p7 = pnand %p3002_p5, %p3979_p4 }
 0xbd5   : > { %p3008_p8 = por %p3007_p12, %p3006_p6 }
 0xbd6   : > { %p3004_p3 = pneg %p3003_p7 }
 0xbd7   : > { %p3010_p1 = por %p3009_p9, %p3008_p8 }
 0xbd9   : > { %p3011_p13 = pnand %p3010_p1, %p3004_p3 }
 0xbdb   : > { %3014 = shalt.err (!%p3011_p13)
}
 0xbdc   : > { %2370 = dma.vmem_to_hbm [thread:$0]  (%p3979_p4), %s3850_s16, 128, %s3848_s1, %s1899_s21  }
 0xbdd PF: > { %s3980_s22 = sld [smem:[#allocation40_spill]]  ;;  %p3981_p0 = scmp.ne.s32.totalorder %s3952_s20, 0 }
 0xbde   : > { %p3982_p2 = scmp.ge.s32.totalorder %s3089_s24, 2 }
 0xbe0   : > { %p2423_p10 = pnand %p3982_p2, %p3981_p0 }
 0xbe3   : > { %s1924_s17 = sand.u32 1, %s3980_s22  }
 0xbe4   : > { %s1925_s3 = scalar_lea.sflag [#allocation4], %s1924_s17 }
 0xbe5   : > { %3072 = dma.done.wait (!%p2423_p10), %s1925_s3, 128  }
 0xbe6   : > { %3074 = vsyncadd (!%p2423_p10), %s1925_s3, 4294967168  ;;  %s3983_s21 = sld [smem:[#allocation41_spill]]  ;;  %s3984_s22 = sld [smem:[#allocation42_spill]] }
 0xbe7   : > { %p39_p11 = scmp.ge.s32.totalorder %s3542_s0, 4   ;;  %s3985_s23 = smov %s3553_s2 }
 0xbe8   : > { %s3986_s24 = smov %s3542_s0 }
 0xbe9   :  { %41 = sbr.rel (!%p39_p11) target bundleno = 23 (0x17), region = 198 }
 0xbf0   :  { %1930 = vsyncpa [#allocation3], 1 }
 0xbf1   :  { %1932 = vsyncpa [#allocation3 + $0x1], 1 }
 0xbf2   :  { %1933 = vsyncpa [#allocation6], 1 }
 0xbf3   :  { %1935 = vsyncpa [#allocation6 + $0x1], 1 }
 0xbf4   :  { %1936 = vsyncpa [#allocation9], 1 }
 0xbf5   :  { %1937 = vsyncpa [#allocation12], 1 }
 0xbf6   :  { %1938 = vsyncpa [#allocation15], 1 }
 0xbf7   :  { %1939 = vsyncpa [#allocation18], 1 }
 0xbf8   :  { %1940 = vsyncpa [#allocation21], 1 }
 0xbf9   :  { %1941 = vsyncpa [#allocation24], 1 }
 0xbfa   :  { %1942 = vsyncpa [#allocation27], 1 }
 0xbfb   :  { %1943 = vsyncpa [#allocation4], 1 }
 0xbfc   :  { %1945 = vsyncpa [#allocation4 + $0x1], 1 }

</bundles_post_ra>
